<compile_context>
chip_gen: v6e
topology: v6e:2x2x1
jax: 0.10.0
libtpu: 0.0.40
codegen_flags: <defaults>
</compile_context>

<pallas_src>
import jax
import jax.numpy as jnp
import numpy as np
from jax.experimental import pallas as pl
from jax.experimental.pallas import tpu as pltpu

# ---- model dims (from MLP_E.__init__) ----
NUM_FEATURES = 5000      # self.num_features
N_CODES = 3              # self.n_diagnosis_codes
EMB_SIZE = 8             # self.emb_size
HIDDEN = 16              # self.hidden_size
NUM_NEW_FEATURES = 256   # self.num_new_features (fc out / BN1 channels)
MLP1 = 256
MLP2 = 64
BN_EPS = 1e-5


def mlp_e_kernel(emb_ref, x_ref, wfcT_ref, bfc_ref,
                 w1r_ref, b1_ref, w2T_ref, b2_ref, w3T_ref, b3_ref,
                 out_ref):
    """Fused, batch-vectorized MLP_E forward (single grid step).

    emb_ref  : SMEM (8, 3) f32,   emb[e, c] = E[c, e]  (scalar reads)
    x_ref    : (3B, 5000) bf16,   x_rows[c*B + b, f] = x[b, f, c]
    wfcT_ref : (5000, 256) bf16   BN1-folded fc weight, (in, out)-major
    bfc_ref  : (1, 256) f32       BN1-folded fc bias
    w1r_ref  : (2048, 256) bf16   w1r[e*256 + n, m] = W1_eff[m, n*8 + e]  (BN2-folded)
    b1/w2T/b2/w3T/b3 : folded mlp params, (in, out)-major weights, f32
    out_ref  : (B, 16) f32
    """
    B = out_ref.shape[0]

    # fc for all (code, batch) rows in one MXU matmul: G[c*B+b, n] = sum_f x*Wfc_eff
    g = jnp.dot(x_ref[...], wfcT_ref[...],
                preferred_element_type=jnp.float32)          # (3B, 256) f32
    g0 = g[:B]                                               # code 0, (B, 256)
    g1 = g[B:2 * B]                                          # code 1
    g2 = g[2 * B:3 * B]                                      # code 2

    bfc = bfc_ref[...]                                       # (1, 256)
    # embedding mix: y_e[b,n] = sum_c E[c,e] * G[c,b,n]  -> 3 VPU FMAs per e
    acts = []
    for e in range(EMB_SIZE):                                # static, 8 iterations
        y_e = emb_ref[e, 0] * g0 + emb_ref[e, 1] * g1 + emb_ref[e, 2] * g2 + bfc
        acts.append(jnp.maximum(y_e, 0.0))                   # BN1-fold + ReLU
    # lane-dense concat -> (B, 2048); W1 was pre-permuted to match this layout
    a_cat = jnp.concatenate(acts, axis=-1)

    z1 = jnp.maximum(
        jnp.dot(a_cat.astype(jnp.bfloat16), w1r_ref[...],
                preferred_element_type=jnp.float32) + b1_ref[...], 0.0)   # (B, 256)
    z2 = jnp.maximum(
        jnp.dot(z1, w2T_ref[...], preferred_element_type=jnp.float32)
        + b2_ref[...], 0.0)                                               # (B, 64)
    z3 = jnp.maximum(
        jnp.dot(z2, w3T_ref[...], preferred_element_type=jnp.float32)
        + b3_ref[...], 0.0)                                               # (B, 16)
    out_ref[...] = z3


def _fold_bn(W, b, gamma, beta, mean, var):
    """Fold an eval-mode BatchNorm1d that follows Linear(W, b) into the Linear."""
    s = gamma / jnp.sqrt(var + BN_EPS)
    return W * s[:, None], s * (b - mean) + beta


def prepare_params(params):
    """One-time weight prep (outside the per-call jit): BN folding, (in,out)-major
    transposes, W1 flatten-order permute, and bf16 casts of the two large weights."""
    wfc_eff, bfc_eff = _fold_bn(params["Wfc"], params["bfc"], *params["bn1"])
    w1_eff, b1_eff = _fold_bn(params["W1"], params["b1"], *params["bn2"])
    w2_eff, b2_eff = _fold_bn(params["W2"], params["b2"], *params["bn3"])
    w3_eff, b3_eff = _fold_bn(params["W3"], params["b3"], *params["bn4"])

    # PyTorch flatten is n-major / e-minor; the kernel activation is e-major / n-minor:
    #   w1r[e*256 + n, m] = W1_eff[m, n*8 + e]
    w1r = jnp.transpose(w1_eff.reshape(MLP1, NUM_NEW_FEATURES, EMB_SIZE), (2, 1, 0))
    w1r = w1r.reshape(NUM_NEW_FEATURES * EMB_SIZE, MLP1)

    kp = dict(
        emb=params["E"].T.astype(jnp.float32),         # (8, 3) -> SMEM scalar table
        wfcT=wfc_eff.T.astype(jnp.bfloat16),           # (5000, 256)
        bfc=bfc_eff[None, :].astype(jnp.float32),      # (1, 256)
        w1r=w1r.astype(jnp.bfloat16),                  # (2048, 256)
        b1=b1_eff[None, :].astype(jnp.float32),
        w2T=w2_eff.T.astype(jnp.float32),
        b2=b2_eff[None, :].astype(jnp.float32),
        w3T=w3_eff.T.astype(jnp.float32),
        b3=b3_eff[None, :].astype(jnp.float32),
    )
    return jax.tree_util.tree_map(jax.block_until_ready, kp)


@jax.jit
def mlp_e_forward(x, kp):
    """x: (B, 5000, 3) float32, kp: prepare_params(...) output -> (B, 16) float32."""
    B = x.shape[0]
    # (B, 5000, 3) -> (3, B, 5000) -> (3B, 5000): code-major rows so the kernel can
    # take contiguous per-code (B, 256) slices of the fc output. Cast to bf16 (MXU-native).
    x_rows = jnp.transpose(x, (2, 0, 1)).reshape(N_CODES * B, NUM_FEATURES)
    x_rows = x_rows.astype(jnp.bfloat16)

    in_specs = [
        pl.BlockSpec(memory_space=pltpu.MemorySpace.SMEM),                  # emb (8,3)
        pl.BlockSpec((N_CODES * B, NUM_FEATURES), lambda i: (0, 0)),        # x_rows
        pl.BlockSpec((NUM_FEATURES, NUM_NEW_FEATURES), lambda i: (0, 0)),   # wfcT
        pl.BlockSpec((1, NUM_NEW_FEATURES), lambda i: (0, 0)),              # bfc
        pl.BlockSpec((NUM_NEW_FEATURES * EMB_SIZE, MLP1), lambda i: (0, 0)),  # w1r
        pl.BlockSpec((1, MLP1), lambda i: (0, 0)),                          # b1
        pl.BlockSpec((MLP1, MLP2), lambda i: (0, 0)),                       # w2T
        pl.BlockSpec((1, MLP2), lambda i: (0, 0)),                          # b2
        pl.BlockSpec((MLP2, HIDDEN), lambda i: (0, 0)),                     # w3T
        pl.BlockSpec((1, HIDDEN), lambda i: (0, 0)),                        # b3
    ]

    return pl.pallas_call(
        mlp_e_kernel,
        out_shape=jax.ShapeDtypeStruct((B, HIDDEN), jnp.float32),
        grid=(1,),
        in_specs=in_specs,
        out_specs=pl.BlockSpec((B, HIDDEN), lambda i: (0, 0)),
        compiler_params=pltpu.CompilerParams(
            dimension_semantics=("arbitrary",),      # memory-bound: keep on one core
            vmem_limit_bytes=24 * 1024 * 1024,       # working set ~4 MiB (x2 buffering)
        ),
    )(kp["emb"], x_rows, kp["wfcT"], kp["bfc"], kp["w1r"], kp["b1"],
      kp["w2T"], kp["b2"], kp["w3T"], kp["b3"])


# ---------------- deterministic synthetic parameters ----------------
def init_params(key):
    ks = jax.random.split(key, 9)

    # nn.Embedding(3, 8, padding_idx=-1, max_norm=1.0)
    E = jax.random.normal(ks[0], (N_CODES, EMB_SIZE), jnp.float32)
    E = E.at[N_CODES - 1].set(0.0)            # padding_idx=-1 -> last row zeroed at init
    norms = jnp.linalg.norm(E, axis=1, keepdims=True)
    E = E * jnp.minimum(1.0, 1.0 / jnp.maximum(norms, 1e-7))  # max_norm=1.0 at lookup

    def linear(k, out_dim, in_dim):
        kw, kb = jax.random.split(k)
        bound = 1.0 / np.sqrt(in_dim)
        W = jax.random.uniform(kw, (out_dim, in_dim), jnp.float32, -bound, bound)
        b = jax.random.uniform(kb, (out_dim,), jnp.float32, -bound, bound)
        return W, b

    def bn(k, dim):
        k1, k2, k3, k4 = jax.random.split(k, 4)
        gamma = jax.random.uniform(k1, (dim,), jnp.float32, 0.5, 1.5)
        beta = 0.1 * jax.random.normal(k2, (dim,), jnp.float32)
        mean = 0.1 * jax.random.normal(k3, (dim,), jnp.float32)
        var = jax.random.uniform(k4, (dim,), jnp.float32, 0.5, 1.5)
        return gamma, beta, mean, var

    Wfc, bfc = linear(ks[1], NUM_NEW_FEATURES, NUM_FEATURES)
    W1, b1 = linear(ks[2], MLP1, NUM_NEW_FEATURES * EMB_SIZE)
    W2, b2 = linear(ks[3], MLP2, MLP1)
    W3, b3 = linear(ks[4], HIDDEN, MLP2)
    return dict(
        E=E,
        Wfc=Wfc, bfc=bfc, bn1=bn(ks[5], NUM_NEW_FEATURES),
        W1=W1, b1=b1, bn2=bn(ks[6], MLP1),
        W2=W2, b2=b2, bn3=bn(ks[7], MLP2),
        W3=W3, b3=b3, bn4=bn(ks[8], HIDDEN),
    )


# ---------------- pure-JAX f32 reference following the PyTorch op order ----------------
def mlp_e_reference(x, p):
    B = x.shape[0]

    def bn_apply(z, stats, axis):
        g, beta, mu, var = stats
        shp = [1] * z.ndim
        shp[axis] = -1
        r = lambda a: a.reshape(shp)
        return r(g) * (z - r(mu)) / jnp.sqrt(r(var) + BN_EPS) + r(beta)

    H = jnp.einsum("bfc,ce->bfe", x, p["E"])                    # (x.unsqueeze(3)*weight).sum(2)
    Ht = jnp.transpose(H, (0, 2, 1))                            # (B, 8, 5000)
    Y = jnp.einsum("bef,nf->ben", Ht, p["Wfc"]) + p["bfc"]      # fc
    Yt = jnp.transpose(Y, (0, 2, 1))                            # (B, 256, 8)
    A = jax.nn.relu(bn_apply(Yt, p["bn1"], axis=1))
    flat = A.reshape(B, -1)                                     # (B, 2048)
    z = jax.nn.relu(bn_apply(flat @ p["W1"].T + p["b1"], p["bn2"], axis=1))
    z = jax.nn.relu(bn_apply(z @ p["W2"].T + p["b2"], p["bn3"], axis=1))
    z = jax.nn.relu(bn_apply(z @ p["W3"].T + p["b3"], p["bn4"], axis=1))
    return z


if __name__ == "__main__":
    B = 2
    # TODO(synk): MLP_E.forward reads self.attributions, which is never defined in
    # __init__; treated as None here (no attribution masking applied).
    params = init_params(jax.random.PRNGKey(42))
    x = jax.random.normal(jax.random.PRNGKey(0), (B, NUM_FEATURES, N_CODES), jnp.float32)

    kernel_params = prepare_params(params)   # one-time prep, outside the per-call jit
    out = mlp_e_forward(x, kernel_params)
    out = jax.block_until_ready(out)

    ref = mlp_e_reference(x, params)
    assert out.shape == (B, HIDDEN)
    # bf16 weights/activations on the K=5000 and K=2048 contractions (f32 accumulate)
    # -> loosened tolerance vs the f32 reference.
    np.testing.assert_allclose(np.asarray(out), np.asarray(ref), rtol=2e-2, atol=1e-2)
    print("KERNEL_OK")
</pallas_src>

<mosaic_0001>
module attributes {stable_mosaic.version = 11 : i64} {
  func.func @mlp_e_kernel(%arg0: i32, %arg1: memref<8x3xf32, #tpu.memory_space<smem>>, %arg2: memref<6x5000xbf16, #tpu.memory_space<vmem>>, %arg3: memref<5000x256xbf16, #tpu.memory_space<vmem>>, %arg4: memref<1x256xf32, #tpu.memory_space<vmem>>, %arg5: memref<2048x256xbf16, #tpu.memory_space<vmem>>, %arg6: memref<1x256xf32, #tpu.memory_space<vmem>>, %arg7: memref<256x64xf32, #tpu.memory_space<vmem>>, %arg8: memref<1x64xf32, #tpu.memory_space<vmem>>, %arg9: memref<64x16xf32, #tpu.memory_space<vmem>>, %arg10: memref<1x16xf32, #tpu.memory_space<vmem>>, %arg11: memref<2x16xf32, #tpu.memory_space<vmem>>) attributes {dimension_semantics = [#tpu.dimension_semantics<arbitrary>], iteration_bounds = array<i64: 1>, scalar_prefetch = 0 : i64, scratch_operands = 0 : i64, tpu.core_type = #tpu.core_type<tc>, window_params = [{transform_indices = @transform_0, window_bounds = array<i64: 8, 3>}, {pipeline_mode = #tpu.pipeline_mode<synchronous>, transform_indices = @transform_1, window_bounds = array<i64: 6, 5000>}, {pipeline_mode = #tpu.pipeline_mode<synchronous>, transform_indices = @transform_2, window_bounds = array<i64: 5000, 256>}, {pipeline_mode = #tpu.pipeline_mode<synchronous>, transform_indices = @transform_3, window_bounds = array<i64: 1, 256>}, {pipeline_mode = #tpu.pipeline_mode<synchronous>, transform_indices = @transform_4, window_bounds = array<i64: 2048, 256>}, {pipeline_mode = #tpu.pipeline_mode<synchronous>, transform_indices = @transform_5, window_bounds = array<i64: 1, 256>}, {pipeline_mode = #tpu.pipeline_mode<synchronous>, transform_indices = @transform_6, window_bounds = array<i64: 256, 64>}, {pipeline_mode = #tpu.pipeline_mode<synchronous>, transform_indices = @transform_7, window_bounds = array<i64: 1, 64>}, {pipeline_mode = #tpu.pipeline_mode<synchronous>, transform_indices = @transform_8, window_bounds = array<i64: 64, 16>}, {pipeline_mode = #tpu.pipeline_mode<synchronous>, transform_indices = @transform_9, window_bounds = array<i64: 1, 16>}, {pipeline_mode = #tpu.pipeline_mode<synchronous>, transform_indices = @transform_10, window_bounds = array<i64: 2, 16>}]} {
    %c0 = arith.constant 0 : index
    %c0_0 = arith.constant 0 : index
    %0 = vector.load %arg2[%c0, %c0_0] : memref<6x5000xbf16, #tpu.memory_space<vmem>>, vector<6x5000xbf16>
    %c0_1 = arith.constant 0 : index
    %c0_2 = arith.constant 0 : index
    %1 = vector.load %arg3[%c0_1, %c0_2] : memref<5000x256xbf16, #tpu.memory_space<vmem>>, vector<5000x256xbf16>
    %cst = arith.constant dense<0.000000e+00> : vector<6x256xf32>
    %2 = tpu.matmul %0, %1, %cst {dimension_numbers = #tpu.dot_dimension_numbers<[1], [0], [0], [1], [0, 0, 1, 1], [], []>} : vector<6x5000xbf16>, vector<5000x256xbf16>, vector<6x256xf32> -> vector<6x256xf32>
    %3 = vector.extract_strided_slice %2 {offsets = [0, 0], sizes = [2, 256], strides = [1, 1]} : vector<6x256xf32> to vector<2x256xf32>
    %4 = vector.extract_strided_slice %2 {offsets = [2, 0], sizes = [2, 256], strides = [1, 1]} : vector<6x256xf32> to vector<2x256xf32>
    %5 = vector.extract_strided_slice %2 {offsets = [4, 0], sizes = [2, 256], strides = [1, 1]} : vector<6x256xf32> to vector<2x256xf32>
    %c0_3 = arith.constant 0 : index
    %c0_4 = arith.constant 0 : index
    %6 = vector.load %arg4[%c0_3, %c0_4] : memref<1x256xf32, #tpu.memory_space<vmem>>, vector<1x256xf32>
    %c0_5 = arith.constant 0 : index
    %c0_6 = arith.constant 0 : index
    %7 = memref.load %arg1[%c0_5, %c0_6] : memref<8x3xf32, #tpu.memory_space<smem>>
    %8 = vector.broadcast %7 : f32 to vector<2x256xf32>
    %9 = arith.mulf %8, %3 : vector<2x256xf32>
    %c0_7 = arith.constant 0 : index
    %c1 = arith.constant 1 : index
    %10 = memref.load %arg1[%c0_7, %c1] : memref<8x3xf32, #tpu.memory_space<smem>>
    %11 = vector.broadcast %10 : f32 to vector<2x256xf32>
    %12 = arith.mulf %11, %4 : vector<2x256xf32>
    %13 = arith.addf %9, %12 : vector<2x256xf32>
    %c0_8 = arith.constant 0 : index
    %c2 = arith.constant 2 : index
    %14 = memref.load %arg1[%c0_8, %c2] : memref<8x3xf32, #tpu.memory_space<smem>>
    %15 = vector.broadcast %14 : f32 to vector<2x256xf32>
    %16 = arith.mulf %15, %5 : vector<2x256xf32>
    %17 = arith.addf %13, %16 : vector<2x256xf32>
    %18 = vector.broadcast %6 : vector<1x256xf32> to vector<2x256xf32>
    %19 = arith.addf %17, %18 : vector<2x256xf32>
    %cst_9 = arith.constant 0.000000e+00 : f32
    %20 = vector.broadcast %cst_9 : f32 to vector<2x256xf32>
    %21 = arith.maximumf %19, %20 : vector<2x256xf32>
    %c1_10 = arith.constant 1 : index
    %c0_11 = arith.constant 0 : index
    %22 = memref.load %arg1[%c1_10, %c0_11] : memref<8x3xf32, #tpu.memory_space<smem>>
    %23 = vector.broadcast %22 : f32 to vector<2x256xf32>
    %24 = arith.mulf %23, %3 : vector<2x256xf32>
    %c1_12 = arith.constant 1 : index
    %c1_13 = arith.constant 1 : index
    %25 = memref.load %arg1[%c1_12, %c1_13] : memref<8x3xf32, #tpu.memory_space<smem>>
    %26 = vector.broadcast %25 : f32 to vector<2x256xf32>
    %27 = arith.mulf %26, %4 : vector<2x256xf32>
    %28 = arith.addf %24, %27 : vector<2x256xf32>
    %c1_14 = arith.constant 1 : index
    %c2_15 = arith.constant 2 : index
    %29 = memref.load %arg1[%c1_14, %c2_15] : memref<8x3xf32, #tpu.memory_space<smem>>
    %30 = vector.broadcast %29 : f32 to vector<2x256xf32>
    %31 = arith.mulf %30, %5 : vector<2x256xf32>
    %32 = arith.addf %28, %31 : vector<2x256xf32>
    %33 = vector.broadcast %6 : vector<1x256xf32> to vector<2x256xf32>
    %34 = arith.addf %32, %33 : vector<2x256xf32>
    %cst_16 = arith.constant 0.000000e+00 : f32
    %35 = vector.broadcast %cst_16 : f32 to vector<2x256xf32>
    %36 = arith.maximumf %34, %35 : vector<2x256xf32>
    %c2_17 = arith.constant 2 : index
    %c0_18 = arith.constant 0 : index
    %37 = memref.load %arg1[%c2_17, %c0_18] : memref<8x3xf32, #tpu.memory_space<smem>>
    %38 = vector.broadcast %37 : f32 to vector<2x256xf32>
    %39 = arith.mulf %38, %3 : vector<2x256xf32>
    %c2_19 = arith.constant 2 : index
    %c1_20 = arith.constant 1 : index
    %40 = memref.load %arg1[%c2_19, %c1_20] : memref<8x3xf32, #tpu.memory_space<smem>>
    %41 = vector.broadcast %40 : f32 to vector<2x256xf32>
    %42 = arith.mulf %41, %4 : vector<2x256xf32>
    %43 = arith.addf %39, %42 : vector<2x256xf32>
    %c2_21 = arith.constant 2 : index
    %c2_22 = arith.constant 2 : index
    %44 = memref.load %arg1[%c2_21, %c2_22] : memref<8x3xf32, #tpu.memory_space<smem>>
    %45 = vector.broadcast %44 : f32 to vector<2x256xf32>
    %46 = arith.mulf %45, %5 : vector<2x256xf32>
    %47 = arith.addf %43, %46 : vector<2x256xf32>
    %48 = vector.broadcast %6 : vector<1x256xf32> to vector<2x256xf32>
    %49 = arith.addf %47, %48 : vector<2x256xf32>
    %cst_23 = arith.constant 0.000000e+00 : f32
    %50 = vector.broadcast %cst_23 : f32 to vector<2x256xf32>
    %51 = arith.maximumf %49, %50 : vector<2x256xf32>
    %c3 = arith.constant 3 : index
    %c0_24 = arith.constant 0 : index
    %52 = memref.load %arg1[%c3, %c0_24] : memref<8x3xf32, #tpu.memory_space<smem>>
    %53 = vector.broadcast %52 : f32 to vector<2x256xf32>
    %54 = arith.mulf %53, %3 : vector<2x256xf32>
    %c3_25 = arith.constant 3 : index
    %c1_26 = arith.constant 1 : index
    %55 = memref.load %arg1[%c3_25, %c1_26] : memref<8x3xf32, #tpu.memory_space<smem>>
    %56 = vector.broadcast %55 : f32 to vector<2x256xf32>
    %57 = arith.mulf %56, %4 : vector<2x256xf32>
    %58 = arith.addf %54, %57 : vector<2x256xf32>
    %c3_27 = arith.constant 3 : index
    %c2_28 = arith.constant 2 : index
    %59 = memref.load %arg1[%c3_27, %c2_28] : memref<8x3xf32, #tpu.memory_space<smem>>
    %60 = vector.broadcast %59 : f32 to vector<2x256xf32>
    %61 = arith.mulf %60, %5 : vector<2x256xf32>
    %62 = arith.addf %58, %61 : vector<2x256xf32>
    %63 = vector.broadcast %6 : vector<1x256xf32> to vector<2x256xf32>
    %64 = arith.addf %62, %63 : vector<2x256xf32>
    %cst_29 = arith.constant 0.000000e+00 : f32
    %65 = vector.broadcast %cst_29 : f32 to vector<2x256xf32>
    %66 = arith.maximumf %64, %65 : vector<2x256xf32>
    %c4 = arith.constant 4 : index
    %c0_30 = arith.constant 0 : index
    %67 = memref.load %arg1[%c4, %c0_30] : memref<8x3xf32, #tpu.memory_space<smem>>
    %68 = vector.broadcast %67 : f32 to vector<2x256xf32>
    %69 = arith.mulf %68, %3 : vector<2x256xf32>
    %c4_31 = arith.constant 4 : index
    %c1_32 = arith.constant 1 : index
    %70 = memref.load %arg1[%c4_31, %c1_32] : memref<8x3xf32, #tpu.memory_space<smem>>
    %71 = vector.broadcast %70 : f32 to vector<2x256xf32>
    %72 = arith.mulf %71, %4 : vector<2x256xf32>
    %73 = arith.addf %69, %72 : vector<2x256xf32>
    %c4_33 = arith.constant 4 : index
    %c2_34 = arith.constant 2 : index
    %74 = memref.load %arg1[%c4_33, %c2_34] : memref<8x3xf32, #tpu.memory_space<smem>>
    %75 = vector.broadcast %74 : f32 to vector<2x256xf32>
    %76 = arith.mulf %75, %5 : vector<2x256xf32>
    %77 = arith.addf %73, %76 : vector<2x256xf32>
    %78 = vector.broadcast %6 : vector<1x256xf32> to vector<2x256xf32>
    %79 = arith.addf %77, %78 : vector<2x256xf32>
    %cst_35 = arith.constant 0.000000e+00 : f32
    %80 = vector.broadcast %cst_35 : f32 to vector<2x256xf32>
    %81 = arith.maximumf %79, %80 : vector<2x256xf32>
    %c5 = arith.constant 5 : index
    %c0_36 = arith.constant 0 : index
    %82 = memref.load %arg1[%c5, %c0_36] : memref<8x3xf32, #tpu.memory_space<smem>>
    %83 = vector.broadcast %82 : f32 to vector<2x256xf32>
    %84 = arith.mulf %83, %3 : vector<2x256xf32>
    %c5_37 = arith.constant 5 : index
    %c1_38 = arith.constant 1 : index
    %85 = memref.load %arg1[%c5_37, %c1_38] : memref<8x3xf32, #tpu.memory_space<smem>>
    %86 = vector.broadcast %85 : f32 to vector<2x256xf32>
    %87 = arith.mulf %86, %4 : vector<2x256xf32>
    %88 = arith.addf %84, %87 : vector<2x256xf32>
    %c5_39 = arith.constant 5 : index
    %c2_40 = arith.constant 2 : index
    %89 = memref.load %arg1[%c5_39, %c2_40] : memref<8x3xf32, #tpu.memory_space<smem>>
    %90 = vector.broadcast %89 : f32 to vector<2x256xf32>
    %91 = arith.mulf %90, %5 : vector<2x256xf32>
    %92 = arith.addf %88, %91 : vector<2x256xf32>
    %93 = vector.broadcast %6 : vector<1x256xf32> to vector<2x256xf32>
    %94 = arith.addf %92, %93 : vector<2x256xf32>
    %cst_41 = arith.constant 0.000000e+00 : f32
    %95 = vector.broadcast %cst_41 : f32 to vector<2x256xf32>
    %96 = arith.maximumf %94, %95 : vector<2x256xf32>
    %c6 = arith.constant 6 : index
    %c0_42 = arith.constant 0 : index
    %97 = memref.load %arg1[%c6, %c0_42] : memref<8x3xf32, #tpu.memory_space<smem>>
    %98 = vector.broadcast %97 : f32 to vector<2x256xf32>
    %99 = arith.mulf %98, %3 : vector<2x256xf32>
    %c6_43 = arith.constant 6 : index
    %c1_44 = arith.constant 1 : index
    %100 = memref.load %arg1[%c6_43, %c1_44] : memref<8x3xf32, #tpu.memory_space<smem>>
    %101 = vector.broadcast %100 : f32 to vector<2x256xf32>
    %102 = arith.mulf %101, %4 : vector<2x256xf32>
    %103 = arith.addf %99, %102 : vector<2x256xf32>
    %c6_45 = arith.constant 6 : index
    %c2_46 = arith.constant 2 : index
    %104 = memref.load %arg1[%c6_45, %c2_46] : memref<8x3xf32, #tpu.memory_space<smem>>
    %105 = vector.broadcast %104 : f32 to vector<2x256xf32>
    %106 = arith.mulf %105, %5 : vector<2x256xf32>
    %107 = arith.addf %103, %106 : vector<2x256xf32>
    %108 = vector.broadcast %6 : vector<1x256xf32> to vector<2x256xf32>
    %109 = arith.addf %107, %108 : vector<2x256xf32>
    %cst_47 = arith.constant 0.000000e+00 : f32
    %110 = vector.broadcast %cst_47 : f32 to vector<2x256xf32>
    %111 = arith.maximumf %109, %110 : vector<2x256xf32>
    %c7 = arith.constant 7 : index
    %c0_48 = arith.constant 0 : index
    %112 = memref.load %arg1[%c7, %c0_48] : memref<8x3xf32, #tpu.memory_space<smem>>
    %113 = vector.broadcast %112 : f32 to vector<2x256xf32>
    %114 = arith.mulf %113, %3 : vector<2x256xf32>
    %c7_49 = arith.constant 7 : index
    %c1_50 = arith.constant 1 : index
    %115 = memref.load %arg1[%c7_49, %c1_50] : memref<8x3xf32, #tpu.memory_space<smem>>
    %116 = vector.broadcast %115 : f32 to vector<2x256xf32>
    %117 = arith.mulf %116, %4 : vector<2x256xf32>
    %118 = arith.addf %114, %117 : vector<2x256xf32>
    %c7_51 = arith.constant 7 : index
    %c2_52 = arith.constant 2 : index
    %119 = memref.load %arg1[%c7_51, %c2_52] : memref<8x3xf32, #tpu.memory_space<smem>>
    %120 = vector.broadcast %119 : f32 to vector<2x256xf32>
    %121 = arith.mulf %120, %5 : vector<2x256xf32>
    %122 = arith.addf %118, %121 : vector<2x256xf32>
    %123 = vector.broadcast %6 : vector<1x256xf32> to vector<2x256xf32>
    %124 = arith.addf %122, %123 : vector<2x256xf32>
    %cst_53 = arith.constant 0.000000e+00 : f32
    %125 = vector.broadcast %cst_53 : f32 to vector<2x256xf32>
    %126 = arith.maximumf %124, %125 : vector<2x256xf32>
    %127 = tpu.concatenate %21, %36, %51, %66, %81, %96, %111, %126 in 1 : vector<2x256xf32>, vector<2x256xf32>, vector<2x256xf32>, vector<2x256xf32>, vector<2x256xf32>, vector<2x256xf32>, vector<2x256xf32>, vector<2x256xf32> -> vector<2x2048xf32>
    %128 = arith.truncf %127 : vector<2x2048xf32> to vector<2x2048xbf16>
    %c0_54 = arith.constant 0 : index
    %c0_55 = arith.constant 0 : index
    %129 = vector.load %arg5[%c0_54, %c0_55] : memref<2048x256xbf16, #tpu.memory_space<vmem>>, vector<2048x256xbf16>
    %cst_56 = arith.constant dense<0.000000e+00> : vector<2x256xf32>
    %130 = tpu.matmul %128, %129, %cst_56 {dimension_numbers = #tpu.dot_dimension_numbers<[1], [0], [0], [1], [0, 0, 1, 1], [], []>} : vector<2x2048xbf16>, vector<2048x256xbf16>, vector<2x256xf32> -> vector<2x256xf32>
    %c0_57 = arith.constant 0 : index
    %c0_58 = arith.constant 0 : index
    %131 = vector.load %arg6[%c0_57, %c0_58] : memref<1x256xf32, #tpu.memory_space<vmem>>, vector<1x256xf32>
    %132 = vector.broadcast %131 : vector<1x256xf32> to vector<2x256xf32>
    %133 = arith.addf %130, %132 : vector<2x256xf32>
    %cst_59 = arith.constant 0.000000e+00 : f32
    %134 = vector.broadcast %cst_59 : f32 to vector<2x256xf32>
    %135 = arith.maximumf %133, %134 : vector<2x256xf32>
    %c0_60 = arith.constant 0 : index
    %c0_61 = arith.constant 0 : index
    %136 = vector.load %arg7[%c0_60, %c0_61] : memref<256x64xf32, #tpu.memory_space<vmem>>, vector<256x64xf32>
    %cst_62 = arith.constant dense<0.000000e+00> : vector<2x64xf32>
    %137 = tpu.matmul %135, %136, %cst_62 {dimension_numbers = #tpu.dot_dimension_numbers<[1], [0], [0], [1], [0, 0, 1, 1], [], []>} : vector<2x256xf32>, vector<256x64xf32>, vector<2x64xf32> -> vector<2x64xf32>
    %c0_63 = arith.constant 0 : index
    %c0_64 = arith.constant 0 : index
    %138 = vector.load %arg8[%c0_63, %c0_64] : memref<1x64xf32, #tpu.memory_space<vmem>>, vector<1x64xf32>
    %139 = vector.broadcast %138 : vector<1x64xf32> to vector<2x64xf32>
    %140 = arith.addf %137, %139 : vector<2x64xf32>
    %cst_65 = arith.constant 0.000000e+00 : f32
    %141 = vector.broadcast %cst_65 : f32 to vector<2x64xf32>
    %142 = arith.maximumf %140, %141 : vector<2x64xf32>
    %c0_66 = arith.constant 0 : index
    %c0_67 = arith.constant 0 : index
    %143 = vector.load %arg9[%c0_66, %c0_67] : memref<64x16xf32, #tpu.memory_space<vmem>>, vector<64x16xf32>
    %cst_68 = arith.constant dense<0.000000e+00> : vector<2x16xf32>
    %144 = tpu.matmul %142, %143, %cst_68 {dimension_numbers = #tpu.dot_dimension_numbers<[1], [0], [0], [1], [0, 0, 1, 1], [], []>} : vector<2x64xf32>, vector<64x16xf32>, vector<2x16xf32> -> vector<2x16xf32>
    %c0_69 = arith.constant 0 : index
    %c0_70 = arith.constant 0 : index
    %145 = vector.load %arg10[%c0_69, %c0_70] : memref<1x16xf32, #tpu.memory_space<vmem>>, vector<1x16xf32>
    %146 = vector.broadcast %145 : vector<1x16xf32> to vector<2x16xf32>
    %147 = arith.addf %144, %146 : vector<2x16xf32>
    %cst_71 = arith.constant 0.000000e+00 : f32
    %148 = vector.broadcast %cst_71 : f32 to vector<2x16xf32>
    %149 = arith.maximumf %147, %148 : vector<2x16xf32>
    %c0_72 = arith.constant 0 : index
    %c0_73 = arith.constant 0 : index
    %150 = vector.load %arg11[%c0_72, %c0_73] : memref<2x16xf32, #tpu.memory_space<vmem>>, vector<2x16xf32>
    tpu.vector_store %arg11[%c0_72, %c0_73], %149 {strides = array<i32>} : memref<2x16xf32, #tpu.memory_space<vmem>>, vector<2x16xf32>,
    return
  }
  func.func @transform_0(%arg0: i32) -> (i32, i32) {
    %c0_i32 = arith.constant 0 : i32
    %c0_i32_0 = arith.constant 0 : i32
    %c0_i32_1 = arith.constant 0 : i32
    return %c0_i32, %c0_i32_0 : i32, i32
  }
  func.func @transform_1(%arg0: i32) -> (i32, i32) {
    %c0_i32 = arith.constant 0 : i32
    %c0_i32_0 = arith.constant 0 : i32
    %c0_i32_1 = arith.constant 0 : i32
    return %c0_i32, %c0_i32_0 : i32, i32
  }
  func.func @transform_2(%arg0: i32) -> (i32, i32) {
    %c0_i32 = arith.constant 0 : i32
    %c0_i32_0 = arith.constant 0 : i32
    %c0_i32_1 = arith.constant 0 : i32
    return %c0_i32, %c0_i32_0 : i32, i32
  }
  func.func @transform_3(%arg0: i32) -> (i32, i32) {
    %c0_i32 = arith.constant 0 : i32
    %c0_i32_0 = arith.constant 0 : i32
    %c0_i32_1 = arith.constant 0 : i32
    return %c0_i32, %c0_i32_0 : i32, i32
  }
  func.func @transform_4(%arg0: i32) -> (i32, i32) {
    %c0_i32 = arith.constant 0 : i32
    %c0_i32_0 = arith.constant 0 : i32
    %c0_i32_1 = arith.constant 0 : i32
    return %c0_i32, %c0_i32_0 : i32, i32
  }
  func.func @transform_5(%arg0: i32) -> (i32, i32) {
    %c0_i32 = arith.constant 0 : i32
    %c0_i32_0 = arith.constant 0 : i32
    %c0_i32_1 = arith.constant 0 : i32
    return %c0_i32, %c0_i32_0 : i32, i32
  }
  func.func @transform_6(%arg0: i32) -> (i32, i32) {
    %c0_i32 = arith.constant 0 : i32
    %c0_i32_0 = arith.constant 0 : i32
    %c0_i32_1 = arith.constant 0 : i32
    return %c0_i32, %c0_i32_0 : i32, i32
  }
  func.func @transform_7(%arg0: i32) -> (i32, i32) {
    %c0_i32 = arith.constant 0 : i32
    %c0_i32_0 = arith.constant 0 : i32
    %c0_i32_1 = arith.constant 0 : i32
    return %c0_i32, %c0_i32_0 : i32, i32
  }
  func.func @transform_8(%arg0: i32) -> (i32, i32) {
    %c0_i32 = arith.constant 0 : i32
    %c0_i32_0 = arith.constant 0 : i32
    %c0_i32_1 = arith.constant 0 : i32
    return %c0_i32, %c0_i32_0 : i32, i32
  }
  func.func @transform_9(%arg0: i32) -> (i32, i32) {
    %c0_i32 = arith.constant 0 : i32
    %c0_i32_0 = arith.constant 0 : i32
    %c0_i32_1 = arith.constant 0 : i32
    return %c0_i32, %c0_i32_0 : i32, i32
  }
  func.func @transform_10(%arg0: i32) -> (i32, i32) {
    %c0_i32 = arith.constant 0 : i32
    %c0_i32_0 = arith.constant 0 : i32
    %c0_i32_1 = arith.constant 0 : i32
    return %c0_i32, %c0_i32_0 : i32, i32
  }
}

</mosaic_0001>

<bundles_post_ra>
// kernel: mlp_e_forward.1
= control target key start
LH: loop header
LB: loop body
LE: loop exit
PB: predicated region body
PF: predicated region fallthrough
CT: control target
= control target key end

     0   :  { %15 = vsyncpa [#allocation5], 0  ;;  %s10428_s0 = inlined_call_operand.vmem [shape: f32[8,3], index: 0, kind: input, shape index: {}]   ;;  %s10429_s1 = inlined_call_operand.vmem [shape: bf16[6,5000], index: 1, kind: input, shape index: {}]   ;;  %s10430_s2 = inlined_call_operand.hbm [shape: bf16[5000,256], index: 2, kind: input, shape index: {}]   ;;  %s10431_s3 = inlined_call_operand.hbm [shape: f32[1,256], index: 3, kind: input, shape index: {}]   ;;  %s10432_s4 = inlined_call_operand.hbm [shape: bf16[2048,256], index: 4, kind: input, shape index: {}]   ;;  %s10433_s5 = inlined_call_operand.hbm [shape: f32[1,256], index: 5, kind: input, shape index: {}]   ;;  %s10434_s6 = inlined_call_operand.vmem [shape: f32[256,64], index: 6, kind: input, shape index: {}]   ;;  %s10435_s7 = inlined_call_operand.hbm [shape: f32[1,64], index: 7, kind: input, shape index: {}]   ;;  %s10436_s8 = inlined_call_operand.vmem [shape: f32[64,16], index: 8, kind: input, shape index: {}]   ;;  %s10437_s9 = inlined_call_operand.hbm [shape: f32[1,16], index: 9, kind: input, shape index: {}]   ;;  %s10438_s10 = inlined_call_operand.hbm [shape: f32[2,16], index: 10, kind: output, shape index: {}]  }
   0x1   :  { %16 = vsyncpa [#allocation3], 0 }
   0x2   :  { %17 = vsyncpa [#allocation8], 0 }
   0x3   :  { %18 = vsyncpa [#allocation11], 0 }
   0x4   :  { %19 = vsyncpa [#allocation14], 0 }
   0x5   :  { %20 = vsyncpa [#allocation4], 0  ;;  %s9798_s13 = smov [#allocation7]   ;;  %s9799_s15 = smov [#allocation10]  }
   0x6   :  { %s51_s14 = sshll.u32 %s9798_s13, 4  ;;  %s73_s16 = sshll.u32 %s9799_s15, 4  ;;  %s52_s14 = int_to_ptr.vmem [resolvable:$true] %s51_s14  ;;  %s74_s16 = int_to_ptr.vmem [resolvable:$true] %s73_s16 }
   0x7   :  { %s9642_s17 = scalar_lea.vmem %s52_s14, 32  ;;  %p9647_p1 = scmp.lt.s32.totalorder %s52_s14, %s52_s14 }
   0x8   :  { %p9643_p0 = scmp.ne.s32.totalorder %s52_s14, %s9642_s17  ;;  %p9648_p2 = scmp.lt.s32.totalorder %s9642_s17, %s9642_s17 }
   0xa   :  { %p9649_p3 = por %p9648_p2, %p9647_p1 }
   0xc   :  { %p9650_p4 = pnand %p9649_p3, %p9643_p0 }
   0xe   :  { %9653 = shalt.err (!%p9650_p4)
}
   0xf   :  { %54 = dma.hbm_to_vmem [thread:$0]  %s10431_s3, 32, %s52_s14, [#allocation8]  }
  0x10   :  { %s9662_s20 = scalar_lea.vmem %s74_s16, 32  ;;  %p9667_p6 = scmp.lt.s32.totalorder %s74_s16, %s74_s16 }
  0x11   :  { %p9663_p5 = scmp.ne.s32.totalorder %s74_s16, %s9662_s20  ;;  %p9668_p7 = scmp.lt.s32.totalorder %s9662_s20, %s9662_s20 }
  0x13   :  { %p9669_p8 = por %p9668_p7, %p9667_p6 }
  0x15   :  { %p9670_p9 = pnand %p9669_p8, %p9663_p5 }
  0x17   :  { %9673 = shalt.err (!%p9670_p9)
}
  0x18   :  { %76 = dma.hbm_to_vmem [thread:$0]  %s10433_s5, 32, %s74_s16, [#allocation11]  }
  0x19   :  { %s27_s25 = sshll.u32 %s10428_s0, 4  ;;  %s28_s25 = int_to_ptr.vmem [resolvable:$true] %s27_s25 }
  0x1a   :  { %s9674_s26 = scalar_lea.vmem %s28_s25, 128  ;;  %p9679_p11 = scmp.lt.s32.totalorder %s28_s25, %s28_s25 }
  0x1b   :  { %p9675_p10 = scmp.ne.s32.totalorder %s28_s25, %s9674_s26  ;;  %p9680_p12 = scmp.lt.s32.totalorder %s9674_s26, %s9674_s26 }
  0x1d   :  { %p9681_p13 = por %p9680_p12, %p9679_p11 }
  0x1f   :  { %p9682_p0 = pnand %p9681_p13, %p9675_p10 }
  0x21   :  { %9685 = shalt.err (!%p9682_p0)
}
  0x22   :  { %s9800_s3 = smov [#allocation2]   ;;  %s9801_s27 = smov [#allocation6]  }
  0x23   :  { %30 = dma.vmem_to_smem %s28_s25, 128, %s9800_s3, [#allocation5]  }
  0x24   :  { %s38_s28 = sshll.u32 %s9801_s27, 4  ;;  %s39_s28 = int_to_ptr.vmem [resolvable:$true] %s38_s28 }
  0x25   :  { %s9694_s29 = scalar_lea.vmem %s39_s28, 80000  ;;  %p9699_p2 = scmp.lt.s32.totalorder %s39_s28, %s39_s28 }
  0x26   :  { %p9695_p1 = scmp.ne.s32.totalorder %s39_s28, %s9694_s29  ;;  %p9700_p3 = scmp.lt.s32.totalorder %s9694_s29, %s9694_s29 }
  0x28   :  { %p9701_p4 = por %p9700_p3, %p9699_p2 }
  0x2a   :  { %p9702_p5 = pnand %p9701_p4, %p9695_p1 }
  0x2c   :  { %9705 = shalt.err (!%p9702_p5)
}
  0x2d   :  { %s9802_s0 = smov 128   ;;  %s9803_s5 = smov 8  }
  0x2e   :  { %44 = dma.hbm_to_vmem [thread:$0]  %s10430_s2, 80000, %s39_s28, [#allocation3], %s9802_s0, %s9802_s0, %s9803_s5  }
  0x2f   :  { %s9804_s12 = smov [#allocation9]   ;;  %s9805_s14 = smov [#allocation12]  }
  0x30   :  { %s60_s13 = sshll.u32 %s9804_s12, 4  ;;  %s85_s15 = sshll.u32 %s9805_s14, 4  ;;  %s61_s13 = int_to_ptr.vmem [resolvable:$true] %s60_s13  ;;  %s86_s15 = int_to_ptr.vmem [resolvable:$true] %s85_s15 }
  0x31   :  { %s9714_s16 = scalar_lea.vmem %s61_s13, 32768  ;;  %p9719_p7 = scmp.lt.s32.totalorder %s61_s13, %s61_s13 }
  0x32   :  { %p9715_p6 = scmp.ne.s32.totalorder %s61_s13, %s9714_s16  ;;  %p9720_p8 = scmp.lt.s32.totalorder %s9714_s16, %s9714_s16 }
  0x34   :  { %p9721_p9 = por %p9720_p8, %p9719_p7 }
  0x36   :  { %p9722_p10 = pnand %p9721_p9, %p9715_p6 }
  0x38   :  { %9725 = shalt.err (!%p9722_p10)
}
  0x39   :  { %66 = dma.hbm_to_vmem [thread:$0]  %s10432_s4, 32768, %s61_s13, [#allocation8], %s9802_s0, %s9802_s0, %s9803_s5  }
  0x3a   :  { %s9734_s19 = scalar_lea.vmem %s86_s15, 16  ;;  %s9738_s2 = scalar_lea.vmem %s86_s15, 32 }
  0x3b   :  { %p9735_p11 = scmp.ne.s32.totalorder %s86_s15, %s9734_s19  ;;  %p9739_p12 = scmp.lt.s32.totalorder %s86_s15, %s86_s15 }
  0x3c   :  { %p9740_p13 = scmp.lt.s32.totalorder %s9738_s2, %s9734_s19 }
  0x3e   :  { %p9741_p0 = por %p9740_p13, %p9739_p12 }
  0x40   :  { %p9742_p1 = pnand %p9741_p0, %p9735_p11 }
  0x42   :  { %9745 = shalt.err (!%p9742_p1)
}
  0x43   :  { %88 = dma.hbm_to_vmem [thread:$0]  %s10435_s7, 16, %s86_s15, [#allocation11]  }
  0x44   :  { %s9806_s22 = smov [#allocation13]  }
  0x45   :  { %s97_s23 = sshll.u32 %s9806_s22, 4  ;;  %s98_s23 = int_to_ptr.vmem [resolvable:$true] %s97_s23 }
  0x46   :  { %s9754_s24 = scalar_lea.vmem %s98_s23, 16  ;;  %s9758_s25 = scalar_lea.vmem %s98_s23, 32 }
  0x47   :  { %p9755_p2 = scmp.ne.s32.totalorder %s98_s23, %s9754_s24  ;;  %p9759_p3 = scmp.lt.s32.totalorder %s98_s23, %s98_s23 }
  0x48   :  { %p9760_p4 = scmp.lt.s32.totalorder %s9758_s25, %s9754_s24 }
  0x4a   :  { %p9761_p5 = por %p9760_p4, %p9759_p3 }
  0x4c   :  { %p9762_p6 = pnand %p9761_p5, %p9755_p2 }
  0x4e   :  { %9765 = shalt.err (!%p9762_p6)
}
  0x4f   :  { %100 = dma.hbm_to_vmem [thread:$0]  %s10437_s9, 16, %s98_s23, [#allocation14]  }
  0x50   :  { %9786 = dma.done.wait [#allocation5], 128  }
  0x51   :  { %9787 = vsyncadd [#allocation5], 4294967168 }
  0x52   :  { %9788 = dma.done.wait [#allocation3], 80000  }
  0x53   :  { %9789 = vsyncadd [#allocation3], 4294887296 }
  0x54   :  { %9790 = dma.done.wait [#allocation8], 32800  }
  0x55   :  { %9791 = vsyncadd [#allocation8], 4294934496 }
  0x56   :  { %9792 = dma.done.wait [#allocation11], 48  }
  0x57   :  { %9793 = vsyncadd [#allocation11], 4294967248 }
  0x58   :  { %9794 = dma.done.wait [#allocation14], 16  }
  0x59   :  { %9795 = vsyncadd [#allocation14], 4294967280 }
  0x5a   :  { %122 = sfence }
  0x5b   :  { %v8272_v0 = vld [vmem:[#allocation6 + $0x74] ss:$8 sps:$4 sm:$0xff]   ;;  %v8276_v2 = vld [vmem:[#allocation6 + $0x70] ss:$8 sps:$4 sm:$0xff]   ;;  %v8278_v4 = vld [vmem:[#allocation6 + $0x64] ss:$8 sps:$4 sm:$0xff]  }
  0x5c   :  { %v8274_v1 = vld [vmem:[#allocation6 + $0x174] ss:$8 sps:$4 sm:$0xff]   ;;  %4044 = vmatprep.subr.bf16.mxu0 %v8272_v0  ;;  %v8277_v3 = vld [vmem:[#allocation6 + $0x170] ss:$8 sps:$4 sm:$0xff]   ;;  %v8280_v5 = vld [vmem:[#allocation6 + $0x164] ss:$8 sps:$4 sm:$0xff]  }
  0x5d   :  { %4085 = vmatprep.subr.bf16.mxu1 %v8274_v1  ;;  %4045 = vmatpush1.bf16.msra.mxu0 %v8276_v2  ;;  %v8282_v6 = vld [vmem:[#allocation6 + $0x60] ss:$8 sps:$4 sm:$0xff]   ;;  %v8284_v8 = vld [vmem:[#allocation6 + $0x54] ss:$8 sps:$4 sm:$0xff]   ;;  %v8288_v10 = vld [vmem:[#allocation6 + $0x50] ss:$8 sps:$4 sm:$0xff]  }
  0x5e   :  { %4086 = vmatpush1.bf16.msra.mxu1 %v8277_v3  ;;  %4046 = vmatprep.subr.bf16.mxu0 %v8278_v4  ;;  %v8283_v7 = vld [vmem:[#allocation6 + $0x160] ss:$8 sps:$4 sm:$0xff]   ;;  %v8286_v9 = vld [vmem:[#allocation6 + $0x154] ss:$8 sps:$4 sm:$0xff]   ;;  %v8289_v11 = vld [vmem:[#allocation6 + $0x150] ss:$8 sps:$4 sm:$0xff]  }
  0x5f   :  { %4087 = vmatprep.subr.bf16.mxu1 %v8280_v5  ;;  %v8290_v12 = vld [vmem:[#allocation6 + $0x44] ss:$8 sps:$4 sm:$0xff]   ;;  %v8294_v14 = vld [vmem:[#allocation6 + $0x40] ss:$8 sps:$4 sm:$0xff]   ;;  %v8296_v16 = vld [vmem:[#allocation6 + $0x34] ss:$8 sps:$4 sm:$0xff]  }
  0x60   :  { %v8292_v13 = vld [vmem:[#allocation6 + $0x144] ss:$8 sps:$4 sm:$0xff]   ;;  %v8295_v15 = vld [vmem:[#allocation6 + $0x140] ss:$8 sps:$4 sm:$0xff]   ;;  %v8298_v17 = vld [vmem:[#allocation6 + $0x134] ss:$8 sps:$4 sm:$0xff]  }
  0x61   :  { %4047 = vmatpush1.bf16.msra.mxu0 %v8282_v6  ;;  %v8300_v18 = vld [vmem:[#allocation6 + $0x30] ss:$8 sps:$4 sm:$0xff]   ;;  %v8302_v20 = vld [vmem:[#allocation6 + $0x24] ss:$8 sps:$4 sm:$0xff]   ;;  %v8306_v22 = vld [vmem:[#allocation6 + $0x20] ss:$8 sps:$4 sm:$0xff]  }
  0x62   :  { %4088 = vmatpush1.bf16.msra.mxu1 %v8283_v7  ;;  %4048 = vmatprep.subr.bf16.mxu0 %v8284_v8  ;;  %v8301_v19 = vld [vmem:[#allocation6 + $0x130] ss:$8 sps:$4 sm:$0xff]   ;;  %v8304_v21 = vld [vmem:[#allocation6 + $0x124] ss:$8 sps:$4 sm:$0xff]   ;;  %v8307_v23 = vld [vmem:[#allocation6 + $0x120] ss:$8 sps:$4 sm:$0xff]  }
  0x63   :  { %4089 = vmatprep.subr.bf16.mxu1 %v8286_v9  ;;  %v8308_v24 = vld [vmem:[#allocation6 + $0x14] ss:$8 sps:$4 sm:$0xff]   ;;  %v8312_v26 = vld [vmem:[#allocation6 + $0x10] ss:$8 sps:$4 sm:$0xff]   ;;  %v8314_v28 = vld [vmem:[#allocation6 + $0x4] ss:$8 sps:$4 sm:$0xff]  }
  0x64   :  { %v8310_v25 = vld [vmem:[#allocation6 + $0x114] ss:$8 sps:$4 sm:$0xff]   ;;  %v8313_v27 = vld [vmem:[#allocation6 + $0x110] ss:$8 sps:$4 sm:$0xff]   ;;  %v8316_v29 = vld [vmem:[#allocation6 + $0x104] ss:$8 sps:$4 sm:$0xff]  }
  0x65   :  { %4049 = vmatpush1.bf16.msra.mxu0 %v8288_v10  ;;  %v8318_v30 = vld [vmem:[#allocation6] ss:$8 sps:$4 sm:$0xff]   ;;  %v8320_v32 = vld [vmem:[#allocation6 + $0xf4] ss:$8 sps:$4 sm:$0xff]   ;;  %v8324_v34 = vld [vmem:[#allocation6 + $0xf0] ss:$8 sps:$4 sm:$0xff]  }
  0x66   :  { %4090 = vmatpush1.bf16.msra.mxu1 %v8289_v11  ;;  %4050 = vmatprep.subr.bf16.mxu0 %v8290_v12  ;;  %v8319_v31 = vld [vmem:[#allocation6 + $0x100] ss:$8 sps:$4 sm:$0xff]   ;;  %v8322_v33 = vld [vmem:[#allocation6 + $0x1f4] ss:$8 sps:$4 sm:$0xff]   ;;  %v8325_v35 = vld [vmem:[#allocation6 + $0x1f0] ss:$8 sps:$4 sm:$0xff]  }
  0x67   :  { %4091 = vmatprep.subr.bf16.mxu1 %v8292_v13  ;;  %v8326_v36 = vld [vmem:[#allocation6 + $0xe4] ss:$8 sps:$4 sm:$0xff]   ;;  %v8330_v38 = vld [vmem:[#allocation6 + $0xe0] ss:$8 sps:$4 sm:$0xff]   ;;  %v8332_v40 = vld [vmem:[#allocation6 + $0xd4] ss:$8 sps:$4 sm:$0xff]  }
  0x68   :  { %v8328_v37 = vld [vmem:[#allocation6 + $0x1e4] ss:$8 sps:$4 sm:$0xff]   ;;  %v8331_v39 = vld [vmem:[#allocation6 + $0x1e0] ss:$8 sps:$4 sm:$0xff]   ;;  %v8334_v41 = vld [vmem:[#allocation6 + $0x1d4] ss:$8 sps:$4 sm:$0xff]  }
  0x69   :  { %4051 = vmatpush1.bf16.msra.mxu0 %v8294_v14  ;;  %v8336_v42 = vld [vmem:[#allocation6 + $0xd0] ss:$8 sps:$4 sm:$0xff]   ;;  %v8338_v44 = vld [vmem:[#allocation6 + $0xc4] ss:$8 sps:$4 sm:$0xff]   ;;  %v8342_v49 = vld [vmem:[#allocation6 + $0xc0] ss:$8 sps:$4 sm:$0xff]  }
  0x6a   :  { %4092 = vmatpush1.bf16.msra.mxu1 %v8295_v15  ;;  %4052 = vmatprep.subr.bf16.mxu0 %v8296_v16  ;;  %v8337_v43 = vld [vmem:[#allocation6 + $0x1d0] ss:$8 sps:$4 sm:$0xff]   ;;  %v8340_v45 = vld [vmem:[#allocation6 + $0x1c4] ss:$8 sps:$4 sm:$0xff]   ;;  %v8343_v50 = vld [vmem:[#allocation6 + $0x1c0] ss:$8 sps:$4 sm:$0xff]  }
  0x6b   :  { %4093 = vmatprep.subr.bf16.mxu1 %v8298_v17  ;;  %v124_v46 = vld [vmem:[%s10429_s1] sm:$0x77]  ;;  %v125_v48 = vld [vmem:[%s10429_s1 + $0x8] sm:$0x77]  ;;  %v8344_v52 = vld [vmem:[#allocation6 + $0xb4] ss:$8 sps:$4 sm:$0xff]  }
  0x6c   :  { %v7248_v47 = vcombine.high %v124_v46, %v124_v46  ;;  %v7250_v51 = vcombine.high %v125_v48, %v125_v48  ;;  %v8346_v53 = vld [vmem:[#allocation6 + $0x1b4] ss:$8 sps:$4 sm:$0xff]   ;;  %v8348_v54 = vld [vmem:[#allocation6 + $0xb0] ss:$8 sps:$4 sm:$0xff]   ;;  %v8350_v56 = vld [vmem:[#allocation6 + $0xa4] ss:$8 sps:$4 sm:$0xff]   ;;  %v7247_v6 = vcombine.low %v124_v46, %v124_v46  ;;  %v7249_v7 = vcombine.low %v125_v48, %v125_v48 }
  0x6d   :  { %4053 = vmatpush1.bf16.msra.mxu0 %v8300_v18  ;;  %v8349_v55 = vld [vmem:[#allocation6 + $0x1b0] ss:$8 sps:$4 sm:$0xff]   ;;  %v8352_v57 = vld [vmem:[#allocation6 + $0x1a4] ss:$8 sps:$4 sm:$0xff]   ;;  %v8354_v58 = vld [vmem:[#allocation6 + $0xa0] ss:$8 sps:$4 sm:$0xff]  }
  0x6e   :  { %4094 = vmatpush1.bf16.msra.mxu1 %v8301_v19  ;;  %4054 = vmatprep.subr.bf16.mxu0 %v8302_v20  ;;  %v8355_v59 = vld [vmem:[#allocation6 + $0x1a0] ss:$8 sps:$4 sm:$0xff]   ;;  %v8356_v60 = vld [vmem:[#allocation6 + $0x94] ss:$8 sps:$4 sm:$0xff]   ;;  %v8360_v62 = vld [vmem:[#allocation6 + $0x90] ss:$8 sps:$4 sm:$0xff]  }
  0x6f   :  { %4095 = vmatprep.subr.bf16.mxu1 %v8304_v21  ;;  %4076 = vmatprep.mubr.bf16.mxu0 %v7248_v47  ;;  %v8358_v61 = vld [vmem:[#allocation6 + $0x194] ss:$8 sps:$4 sm:$0xff]   ;;  %v8361_v63 = vld [vmem:[#allocation6 + $0x190] ss:$8 sps:$4 sm:$0xff]   ;;  %v8362_v0 = vld [vmem:[#allocation6 + $0x84] ss:$8 sps:$4 sm:$0xff]  }
  0x70   :  { %4117 = vmatprep.mubr.bf16.mxu1 %v7250_v51  ;;  %v8364_v1 = vld [vmem:[#allocation6 + $0x184] ss:$8 sps:$4 sm:$0xff]   ;;  %v8366_v2 = vld [vmem:[#allocation6 + $0x80] ss:$8 sps:$4 sm:$0xff]   ;;  %v8374_v4 = vld [vmem:[#allocation6 + $0x274] ss:$8 sps:$4 sm:$0xff]  }
  0x71   :  { %4055 = vmatpush1.bf16.msra.mxu0 %v8306_v22  ;;  %v8367_v3 = vld [vmem:[#allocation6 + $0x180] ss:$8 sps:$4 sm:$0xff]   ;;  %v8377_v5 = vld [vmem:[#allocation6 + $0x374] ss:$8 sps:$4 sm:$0xff]   ;;  %v8372_v8 = vld [vmem:[#allocation6 + $0x270] ss:$8 sps:$4 sm:$0xff]  }
  0x72   :  { %4096 = vmatpush1.bf16.msra.mxu1 %v8307_v23  ;;  %4056 = vmatprep.subr.bf16.mxu0 %v8308_v24  ;;  %v8375_v9 = vld [vmem:[#allocation6 + $0x370] ss:$8 sps:$4 sm:$0xff]   ;;  %v8380_v10 = vld [vmem:[#allocation6 + $0x264] ss:$8 sps:$4 sm:$0xff]   ;;  %v8378_v12 = vld [vmem:[#allocation6 + $0x260] ss:$8 sps:$4 sm:$0xff]  }
  0x73   :  { %4097 = vmatprep.subr.bf16.mxu1 %v8310_v25  ;;  %v8383_v11 = vld [vmem:[#allocation6 + $0x364] ss:$8 sps:$4 sm:$0xff]   ;;  %v8381_v13 = vld [vmem:[#allocation6 + $0x360] ss:$8 sps:$4 sm:$0xff]   ;;  %v8386_v14 = vld [vmem:[#allocation6 + $0x254] ss:$8 sps:$4 sm:$0xff]  }
  0x74   :  { %v8389_v15 = vld [vmem:[#allocation6 + $0x354] ss:$8 sps:$4 sm:$0xff]   ;;  %v8384_v16 = vld [vmem:[#allocation6 + $0x250] ss:$8 sps:$4 sm:$0xff]   ;;  %v8392_v18 = vld [vmem:[#allocation6 + $0x244] ss:$8 sps:$4 sm:$0xff]  }
  0x75   :  { %4057 = vmatpush1.bf16.msra.mxu0 %v8312_v26  ;;  %v8387_v17 = vld [vmem:[#allocation6 + $0x350] ss:$8 sps:$4 sm:$0xff]   ;;  %v8395_v19 = vld [vmem:[#allocation6 + $0x344] ss:$8 sps:$4 sm:$0xff]   ;;  %v8390_v20 = vld [vmem:[#allocation6 + $0x240] ss:$8 sps:$4 sm:$0xff]  }
  0x76   :  { %4098 = vmatpush1.bf16.msra.mxu1 %v8313_v27  ;;  %4058 = vmatprep.subr.bf16.mxu0 %v8314_v28  ;;  %v8393_v21 = vld [vmem:[#allocation6 + $0x340] ss:$8 sps:$4 sm:$0xff]   ;;  %v8398_v22 = vld [vmem:[#allocation6 + $0x234] ss:$8 sps:$4 sm:$0xff]   ;;  %v8396_v24 = vld [vmem:[#allocation6 + $0x230] ss:$8 sps:$4 sm:$0xff]  }
  0x77   :  { %4099 = vmatprep.subr.bf16.mxu1 %v8316_v29  ;;  %v8401_v23 = vld [vmem:[#allocation6 + $0x334] ss:$8 sps:$4 sm:$0xff]   ;;  %v8399_v25 = vld [vmem:[#allocation6 + $0x330] ss:$8 sps:$4 sm:$0xff]   ;;  %v8404_v26 = vld [vmem:[#allocation6 + $0x224] ss:$8 sps:$4 sm:$0xff]  }
  0x78   :  { %v8407_v27 = vld [vmem:[#allocation6 + $0x324] ss:$8 sps:$4 sm:$0xff]   ;;  %v8402_v28 = vld [vmem:[#allocation6 + $0x220] ss:$8 sps:$4 sm:$0xff]   ;;  %v8437_v51 = vld [vmem:[#allocation6 + $0x3d4] ss:$8 sps:$4 sm:$0xff]  }
  0x79   :  { %4059 = vmatpush1.bf16.msra.mxu0 %v8318_v30  ;;  %v8405_v29 = vld [vmem:[#allocation6 + $0x320] ss:$8 sps:$4 sm:$0xff]   ;;  %v8410_v30 = vld [vmem:[#allocation6 + $0x214] ss:$8 sps:$4 sm:$0xff]   ;;  %v8428_v46 = vld [vmem:[#allocation6 + $0x2e4] ss:$8 sps:$4 sm:$0xff]  }
  0x7a   :  { %4100 = vmatpush1.bf16.msra.mxu1 %v8319_v31  ;;  %4060 = vmatprep.subr.bf16.mxu0 %v8320_v32  ;;  %v8413_v31 = vld [vmem:[#allocation6 + $0x314] ss:$8 sps:$4 sm:$0xff]   ;;  %v8431_v47 = vld [vmem:[#allocation6 + $0x3e4] ss:$8 sps:$4 sm:$0xff]   ;;  %v8426_v48 = vld [vmem:[#allocation6 + $0x2e0] ss:$8 sps:$4 sm:$0xff]  }
  0x7b   :  { %4101 = vmatprep.subr.bf16.mxu1 %v8322_v33  ;;  %v9895_v32 = vld [vmem:[%s10429_s1 + $0x10] sm:$0x77]  ;;  %vm4033_vm0 = vcmask 64512   ;;  %vm4037_vm1 = vcmask 1043456   ;;  %s10100_s15 = sld [smem:[#allocation2 + $0x1]]  ;;  %vm9808_vm2 = vmmov 0  }
  0x7c   :  { %v8408_v33 = vld [vmem:[#allocation6 + $0x210] ss:$8 sps:$4 sm:$0xff]   ;;  %s10102_s16 = sld [smem:[#allocation2 + $0x2]]  ;;  %vm7151_vm3 = vcmask 523264   ;;  %vm7226_vm4 = vcmask 123904  }
  0x7d   :  { %4061 = vmatpush2.bf16.msra.mxu0 %v8324_v34  ;;  %v8411_v34 = vld [vmem:[#allocation6 + $0x310] ss:$8 sps:$4 sm:$0xff]   ;;  %s10104_s17 = sld [smem:[#allocation2 + $0x80]] }
  0x7e   :  { %4102 = vmatpush2.bf16.msra.mxu1 %v8325_v35  ;;  %4062 = vmatprep.subr.bf16.mxu0 %v8326_v36  ;;  %v7252_v35 = vcombine.high %v9895_v32, %v9895_v32  ;;  %v9902_v36 = vld [vmem:[%s10429_s1 + $0x18] sm:$0x77]  ;;  %s10106_s18 = sld [smem:[#allocation2 + $0x81]] }
  0x7f   :  { %4103 = vmatprep.subr.bf16.mxu1 %v8328_v37  ;;  %v8416_v37 = vld [vmem:[#allocation6 + $0x204] ss:$8 sps:$4 sm:$0xff]   ;;  %s10108_s19 = sld [smem:[#allocation2 + $0x82]] }
  0x80   :  { %s10110_s2 = sld [smem:[#allocation2 + $0x100]] }
  0x81   :  { %4063 = vmatpush2.bf16.msra.mxu0 %v8330_v38  ;;  %v7254_v38 = vcombine.high %v9902_v36, %v9902_v36  ;;  %s10112_s20 = sld [smem:[#allocation2 + $0x101]] }
  0x82   :  { %4104 = vmatpush2.bf16.msra.mxu1 %v8331_v39  ;;  %4064 = vmatprep.subr.bf16.mxu0 %v8332_v40  ;;  %v8419_v39 = vld [vmem:[#allocation6 + $0x304] ss:$8 sps:$4 sm:$0xff]   ;;  %v8414_v40 = vld [vmem:[#allocation6 + $0x200] ss:$8 sps:$4 sm:$0xff]   ;;  %s10114_s21 = sld [smem:[#allocation2 + $0x102]] }
  0x83   :  { %4105 = vmatprep.subr.bf16.mxu1 %v8334_v41  ;;  %v8417_v41 = vld [vmem:[#allocation6 + $0x300] ss:$8 sps:$4 sm:$0xff]   ;;  %s10116_s22 = sld [smem:[#allocation2 + $0x180]] }
  0x84   :  { %s10118_s23 = sld [smem:[#allocation2 + $0x181]] }
  0x85   :  { %4065 = vmatpush2.bf16.msra.mxu0 %v8336_v42  ;;  %v8422_v42 = vld [vmem:[#allocation6 + $0x2f4] ss:$8 sps:$4 sm:$0xff]   ;;  %s10122_s24 = sld [smem:[#allocation2 + $0x182]] }
  0x86   :  { %4106 = vmatpush2.bf16.msra.mxu1 %v8337_v43  ;;  %4066 = vmatprep.subr.bf16.mxu0 %v8338_v44  ;;  %v8425_v43 = vld [vmem:[#allocation6 + $0x3f4] ss:$8 sps:$4 sm:$0xff]   ;;  %v8420_v44 = vld [vmem:[#allocation6 + $0x2f0] ss:$8 sps:$4 sm:$0xff]   ;;  %s10124_s25 = sld [smem:[#allocation2 + $0x200]] }
  0x87   :  { %4107 = vmatprep.subr.bf16.mxu1 %v8340_v45  ;;  %v8423_v45 = vld [vmem:[#allocation6 + $0x3f0] ss:$8 sps:$4 sm:$0xff]   ;;  %s10126_s4 = sld [smem:[#allocation2 + $0x201]] }
  0x88   :  { %s10129_s26 = sld [smem:[#allocation2 + $0x202]] }
  0x89   :  { %4067 = vmatpush2.bf16.msra.mxu0 %v8342_v49  ;;  %v8429_v49 = vld [vmem:[#allocation6 + $0x3e0] ss:$8 sps:$4 sm:$0xff]   ;;  %s10180_s7 = sld [smem:[#allocation2 + $0x280]] }
  0x8a   :  { %4108 = vmatpush2.bf16.msra.mxu1 %v8343_v50  ;;  %4068 = vmatprep.subr.bf16.mxu0 %v8344_v52  ;;  %v8434_v50 = vld [vmem:[#allocation6 + $0x2d4] ss:$8 sps:$4 sm:$0xff]   ;;  %v8432_v52 = vld [vmem:[#allocation6 + $0x2d0] ss:$8 sps:$4 sm:$0xff]   ;;  %s10183_s9 = sld [smem:[#allocation2 + $0x281]] }
  0x8b   :  { %4109 = vmatprep.subr.bf16.mxu1 %v8346_v53  ;;  %v8435_v53 = vld [vmem:[#allocation6 + $0x3d0] ss:$8 sps:$4 sm:$0xff]   ;;  %s10189_s3 = sld [smem:[#allocation2 + $0x282]] }
  0x8c   :  { %s10199_s27 = sld [smem:[#allocation2 + $0x301]] }
  0x8d   :  { %4069 = vmatpush2.bf16.msra.mxu0 %v8348_v54  ;;  %v8440_v54 = vld [vmem:[#allocation6 + $0x2c4] ss:$8 sps:$4 sm:$0xff]   ;;  %s10213_s28 = sld [smem:[#allocation2 + $0x302]] }
  0x8e   :  { %4110 = vmatpush2.bf16.msra.mxu1 %v8349_v55  ;;  %4070 = vmatprep.subr.bf16.mxu0 %v8350_v56  ;;  %v8443_v55 = vld [vmem:[#allocation6 + $0x3c4] ss:$8 sps:$4 sm:$0xff]   ;;  %v8438_v56 = vld [vmem:[#allocation6 + $0x2c0] ss:$8 sps:$4 sm:$0xff]   ;;  %s10231_s29 = sld [smem:[#allocation2 + $0x300]] }
  0x8f   :  { %4111 = vmatprep.subr.bf16.mxu1 %v8352_v57  ;;  %v8441_v57 = vld [vmem:[#allocation6 + $0x3c0] ss:$8 sps:$4 sm:$0xff]   ;;  %s10235_s0 = sld [smem:[#allocation2 + $0x380]] }
  0x90   :  { %s10241_s5 = sld [smem:[#allocation2 + $0x381]] }
  0x91   :  { %4071 = vmatpush2.bf16.msra.mxu0 %v8354_v58  ;;  %v8446_v58 = vld [vmem:[#allocation6 + $0x2b4] ss:$8 sps:$4 sm:$0xff]   ;;  %s10246_s30 = sld [smem:[#allocation2 + $0x382]] }
  0x92   :  { %4112 = vmatpush2.bf16.msra.mxu1 %v8355_v59  ;;  %4072 = vmatprep.subr.bf16.mxu0 %v8356_v60  ;;  %v8449_v59 = vld [vmem:[#allocation6 + $0x3b4] ss:$8 sps:$4 sm:$0xff]   ;;  %v8444_v60 = vld [vmem:[#allocation6 + $0x2b0] ss:$8 sps:$4 sm:$0xff]  }
  0x93   :  { %4113 = vmatprep.subr.bf16.mxu1 %v8358_v61  ;;  %v8447_v61 = vld [vmem:[#allocation6 + $0x3b0] ss:$8 sps:$4 sm:$0xff]  }
  0x95   :  { %4073 = vmatpush2.bf16.msra.mxu0 %v8360_v62  ;;  %v8452_v62 = vld [vmem:[#allocation6 + $0x2a4] ss:$8 sps:$4 sm:$0xff]  }
  0x96   :  { %4114 = vmatpush2.bf16.msra.mxu1 %v8361_v63  ;;  %4074 = vmatprep.subr.bf16.mxu0 %v8362_v0  ;;  %v8455_v63 = vld [vmem:[#allocation6 + $0x3a4] ss:$8 sps:$4 sm:$0xff]   ;;  %v8450_v0 = vld [vmem:[#allocation6 + $0x2a0] ss:$8 sps:$4 sm:$0xff]  }
  0x97   :  { %4115 = vmatprep.subr.bf16.mxu1 %v8364_v1  ;;  %v8453_v1 = vld [vmem:[#allocation6 + $0x3a0] ss:$8 sps:$4 sm:$0xff]  }
  0x99   :  { %4075 = vmatpush2.bf16.msra.mxu0 %v8366_v2  ;;  %v8458_v2 = vld [vmem:[#allocation6 + $0x294] ss:$8 sps:$4 sm:$0xff]  }
  0x9a   :  { %4116 = vmatpush2.bf16.msra.mxu1 %v8367_v3  ;;  %4126 = vmatprep.subr.bf16.mxu0 %v8374_v4  ;;  %v8461_v3 = vld [vmem:[#allocation6 + $0x394] ss:$8 sps:$4 sm:$0xff]   ;;  %v8456_v4 = vld [vmem:[#allocation6 + $0x290] ss:$8 sps:$4 sm:$0xff]  }
  0x9b   :  { %4167 = vmatprep.subr.bf16.mxu1 %v8377_v5  ;;  %v8459_v5 = vld [vmem:[#allocation6 + $0x390] ss:$8 sps:$4 sm:$0xff]  }
  0x9c   :  { %4077 = vmatmul.mubr.bf16.vlgmr.msra.gmra.mxu0 %v7247_v6  ;;  %v8464_v6 = vld [vmem:[#allocation6 + $0x284] ss:$8 sps:$4 sm:$0xff]  }
  0x9d   :  { %4118 = vmatmul.mubr.bf16.vlgmr.msra.gmra.mxu1 %v7249_v7  ;;  %4127 = vmatpush1.bf16.msra.mxu0 %v8372_v8  ;;  %v8467_v7 = vld [vmem:[#allocation6 + $0x384] ss:$8 sps:$4 sm:$0xff]   ;;  %v8462_v8 = vld [vmem:[#allocation6 + $0x280] ss:$8 sps:$4 sm:$0xff]  }
  0x9e   :  { %4168 = vmatpush1.bf16.msra.mxu1 %v8375_v9  ;;  %4128 = vmatprep.subr.bf16.mxu0 %v8380_v10  ;;  %v8465_v9 = vld [vmem:[#allocation6 + $0x380] ss:$8 sps:$4 sm:$0xff]   ;;  %v8472_v10 = vld [vmem:[#allocation6 + $0x474] ss:$8 sps:$4 sm:$0xff]  }
  0x9f   :  { %4169 = vmatprep.subr.bf16.mxu1 %v8383_v11  ;;  %4158 = vmatprep.mubr.bf16.mxu0 %v7252_v35  ;;  %v8477_v11 = vld [vmem:[#allocation6 + $0x574] ss:$8 sps:$4 sm:$0xff]   ;;  %v8499_v35 = vld [vmem:[#allocation6 + $0x530] ss:$8 sps:$4 sm:$0xff]  }
  0xa0   :  { %4199 = vmatprep.mubr.bf16.mxu1 %v7254_v38  ;;  %v8502_v38 = vld [vmem:[#allocation6 + $0x420] ss:$8 sps:$4 sm:$0xff]  }
  0xa1   :  { %4129 = vmatpush1.bf16.msra.mxu0 %v8378_v12  ;;  %v7251_v12 = vcombine.low %v9895_v32, %v9895_v32  ;;  %v8498_v32 = vld [vmem:[#allocation6 + $0x434] ss:$8 sps:$4 sm:$0xff]  }
  0xa2   :  { %4170 = vmatpush1.bf16.msra.mxu1 %v8381_v13  ;;  %4130 = vmatprep.subr.bf16.mxu0 %v8386_v14  ;;  %v8470_v13 = vld [vmem:[#allocation6 + $0x470] ss:$8 sps:$4 sm:$0xff]   ;;  %v7253_v14 = vcombine.low %v9902_v36, %v9902_v36  ;;  %v8504_v36 = vld [vmem:[#allocation6 + $0x424] ss:$8 sps:$4 sm:$0xff]  }
  0xa3   :  { %4171 = vmatprep.subr.bf16.mxu1 %v8389_v15  ;;  %v8475_v15 = vld [vmem:[#allocation6 + $0x570] ss:$8 sps:$4 sm:$0xff]  }
  0xa5   :  { %4131 = vmatpush1.bf16.msra.mxu0 %v8384_v16  ;;  %v8480_v16 = vld [vmem:[#allocation6 + $0x464] ss:$8 sps:$4 sm:$0xff]  }
  0xa6   :  { %4172 = vmatpush1.bf16.msra.mxu1 %v8387_v17  ;;  %4132 = vmatprep.subr.bf16.mxu0 %v8392_v18  ;;  %v8483_v17 = vld [vmem:[#allocation6 + $0x564] ss:$8 sps:$4 sm:$0xff]  }
  0xa7   :  { %4173 = vmatprep.subr.bf16.mxu1 %v8395_v19  ;;  %v9913_v18 = vld [vmem:[%s10429_s1 + $0x20] sm:$0x77] }
  0xa8   :  { %v7256_v19 = vcombine.high %v9913_v18, %v9913_v18 }
  0xa9   :  { %4133 = vmatpush1.bf16.msra.mxu0 %v8390_v20  ;;  %v9920_v20 = vld [vmem:[%s10429_s1 + $0x28] sm:$0x77] }
  0xaa   :  { %4174 = vmatpush1.bf16.msra.mxu1 %v8393_v21  ;;  %4134 = vmatprep.subr.bf16.mxu0 %v8398_v22  ;;  %v8478_v21 = vld [vmem:[#allocation6 + $0x460] ss:$8 sps:$4 sm:$0xff]  }
  0xab   :  { %4175 = vmatprep.subr.bf16.mxu1 %v8401_v23  ;;  %v8481_v22 = vld [vmem:[#allocation6 + $0x560] ss:$8 sps:$4 sm:$0xff]   ;;  %v7258_v23 = vcombine.high %v9920_v20, %v9920_v20 }
  0xad   :  { %4135 = vmatpush1.bf16.msra.mxu0 %v8396_v24  ;;  %v8486_v24 = vld [vmem:[#allocation6 + $0x454] ss:$8 sps:$4 sm:$0xff]  }
  0xae   :  { %4176 = vmatpush1.bf16.msra.mxu1 %v8399_v25  ;;  %4136 = vmatprep.subr.bf16.mxu0 %v8404_v26  ;;  %v8489_v25 = vld [vmem:[#allocation6 + $0x554] ss:$8 sps:$4 sm:$0xff]   ;;  %v8484_v26 = vld [vmem:[#allocation6 + $0x450] ss:$8 sps:$4 sm:$0xff]  }
  0xaf   :  { %4177 = vmatprep.subr.bf16.mxu1 %v8407_v27  ;;  %v8487_v27 = vld [vmem:[#allocation6 + $0x550] ss:$8 sps:$4 sm:$0xff]  }
  0xb1   :  { %4137 = vmatpush1.bf16.msra.mxu0 %v8402_v28  ;;  %v8492_v28 = vld [vmem:[#allocation6 + $0x444] ss:$8 sps:$4 sm:$0xff]  }
  0xb2   :  { %4178 = vmatpush1.bf16.msra.mxu1 %v8405_v29  ;;  %4138 = vmatprep.subr.bf16.mxu0 %v8410_v30  ;;  %v8495_v29 = vld [vmem:[#allocation6 + $0x544] ss:$8 sps:$4 sm:$0xff]   ;;  %v8490_v30 = vld [vmem:[#allocation6 + $0x440] ss:$8 sps:$4 sm:$0xff]  }
  0xb3   :  { %4179 = vmatprep.subr.bf16.mxu1 %v8413_v31  ;;  %v8493_v31 = vld [vmem:[#allocation6 + $0x540] ss:$8 sps:$4 sm:$0xff]  }
  0xb5   :  { %4139 = vmatpush1.bf16.msra.mxu0 %v8408_v33  ;;  %v8501_v33 = vld [vmem:[#allocation6 + $0x534] ss:$8 sps:$4 sm:$0xff]  }
  0xb6   :  { %4180 = vmatpush1.bf16.msra.mxu1 %v8411_v34  ;;  %4140 = vmatprep.subr.bf16.mxu0 %v8416_v37  ;;  %v8496_v34 = vld [vmem:[#allocation6 + $0x430] ss:$8 sps:$4 sm:$0xff]   ;;  %v8507_v37 = vld [vmem:[#allocation6 + $0x524] ss:$8 sps:$4 sm:$0xff]  }
  0xb7   :  { %4181 = vmatprep.subr.bf16.mxu1 %v8419_v39  ;;  %v8505_v39 = vld [vmem:[#allocation6 + $0x520] ss:$8 sps:$4 sm:$0xff]  }
  0xb9   :  { %4141 = vmatpush1.bf16.msra.mxu0 %v8414_v40  ;;  %v8510_v40 = vld [vmem:[#allocation6 + $0x414] ss:$8 sps:$4 sm:$0xff]  }
  0xba   :  { %4182 = vmatpush1.bf16.msra.mxu1 %v8417_v41  ;;  %4142 = vmatprep.subr.bf16.mxu0 %v8422_v42  ;;  %v8513_v41 = vld [vmem:[#allocation6 + $0x514] ss:$8 sps:$4 sm:$0xff]   ;;  %v8508_v42 = vld [vmem:[#allocation6 + $0x410] ss:$8 sps:$4 sm:$0xff]  }
  0xbb   :  { %4183 = vmatprep.subr.bf16.mxu1 %v8425_v43  ;;  %v8511_v43 = vld [vmem:[#allocation6 + $0x510] ss:$8 sps:$4 sm:$0xff]  }
  0xbd   :  { %4143 = vmatpush2.bf16.msra.mxu0 %v8420_v44  ;;  %v8516_v44 = vld [vmem:[#allocation6 + $0x404] ss:$8 sps:$4 sm:$0xff]  }
  0xbe   :  { %4184 = vmatpush2.bf16.msra.mxu1 %v8423_v45  ;;  %4144 = vmatprep.subr.bf16.mxu0 %v8428_v46  ;;  %v8519_v45 = vld [vmem:[#allocation6 + $0x504] ss:$8 sps:$4 sm:$0xff]   ;;  %v8514_v46 = vld [vmem:[#allocation6 + $0x400] ss:$8 sps:$4 sm:$0xff]  }
  0xbf   :  { %4185 = vmatprep.subr.bf16.mxu1 %v8431_v47  ;;  %v8517_v47 = vld [vmem:[#allocation6 + $0x500] ss:$8 sps:$4 sm:$0xff]  }
  0xc1   :  { %4145 = vmatpush2.bf16.msra.mxu0 %v8426_v48  ;;  %v8522_v48 = vld [vmem:[#allocation6 + $0x4f4] ss:$8 sps:$4 sm:$0xff]  }
  0xc2   :  { %4186 = vmatpush2.bf16.msra.mxu1 %v8429_v49  ;;  %4146 = vmatprep.subr.bf16.mxu0 %v8434_v50  ;;  %v8525_v49 = vld [vmem:[#allocation6 + $0x5f4] ss:$8 sps:$4 sm:$0xff]   ;;  %v8520_v50 = vld [vmem:[#allocation6 + $0x4f0] ss:$8 sps:$4 sm:$0xff]  }
  0xc3   :  { %4187 = vmatprep.subr.bf16.mxu1 %v8437_v51  ;;  %v8523_v51 = vld [vmem:[#allocation6 + $0x5f0] ss:$8 sps:$4 sm:$0xff]  }
  0xc5   :  { %4147 = vmatpush2.bf16.msra.mxu0 %v8432_v52  ;;  %v8528_v52 = vld [vmem:[#allocation6 + $0x4e4] ss:$8 sps:$4 sm:$0xff]  }
  0xc6   :  { %4188 = vmatpush2.bf16.msra.mxu1 %v8435_v53  ;;  %4148 = vmatprep.subr.bf16.mxu0 %v8440_v54  ;;  %v8531_v53 = vld [vmem:[#allocation6 + $0x5e4] ss:$8 sps:$4 sm:$0xff]   ;;  %v8526_v54 = vld [vmem:[#allocation6 + $0x4e0] ss:$8 sps:$4 sm:$0xff]  }
  0xc7   :  { %4189 = vmatprep.subr.bf16.mxu1 %v8443_v55  ;;  %v8529_v55 = vld [vmem:[#allocation6 + $0x5e0] ss:$8 sps:$4 sm:$0xff]  }
  0xc9   :  { %4149 = vmatpush2.bf16.msra.mxu0 %v8438_v56  ;;  %v8534_v56 = vld [vmem:[#allocation6 + $0x4d4] ss:$8 sps:$4 sm:$0xff]  }
  0xca   :  { %4190 = vmatpush2.bf16.msra.mxu1 %v8441_v57  ;;  %4150 = vmatprep.subr.bf16.mxu0 %v8446_v58  ;;  %v8537_v57 = vld [vmem:[#allocation6 + $0x5d4] ss:$8 sps:$4 sm:$0xff]   ;;  %v8532_v58 = vld [vmem:[#allocation6 + $0x4d0] ss:$8 sps:$4 sm:$0xff]  }
  0xcb   :  { %4191 = vmatprep.subr.bf16.mxu1 %v8449_v59  ;;  %v8535_v59 = vld [vmem:[#allocation6 + $0x5d0] ss:$8 sps:$4 sm:$0xff]  }
  0xcd   :  { %4151 = vmatpush2.bf16.msra.mxu0 %v8444_v60  ;;  %v8540_v60 = vld [vmem:[#allocation6 + $0x4c4] ss:$8 sps:$4 sm:$0xff]  }
  0xce   :  { %4192 = vmatpush2.bf16.msra.mxu1 %v8447_v61  ;;  %4152 = vmatprep.subr.bf16.mxu0 %v8452_v62  ;;  %v8543_v61 = vld [vmem:[#allocation6 + $0x5c4] ss:$8 sps:$4 sm:$0xff]   ;;  %v8538_v62 = vld [vmem:[#allocation6 + $0x4c0] ss:$8 sps:$4 sm:$0xff]  }
  0xcf   :  { %4193 = vmatprep.subr.bf16.mxu1 %v8455_v63  ;;  %v8541_v63 = vld [vmem:[#allocation6 + $0x5c0] ss:$8 sps:$4 sm:$0xff]  }
  0xd1   :  { %4153 = vmatpush2.bf16.msra.mxu0 %v8450_v0  ;;  %v8546_v0 = vld [vmem:[#allocation6 + $0x4b4] ss:$8 sps:$4 sm:$0xff]  }
  0xd2   :  { %4194 = vmatpush2.bf16.msra.mxu1 %v8453_v1  ;;  %4154 = vmatprep.subr.bf16.mxu0 %v8458_v2  ;;  %v8549_v1 = vld [vmem:[#allocation6 + $0x5b4] ss:$8 sps:$4 sm:$0xff]   ;;  %v8544_v2 = vld [vmem:[#allocation6 + $0x4b0] ss:$8 sps:$4 sm:$0xff]  }
  0xd3   :  { %4195 = vmatprep.subr.bf16.mxu1 %v8461_v3  ;;  %v8547_v3 = vld [vmem:[#allocation6 + $0x5b0] ss:$8 sps:$4 sm:$0xff]  }
  0xd5   :  { %4155 = vmatpush2.bf16.msra.mxu0 %v8456_v4  ;;  %v8552_v4 = vld [vmem:[#allocation6 + $0x4a4] ss:$8 sps:$4 sm:$0xff]  }
  0xd6   :  { %4196 = vmatpush2.bf16.msra.mxu1 %v8459_v5  ;;  %4156 = vmatprep.subr.bf16.mxu0 %v8464_v6  ;;  %v8555_v5 = vld [vmem:[#allocation6 + $0x5a4] ss:$8 sps:$4 sm:$0xff]   ;;  %v8550_v6 = vld [vmem:[#allocation6 + $0x4a0] ss:$8 sps:$4 sm:$0xff]  }
  0xd7   :  { %4197 = vmatprep.subr.bf16.mxu1 %v8467_v7  ;;  %v8553_v7 = vld [vmem:[#allocation6 + $0x5a0] ss:$8 sps:$4 sm:$0xff]  }
  0xd9   :  { %4157 = vmatpush2.bf16.msra.mxu0 %v8462_v8  ;;  %v8558_v8 = vld [vmem:[#allocation6 + $0x494] ss:$8 sps:$4 sm:$0xff]  }
  0xda   :  { %4198 = vmatpush2.bf16.msra.mxu1 %v8465_v9  ;;  %4208 = vmatprep.subr.bf16.mxu0 %v8472_v10  ;;  %v8561_v9 = vld [vmem:[#allocation6 + $0x594] ss:$8 sps:$4 sm:$0xff]   ;;  %v8556_v10 = vld [vmem:[#allocation6 + $0x490] ss:$8 sps:$4 sm:$0xff]  }
  0xdb   :  { %4249 = vmatprep.subr.bf16.mxu1 %v8477_v11  ;;  %v8559_v11 = vld [vmem:[#allocation6 + $0x590] ss:$8 sps:$4 sm:$0xff]  }
  0xdc   :  { %4159 = vmatmul.mubr.bf16.vlgmr.msra.gmra.mxu0 %v7251_v12  ;;  %v8564_v12 = vld [vmem:[#allocation6 + $0x484] ss:$8 sps:$4 sm:$0xff]  }
  0xdd   :  { %4200 = vmatmul.mubr.bf16.vlgmr.msra.gmra.mxu1 %v7253_v14  ;;  %4209 = vmatpush1.bf16.msra.mxu0 %v8470_v13  ;;  %v8567_v13 = vld [vmem:[#allocation6 + $0x584] ss:$8 sps:$4 sm:$0xff]   ;;  %v8562_v14 = vld [vmem:[#allocation6 + $0x480] ss:$8 sps:$4 sm:$0xff]  }
  0xde   :  { %4250 = vmatpush1.bf16.msra.mxu1 %v8475_v15  ;;  %4210 = vmatprep.subr.bf16.mxu0 %v8480_v16  ;;  %v8565_v15 = vld [vmem:[#allocation6 + $0x580] ss:$8 sps:$4 sm:$0xff]   ;;  %v8572_v16 = vld [vmem:[#allocation6 + $0x674] ss:$8 sps:$4 sm:$0xff]  }
  0xdf   :  { %4251 = vmatprep.subr.bf16.mxu1 %v8483_v17  ;;  %4240 = vmatprep.mubr.bf16.mxu0 %v7256_v19  ;;  %v8577_v17 = vld [vmem:[#allocation6 + $0x774] ss:$8 sps:$4 sm:$0xff]   ;;  %v8570_v19 = vld [vmem:[#allocation6 + $0x670] ss:$8 sps:$4 sm:$0xff]  }
  0xe0   :  { %4281 = vmatprep.mubr.bf16.mxu1 %v7258_v23  ;;  %v7257_v23 = vcombine.low %v9920_v20, %v9920_v20 }
  0xe1   :  { %4211 = vmatpush1.bf16.msra.mxu0 %v8478_v21  ;;  %v8575_v21 = vld [vmem:[#allocation6 + $0x770] ss:$8 sps:$4 sm:$0xff]  }
  0xe2   :  { %4252 = vmatpush1.bf16.msra.mxu1 %v8481_v22  ;;  %4212 = vmatprep.subr.bf16.mxu0 %v8486_v24  ;;  %v7255_v22 = vcombine.low %v9913_v18, %v9913_v18  ;;  %v9931_v24 = vld [vmem:[%s10429_s1 + $0x30] sm:$0x77] }
  0xe3   :  { %4253 = vmatprep.subr.bf16.mxu1 %v8489_v25  ;;  %v9936_v25 = vld [vmem:[%s10429_s1 + $0x38] sm:$0x77]  ;;  %v7260_v18 = vcombine.high %v9931_v24, %v9931_v24 }
  0xe4   :  { %v7262_v20 = vcombine.high %v9936_v25, %v9936_v25 }
  0xe5   :  { %4213 = vmatpush1.bf16.msra.mxu0 %v8484_v26  ;;  %v8580_v26 = vld [vmem:[#allocation6 + $0x664] ss:$8 sps:$4 sm:$0xff]  }
  0xe6   :  { %4254 = vmatpush1.bf16.msra.mxu1 %v8487_v27  ;;  %4214 = vmatprep.subr.bf16.mxu0 %v8492_v28  ;;  %v8583_v27 = vld [vmem:[#allocation6 + $0x764] ss:$8 sps:$4 sm:$0xff]   ;;  %v8578_v28 = vld [vmem:[#allocation6 + $0x660] ss:$8 sps:$4 sm:$0xff]  }
  0xe7   :  { %4255 = vmatprep.subr.bf16.mxu1 %v8495_v29  ;;  %v8581_v29 = vld [vmem:[#allocation6 + $0x760] ss:$8 sps:$4 sm:$0xff]  }
  0xe9   :  { %4215 = vmatpush1.bf16.msra.mxu0 %v8490_v30  ;;  %v8586_v30 = vld [vmem:[#allocation6 + $0x654] ss:$8 sps:$4 sm:$0xff]  }
  0xea   :  { %4256 = vmatpush1.bf16.msra.mxu1 %v8493_v31  ;;  %4216 = vmatprep.subr.bf16.mxu0 %v8498_v32  ;;  %v8589_v31 = vld [vmem:[#allocation6 + $0x754] ss:$8 sps:$4 sm:$0xff]   ;;  %v8584_v32 = vld [vmem:[#allocation6 + $0x650] ss:$8 sps:$4 sm:$0xff]  }
  0xeb   :  { %4257 = vmatprep.subr.bf16.mxu1 %v8501_v33  ;;  %v8587_v33 = vld [vmem:[#allocation6 + $0x750] ss:$8 sps:$4 sm:$0xff]  }
  0xed   :  { %4217 = vmatpush1.bf16.msra.mxu0 %v8496_v34  ;;  %v8592_v34 = vld [vmem:[#allocation6 + $0x644] ss:$8 sps:$4 sm:$0xff]  }
  0xee   :  { %4258 = vmatpush1.bf16.msra.mxu1 %v8499_v35  ;;  %4218 = vmatprep.subr.bf16.mxu0 %v8504_v36  ;;  %v8595_v35 = vld [vmem:[#allocation6 + $0x744] ss:$8 sps:$4 sm:$0xff]   ;;  %v8590_v36 = vld [vmem:[#allocation6 + $0x640] ss:$8 sps:$4 sm:$0xff]  }
  0xef   :  { %4259 = vmatprep.subr.bf16.mxu1 %v8507_v37  ;;  %v8593_v37 = vld [vmem:[#allocation6 + $0x740] ss:$8 sps:$4 sm:$0xff]  }
  0xf1   :  { %4219 = vmatpush1.bf16.msra.mxu0 %v8502_v38  ;;  %v8598_v38 = vld [vmem:[#allocation6 + $0x634] ss:$8 sps:$4 sm:$0xff]  }
  0xf2   :  { %4260 = vmatpush1.bf16.msra.mxu1 %v8505_v39  ;;  %4220 = vmatprep.subr.bf16.mxu0 %v8510_v40  ;;  %v8601_v39 = vld [vmem:[#allocation6 + $0x734] ss:$8 sps:$4 sm:$0xff]   ;;  %v8596_v40 = vld [vmem:[#allocation6 + $0x630] ss:$8 sps:$4 sm:$0xff]  }
  0xf3   :  { %4261 = vmatprep.subr.bf16.mxu1 %v8513_v41  ;;  %v8599_v41 = vld [vmem:[#allocation6 + $0x730] ss:$8 sps:$4 sm:$0xff]  }
  0xf5   :  { %4221 = vmatpush1.bf16.msra.mxu0 %v8508_v42  ;;  %v8604_v42 = vld [vmem:[#allocation6 + $0x624] ss:$8 sps:$4 sm:$0xff]  }
  0xf6   :  { %4262 = vmatpush1.bf16.msra.mxu1 %v8511_v43  ;;  %4222 = vmatprep.subr.bf16.mxu0 %v8516_v44  ;;  %v8607_v43 = vld [vmem:[#allocation6 + $0x724] ss:$8 sps:$4 sm:$0xff]   ;;  %v8602_v44 = vld [vmem:[#allocation6 + $0x620] ss:$8 sps:$4 sm:$0xff]  }
  0xf7   :  { %4263 = vmatprep.subr.bf16.mxu1 %v8519_v45  ;;  %v8605_v45 = vld [vmem:[#allocation6 + $0x720] ss:$8 sps:$4 sm:$0xff]  }
  0xf9   :  { %4223 = vmatpush1.bf16.msra.mxu0 %v8514_v46  ;;  %v8610_v46 = vld [vmem:[#allocation6 + $0x614] ss:$8 sps:$4 sm:$0xff]  }
  0xfa   :  { %4264 = vmatpush1.bf16.msra.mxu1 %v8517_v47  ;;  %4224 = vmatprep.subr.bf16.mxu0 %v8522_v48  ;;  %v8613_v47 = vld [vmem:[#allocation6 + $0x714] ss:$8 sps:$4 sm:$0xff]   ;;  %v8608_v48 = vld [vmem:[#allocation6 + $0x610] ss:$8 sps:$4 sm:$0xff]  }
  0xfb   :  { %4265 = vmatprep.subr.bf16.mxu1 %v8525_v49  ;;  %v8611_v49 = vld [vmem:[#allocation6 + $0x710] ss:$8 sps:$4 sm:$0xff]  }
  0xfd   :  { %4225 = vmatpush2.bf16.msra.mxu0 %v8520_v50  ;;  %v8616_v50 = vld [vmem:[#allocation6 + $0x604] ss:$8 sps:$4 sm:$0xff]  }
  0xfe   :  { %4266 = vmatpush2.bf16.msra.mxu1 %v8523_v51  ;;  %4226 = vmatprep.subr.bf16.mxu0 %v8528_v52  ;;  %v8619_v51 = vld [vmem:[#allocation6 + $0x704] ss:$8 sps:$4 sm:$0xff]   ;;  %v8614_v52 = vld [vmem:[#allocation6 + $0x600] ss:$8 sps:$4 sm:$0xff]  }
  0xff   :  { %4267 = vmatprep.subr.bf16.mxu1 %v8531_v53  ;;  %v8617_v53 = vld [vmem:[#allocation6 + $0x700] ss:$8 sps:$4 sm:$0xff]  }
 0x101   :  { %4227 = vmatpush2.bf16.msra.mxu0 %v8526_v54  ;;  %v8622_v54 = vld [vmem:[#allocation6 + $0x6f4] ss:$8 sps:$4 sm:$0xff]  }
 0x102   :  { %4268 = vmatpush2.bf16.msra.mxu1 %v8529_v55  ;;  %4228 = vmatprep.subr.bf16.mxu0 %v8534_v56  ;;  %v8625_v55 = vld [vmem:[#allocation6 + $0x7f4] ss:$8 sps:$4 sm:$0xff]   ;;  %v8620_v56 = vld [vmem:[#allocation6 + $0x6f0] ss:$8 sps:$4 sm:$0xff]  }
 0x103   :  { %4269 = vmatprep.subr.bf16.mxu1 %v8537_v57  ;;  %v8623_v57 = vld [vmem:[#allocation6 + $0x7f0] ss:$8 sps:$4 sm:$0xff]  }
 0x105   :  { %4229 = vmatpush2.bf16.msra.mxu0 %v8532_v58  ;;  %v8628_v58 = vld [vmem:[#allocation6 + $0x6e4] ss:$8 sps:$4 sm:$0xff]  }
 0x106   :  { %4270 = vmatpush2.bf16.msra.mxu1 %v8535_v59  ;;  %4230 = vmatprep.subr.bf16.mxu0 %v8540_v60  ;;  %v8631_v59 = vld [vmem:[#allocation6 + $0x7e4] ss:$8 sps:$4 sm:$0xff]   ;;  %v8626_v60 = vld [vmem:[#allocation6 + $0x6e0] ss:$8 sps:$4 sm:$0xff]  }
 0x107   :  { %4271 = vmatprep.subr.bf16.mxu1 %v8543_v61  ;;  %v8629_v61 = vld [vmem:[#allocation6 + $0x7e0] ss:$8 sps:$4 sm:$0xff]  }
 0x109   :  { %4231 = vmatpush2.bf16.msra.mxu0 %v8538_v62  ;;  %v8634_v62 = vld [vmem:[#allocation6 + $0x6d4] ss:$8 sps:$4 sm:$0xff]  }
 0x10a   :  { %4272 = vmatpush2.bf16.msra.mxu1 %v8541_v63  ;;  %4232 = vmatprep.subr.bf16.mxu0 %v8546_v0  ;;  %v8637_v63 = vld [vmem:[#allocation6 + $0x7d4] ss:$8 sps:$4 sm:$0xff]   ;;  %v8632_v0 = vld [vmem:[#allocation6 + $0x6d0] ss:$8 sps:$4 sm:$0xff]  }
 0x10b   :  { %4273 = vmatprep.subr.bf16.mxu1 %v8549_v1  ;;  %v8635_v1 = vld [vmem:[#allocation6 + $0x7d0] ss:$8 sps:$4 sm:$0xff]  }
 0x10d   :  { %4233 = vmatpush2.bf16.msra.mxu0 %v8544_v2  ;;  %v8640_v2 = vld [vmem:[#allocation6 + $0x6c4] ss:$8 sps:$4 sm:$0xff]  }
 0x10e   :  { %4274 = vmatpush2.bf16.msra.mxu1 %v8547_v3  ;;  %4234 = vmatprep.subr.bf16.mxu0 %v8552_v4  ;;  %v8643_v3 = vld [vmem:[#allocation6 + $0x7c4] ss:$8 sps:$4 sm:$0xff]   ;;  %v8638_v4 = vld [vmem:[#allocation6 + $0x6c0] ss:$8 sps:$4 sm:$0xff]  }
 0x10f   :  { %4275 = vmatprep.subr.bf16.mxu1 %v8555_v5  ;;  %v8641_v5 = vld [vmem:[#allocation6 + $0x7c0] ss:$8 sps:$4 sm:$0xff]  }
 0x111   :  { %4235 = vmatpush2.bf16.msra.mxu0 %v8550_v6  ;;  %v8646_v6 = vld [vmem:[#allocation6 + $0x6b4] ss:$8 sps:$4 sm:$0xff]  }
 0x112   :  { %4276 = vmatpush2.bf16.msra.mxu1 %v8553_v7  ;;  %4236 = vmatprep.subr.bf16.mxu0 %v8558_v8  ;;  %v8649_v7 = vld [vmem:[#allocation6 + $0x7b4] ss:$8 sps:$4 sm:$0xff]   ;;  %v8644_v8 = vld [vmem:[#allocation6 + $0x6b0] ss:$8 sps:$4 sm:$0xff]  }
 0x113   :  { %4277 = vmatprep.subr.bf16.mxu1 %v8561_v9  ;;  %v8647_v9 = vld [vmem:[#allocation6 + $0x7b0] ss:$8 sps:$4 sm:$0xff]  }
 0x115   :  { %4237 = vmatpush2.bf16.msra.mxu0 %v8556_v10  ;;  %v8652_v10 = vld [vmem:[#allocation6 + $0x6a4] ss:$8 sps:$4 sm:$0xff]  }
 0x116   :  { %4278 = vmatpush2.bf16.msra.mxu1 %v8559_v11  ;;  %4238 = vmatprep.subr.bf16.mxu0 %v8564_v12  ;;  %v8655_v11 = vld [vmem:[#allocation6 + $0x7a4] ss:$8 sps:$4 sm:$0xff]   ;;  %v8650_v12 = vld [vmem:[#allocation6 + $0x6a0] ss:$8 sps:$4 sm:$0xff]  }
 0x117   :  { %4279 = vmatprep.subr.bf16.mxu1 %v8567_v13  ;;  %v8653_v13 = vld [vmem:[#allocation6 + $0x7a0] ss:$8 sps:$4 sm:$0xff]  }
 0x119   :  { %4239 = vmatpush2.bf16.msra.mxu0 %v8562_v14  ;;  %v8658_v14 = vld [vmem:[#allocation6 + $0x694] ss:$8 sps:$4 sm:$0xff]  }
 0x11a   :  { %4280 = vmatpush2.bf16.msra.mxu1 %v8565_v15  ;;  %4290 = vmatprep.subr.bf16.mxu0 %v8572_v16  ;;  %v8661_v15 = vld [vmem:[#allocation6 + $0x794] ss:$8 sps:$4 sm:$0xff]   ;;  %v8656_v16 = vld [vmem:[#allocation6 + $0x690] ss:$8 sps:$4 sm:$0xff]  }
 0x11b   :  { %4331 = vmatprep.subr.bf16.mxu1 %v8577_v17  ;;  %v8659_v17 = vld [vmem:[#allocation6 + $0x790] ss:$8 sps:$4 sm:$0xff]  }
 0x11c   :  { %4241 = vmatmul.mubr.bf16.vlgmr.msra.gmra.mxu0 %v7255_v22  ;;  %v8662_v22 = vld [vmem:[#allocation6 + $0x680] ss:$8 sps:$4 sm:$0xff]  }
 0x11d   :  { %4282 = vmatmul.mubr.bf16.vlgmr.msra.gmra.mxu1 %v7257_v23  ;;  %4291 = vmatpush1.bf16.msra.mxu0 %v8570_v19  ;;  %v8664_v19 = vld [vmem:[#allocation6 + $0x684] ss:$8 sps:$4 sm:$0xff]   ;;  %v8665_v23 = vld [vmem:[#allocation6 + $0x780] ss:$8 sps:$4 sm:$0xff]  }
 0x11e   :  { %4332 = vmatpush1.bf16.msra.mxu1 %v8575_v21  ;;  %4292 = vmatprep.subr.bf16.mxu0 %v8580_v26  ;;  %v8667_v21 = vld [vmem:[#allocation6 + $0x784] ss:$8 sps:$4 sm:$0xff]   ;;  %v8672_v26 = vld [vmem:[#allocation6 + $0x874] ss:$8 sps:$4 sm:$0xff]  }
 0x11f   :  { %4333 = vmatprep.subr.bf16.mxu1 %v8583_v27  ;;  %4322 = vmatprep.mubr.bf16.mxu0 %v7260_v18  ;;  %v8677_v27 = vld [vmem:[#allocation6 + $0x974] ss:$8 sps:$4 sm:$0xff]   ;;  %v9945_v18 = vld [vmem:[%s10429_s1 + $0x40] sm:$0x77] }
 0x120   :  { %4363 = vmatprep.mubr.bf16.mxu1 %v7262_v20  ;;  %v7259_v20 = vcombine.low %v9931_v24, %v9931_v24 }
 0x121   :  { %4293 = vmatpush1.bf16.msra.mxu0 %v8578_v28  ;;  %v7261_v28 = vcombine.low %v9936_v25, %v9936_v25 }
 0x122   :  { %4334 = vmatpush1.bf16.msra.mxu1 %v8581_v29  ;;  %4294 = vmatprep.subr.bf16.mxu0 %v8586_v30  ;;  %v9954_v29 = vld [vmem:[%s10429_s1 + $0x48] sm:$0x77]  ;;  %v8670_v30 = vld [vmem:[#allocation6 + $0x870] ss:$8 sps:$4 sm:$0xff]  }
 0x123   :  { %4335 = vmatprep.subr.bf16.mxu1 %v8589_v31  ;;  %v8675_v31 = vld [vmem:[#allocation6 + $0x970] ss:$8 sps:$4 sm:$0xff]   ;;  %v7266_v24 = vcombine.high %v9954_v29, %v9954_v29 }
 0x125   :  { %4295 = vmatpush1.bf16.msra.mxu0 %v8584_v32  ;;  %v8680_v32 = vld [vmem:[#allocation6 + $0x864] ss:$8 sps:$4 sm:$0xff]  }
 0x126   :  { %4336 = vmatpush1.bf16.msra.mxu1 %v8587_v33  ;;  %4296 = vmatprep.subr.bf16.mxu0 %v8592_v34  ;;  %v8683_v33 = vld [vmem:[#allocation6 + $0x964] ss:$8 sps:$4 sm:$0xff]   ;;  %v7264_v34 = vcombine.high %v9945_v18, %v9945_v18 }
 0x127   :  { %4337 = vmatprep.subr.bf16.mxu1 %v8595_v35 }
 0x129   :  { %4297 = vmatpush1.bf16.msra.mxu0 %v8590_v36  ;;  %v8678_v36 = vld [vmem:[#allocation6 + $0x860] ss:$8 sps:$4 sm:$0xff]  }
 0x12a   :  { %4338 = vmatpush1.bf16.msra.mxu1 %v8593_v37  ;;  %4298 = vmatprep.subr.bf16.mxu0 %v8598_v38  ;;  %v8681_v38 = vld [vmem:[#allocation6 + $0x960] ss:$8 sps:$4 sm:$0xff]  }
 0x12b   :  { %4339 = vmatprep.subr.bf16.mxu1 %v8601_v39  ;;  %v8686_v39 = vld [vmem:[#allocation6 + $0x854] ss:$8 sps:$4 sm:$0xff]  }
 0x12d   :  { %4299 = vmatpush1.bf16.msra.mxu0 %v8596_v40 }
 0x12e   :  { %4340 = vmatpush1.bf16.msra.mxu1 %v8599_v41  ;;  %4300 = vmatprep.subr.bf16.mxu0 %v8604_v42  ;;  %v8689_v42 = vld [vmem:[#allocation6 + $0x954] ss:$8 sps:$4 sm:$0xff]  }
 0x12f   :  { %4341 = vmatprep.subr.bf16.mxu1 %v8607_v43 }
 0x131   :  { %4301 = vmatpush1.bf16.msra.mxu0 %v8602_v44 }
 0x132   :  { %4342 = vmatpush1.bf16.msra.mxu1 %v8605_v45  ;;  %4302 = vmatprep.subr.bf16.mxu0 %v8610_v46  ;;  %v8684_v45 = vld [vmem:[#allocation6 + $0x850] ss:$8 sps:$4 sm:$0xff]  }
 0x133   :  { %4343 = vmatprep.subr.bf16.mxu1 %v8613_v47  ;;  %v8687_v46 = vld [vmem:[#allocation6 + $0x950] ss:$8 sps:$4 sm:$0xff]  }
 0x135   :  { %4303 = vmatpush1.bf16.msra.mxu0 %v8608_v48  ;;  %v8692_v48 = vld [vmem:[#allocation6 + $0x844] ss:$8 sps:$4 sm:$0xff]  }
 0x136   :  { %4344 = vmatpush1.bf16.msra.mxu1 %v8611_v49  ;;  %4304 = vmatprep.subr.bf16.mxu0 %v8616_v50  ;;  %v8695_v50 = vld [vmem:[#allocation6 + $0x944] ss:$8 sps:$4 sm:$0xff]  }
 0x137   :  { %4345 = vmatprep.subr.bf16.mxu1 %v8619_v51 }
 0x139   :  { %4305 = vmatpush1.bf16.msra.mxu0 %v8614_v52  ;;  %v8690_v52 = vld [vmem:[#allocation6 + $0x840] ss:$8 sps:$4 sm:$0xff]  }
 0x13a   :  { %4346 = vmatpush1.bf16.msra.mxu1 %v8617_v53  ;;  %4306 = vmatprep.subr.bf16.mxu0 %v8622_v54  ;;  %v8693_v53 = vld [vmem:[#allocation6 + $0x940] ss:$8 sps:$4 sm:$0xff]   ;;  %v8698_v54 = vld [vmem:[#allocation6 + $0x834] ss:$8 sps:$4 sm:$0xff]  }
 0x13b   :  { %4347 = vmatprep.subr.bf16.mxu1 %v8625_v55  ;;  %v8701_v55 = vld [vmem:[#allocation6 + $0x934] ss:$8 sps:$4 sm:$0xff]  }
 0x13d   :  { %4307 = vmatpush2.bf16.msra.mxu0 %v8620_v56  ;;  %v8696_v56 = vld [vmem:[#allocation6 + $0x830] ss:$8 sps:$4 sm:$0xff]  }
 0x13e   :  { %4348 = vmatpush2.bf16.msra.mxu1 %v8623_v57  ;;  %4308 = vmatprep.subr.bf16.mxu0 %v8628_v58  ;;  %v8699_v57 = vld [vmem:[#allocation6 + $0x930] ss:$8 sps:$4 sm:$0xff]   ;;  %v8704_v58 = vld [vmem:[#allocation6 + $0x824] ss:$8 sps:$4 sm:$0xff]  }
 0x13f   :  { %4349 = vmatprep.subr.bf16.mxu1 %v8631_v59  ;;  %v8707_v59 = vld [vmem:[#allocation6 + $0x924] ss:$8 sps:$4 sm:$0xff]  }
 0x141   :  { %4309 = vmatpush2.bf16.msra.mxu0 %v8626_v60  ;;  %v8702_v60 = vld [vmem:[#allocation6 + $0x820] ss:$8 sps:$4 sm:$0xff]  }
 0x142   :  { %4350 = vmatpush2.bf16.msra.mxu1 %v8629_v61  ;;  %4310 = vmatprep.subr.bf16.mxu0 %v8634_v62  ;;  %v8705_v61 = vld [vmem:[#allocation6 + $0x920] ss:$8 sps:$4 sm:$0xff]   ;;  %v8710_v62 = vld [vmem:[#allocation6 + $0x814] ss:$8 sps:$4 sm:$0xff]  }
 0x143   :  { %4351 = vmatprep.subr.bf16.mxu1 %v8637_v63  ;;  %v8713_v63 = vld [vmem:[#allocation6 + $0x914] ss:$8 sps:$4 sm:$0xff]  }
 0x145   :  { %4311 = vmatpush2.bf16.msra.mxu0 %v8632_v0  ;;  %v8708_v0 = vld [vmem:[#allocation6 + $0x810] ss:$8 sps:$4 sm:$0xff]  }
 0x146   :  { %4352 = vmatpush2.bf16.msra.mxu1 %v8635_v1  ;;  %4312 = vmatprep.subr.bf16.mxu0 %v8640_v2  ;;  %v8711_v1 = vld [vmem:[#allocation6 + $0x910] ss:$8 sps:$4 sm:$0xff]   ;;  %v8716_v2 = vld [vmem:[#allocation6 + $0x804] ss:$8 sps:$4 sm:$0xff]  }
 0x147   :  { %4353 = vmatprep.subr.bf16.mxu1 %v8643_v3  ;;  %v8719_v3 = vld [vmem:[#allocation6 + $0x904] ss:$8 sps:$4 sm:$0xff]  }
 0x149   :  { %4313 = vmatpush2.bf16.msra.mxu0 %v8638_v4  ;;  %v8714_v4 = vld [vmem:[#allocation6 + $0x800] ss:$8 sps:$4 sm:$0xff]  }
 0x14a   :  { %4354 = vmatpush2.bf16.msra.mxu1 %v8641_v5  ;;  %4314 = vmatprep.subr.bf16.mxu0 %v8646_v6  ;;  %v8717_v5 = vld [vmem:[#allocation6 + $0x900] ss:$8 sps:$4 sm:$0xff]   ;;  %v8722_v6 = vld [vmem:[#allocation6 + $0x8f4] ss:$8 sps:$4 sm:$0xff]  }
 0x14b   :  { %4355 = vmatprep.subr.bf16.mxu1 %v8649_v7  ;;  %v8725_v7 = vld [vmem:[#allocation6 + $0x9f4] ss:$8 sps:$4 sm:$0xff]  }
 0x14d   :  { %4315 = vmatpush2.bf16.msra.mxu0 %v8644_v8  ;;  %v8720_v8 = vld [vmem:[#allocation6 + $0x8f0] ss:$8 sps:$4 sm:$0xff]  }
 0x14e   :  { %4356 = vmatpush2.bf16.msra.mxu1 %v8647_v9  ;;  %4316 = vmatprep.subr.bf16.mxu0 %v8652_v10  ;;  %v8723_v9 = vld [vmem:[#allocation6 + $0x9f0] ss:$8 sps:$4 sm:$0xff]   ;;  %v8728_v10 = vld [vmem:[#allocation6 + $0x8e4] ss:$8 sps:$4 sm:$0xff]  }
 0x14f   :  { %4357 = vmatprep.subr.bf16.mxu1 %v8655_v11  ;;  %v8731_v11 = vld [vmem:[#allocation6 + $0x9e4] ss:$8 sps:$4 sm:$0xff]  }
 0x151   :  { %4317 = vmatpush2.bf16.msra.mxu0 %v8650_v12  ;;  %v8726_v12 = vld [vmem:[#allocation6 + $0x8e0] ss:$8 sps:$4 sm:$0xff]  }
 0x152   :  { %4358 = vmatpush2.bf16.msra.mxu1 %v8653_v13  ;;  %4318 = vmatprep.subr.bf16.mxu0 %v8658_v14  ;;  %v8729_v13 = vld [vmem:[#allocation6 + $0x9e0] ss:$8 sps:$4 sm:$0xff]   ;;  %v8734_v14 = vld [vmem:[#allocation6 + $0x8d4] ss:$8 sps:$4 sm:$0xff]  }
 0x153   :  { %4359 = vmatprep.subr.bf16.mxu1 %v8661_v15  ;;  %v8737_v15 = vld [vmem:[#allocation6 + $0x9d4] ss:$8 sps:$4 sm:$0xff]  }
 0x155   :  { %4319 = vmatpush2.bf16.msra.mxu0 %v8656_v16  ;;  %v8732_v16 = vld [vmem:[#allocation6 + $0x8d0] ss:$8 sps:$4 sm:$0xff]  }
 0x156   :  { %4360 = vmatpush2.bf16.msra.mxu1 %v8659_v17  ;;  %4320 = vmatprep.subr.bf16.mxu0 %v8664_v19  ;;  %v8735_v17 = vld [vmem:[#allocation6 + $0x9d0] ss:$8 sps:$4 sm:$0xff]   ;;  %v8740_v19 = vld [vmem:[#allocation6 + $0x8c4] ss:$8 sps:$4 sm:$0xff]  }
 0x157   :  { %4361 = vmatprep.subr.bf16.mxu1 %v8667_v21  ;;  %v8743_v21 = vld [vmem:[#allocation6 + $0x9c4] ss:$8 sps:$4 sm:$0xff]  }
 0x159   :  { %4321 = vmatpush2.bf16.msra.mxu0 %v8662_v22  ;;  %v8738_v22 = vld [vmem:[#allocation6 + $0x8c0] ss:$8 sps:$4 sm:$0xff]  }
 0x15a   :  { %4362 = vmatpush2.bf16.msra.mxu1 %v8665_v23  ;;  %4372 = vmatprep.subr.bf16.mxu0 %v8672_v26  ;;  %v8741_v23 = vld [vmem:[#allocation6 + $0x9c0] ss:$8 sps:$4 sm:$0xff]   ;;  %v8746_v26 = vld [vmem:[#allocation6 + $0x8b4] ss:$8 sps:$4 sm:$0xff]  }
 0x15b   :  { %4413 = vmatprep.subr.bf16.mxu1 %v8677_v27  ;;  %v8749_v27 = vld [vmem:[#allocation6 + $0x9b4] ss:$8 sps:$4 sm:$0xff]  }
 0x15c   :  { %v4078_v25 = vpop.f32.mrf.mxu0  ;;  %4323 = vmatmul.mubr.bf16.vlgmr.msra.gmra.mxu0 %v7259_v20  ;;  %v8744_v20 = vld [vmem:[#allocation6 + $0x8b0] ss:$8 sps:$4 sm:$0xff]  }
 0x15d   :  { %v4119_v35 = vpop.f32.mrf.mxu1  ;;  %4364 = vmatmul.mubr.bf16.vlgmr.msra.gmra.mxu1 %v7261_v28  ;;  %4373 = vmatpush1.bf16.msra.mxu0 %v8670_v30  ;;  %v8747_v28 = vld [vmem:[#allocation6 + $0x9b0] ss:$8 sps:$4 sm:$0xff]   ;;  %v8752_v30 = vld [vmem:[#allocation6 + $0x8a4] ss:$8 sps:$4 sm:$0xff]  }
 0x15e   :  { %v9960_v37 = vadd.f32 %v4119_v35, %v4078_v25  ;;  %4414 = vmatpush1.bf16.msra.mxu1 %v8675_v31  ;;  %v4080_v40 = vpop.f32.mrf.mxu0  ;;  %4374 = vmatprep.subr.bf16.mxu0 %v8680_v32  ;;  %v8755_v31 = vld [vmem:[#allocation6 + $0x9a4] ss:$8 sps:$4 sm:$0xff]   ;;  %v8750_v32 = vld [vmem:[#allocation6 + $0x8a0] ss:$8 sps:$4 sm:$0xff]   ;;  %v8756_v25 = vld [vmem:[#allocation6 + $0x890] ss:$8 sps:$4 sm:$0xff]  }
 0x15f   :  { %v4121_v41 = vpop.f32.mrf.mxu1  ;;  %4415 = vmatprep.subr.bf16.mxu1 %v8683_v33  ;;  %4404 = vmatprep.mubr.bf16.mxu0 %v7264_v34  ;;  %v8753_v33 = vld [vmem:[#allocation6 + $0x9a0] ss:$8 sps:$4 sm:$0xff]   ;;  %v8758_v34 = vld [vmem:[#allocation6 + $0x894] ss:$8 sps:$4 sm:$0xff]   ;;  %v8759_v35 = vld [vmem:[#allocation6 + $0x990] ss:$8 sps:$4 sm:$0xff]  }
 0x160   :  { %v9962_v43 = vadd.f32 %v4121_v41, %v4080_v40  ;;  %4445 = vmatprep.mubr.bf16.mxu1 %v7266_v24  ;;  %v4082_v44 = vpop.f32.mrf.mxu0  ;;  %v8761_v24 = vld [vmem:[#allocation6 + $0x994] ss:$8 sps:$4 sm:$0xff]   ;;  %v8765_v40 = vld [vmem:[#allocation6 + $0x980] ss:$8 sps:$4 sm:$0xff]  }
 0x161   :  { %v4123_v47 = vpop.f32.mrf.mxu1  ;;  %4375 = vmatpush1.bf16.msra.mxu0 %v8678_v36  ;;  %v8764_v36 = vld [vmem:[#allocation6 + $0x884] ss:$8 sps:$4 sm:$0xff]   ;;  %v8772_v41 = vld [vmem:[#allocation6 + $0xa74] ss:$8 sps:$4 sm:$0xff]   ;;  %v8770_v44 = vld [vmem:[#allocation6 + $0xa70] ss:$8 sps:$4 sm:$0xff]  }
 0x162   :  { %4416 = vmatpush1.bf16.msra.mxu1 %v8681_v38  ;;  %v4083_v49 = vpop.f32.mrf.mxu0  ;;  %4376 = vmatprep.subr.bf16.mxu0 %v8686_v39  ;;  %v8767_v38 = vld [vmem:[#allocation6 + $0x984] ss:$8 sps:$4 sm:$0xff]   ;;  %v8762_v39 = vld [vmem:[#allocation6 + $0x880] ss:$8 sps:$4 sm:$0xff]   ;;  %v9971_v47 = vld [vmem:[%s10429_s1 + $0x50] sm:$0x77] }
 0x163   :  { %4417 = vmatprep.subr.bf16.mxu1 %v8689_v42  ;;  %v4124_v51 = vpop.f32.mrf.mxu1  ;;  %v8777_v42 = vld [vmem:[#allocation6 + $0xb74] ss:$8 sps:$4 sm:$0xff]   ;;  %v8775_v49 = vld [vmem:[#allocation6 + $0xb70] ss:$8 sps:$4 sm:$0xff]  }
 0x164   :  { %v8778_v51 = vld [vmem:[#allocation6 + $0xa60] ss:$8 sps:$4 sm:$0xff]  }
 0x165   :  { %4377 = vmatpush1.bf16.msra.mxu0 %v8684_v45  ;;  %v7263_v45 = vcombine.low %v9945_v18, %v9945_v18  ;;  %v8783_v18 = vld [vmem:[#allocation6 + $0xb64] ss:$8 sps:$4 sm:$0xff]  }
 0x166   :  { %4418 = vmatpush1.bf16.msra.mxu1 %v8687_v46  ;;  %4378 = vmatprep.subr.bf16.mxu0 %v8692_v48  ;;  %v7265_v46 = vcombine.low %v9954_v29, %v9954_v29  ;;  %v9976_v48 = vld [vmem:[%s10429_s1 + $0x58] sm:$0x77]  ;;  %v7268_v29 = vcombine.high %v9971_v47, %v9971_v47 }
 0x167   :  { %4419 = vmatprep.subr.bf16.mxu1 %v8695_v50  ;;  %v8780_v50 = vld [vmem:[#allocation6 + $0xa64] ss:$8 sps:$4 sm:$0xff]  }
 0x169   :  { %4379 = vmatpush1.bf16.msra.mxu0 %v8690_v52  ;;  %v7270_v52 = vcombine.high %v9976_v48, %v9976_v48 }
 0x16a   :  { %4420 = vmatpush1.bf16.msra.mxu1 %v8693_v53  ;;  %4380 = vmatprep.subr.bf16.mxu0 %v8698_v54 }
 0x16b   :  { %4421 = vmatprep.subr.bf16.mxu1 %v8701_v55  ;;  %v8781_v55 = vld [vmem:[#allocation6 + $0xb60] ss:$8 sps:$4 sm:$0xff]  }
 0x16d   :  { %4381 = vmatpush1.bf16.msra.mxu0 %v8696_v56 }
 0x16e   :  { %4422 = vmatpush1.bf16.msra.mxu1 %v8699_v57  ;;  %4382 = vmatprep.subr.bf16.mxu0 %v8704_v58  ;;  %v8786_v57 = vld [vmem:[#allocation6 + $0xa54] ss:$8 sps:$4 sm:$0xff]  }
 0x16f   :  { %4423 = vmatprep.subr.bf16.mxu1 %v8707_v59 }
 0x171   :  { %4383 = vmatpush1.bf16.msra.mxu0 %v8702_v60  ;;  %v8789_v60 = vld [vmem:[#allocation6 + $0xb54] ss:$8 sps:$4 sm:$0xff]  }
 0x172   :  { %4424 = vmatpush1.bf16.msra.mxu1 %v8705_v61  ;;  %4384 = vmatprep.subr.bf16.mxu0 %v8710_v62 }
 0x173   :  { %4425 = vmatprep.subr.bf16.mxu1 %v8713_v63 }
 0x175   :  { %4385 = vmatpush1.bf16.msra.mxu0 %v8708_v0  ;;  %v8784_v0 = vld [vmem:[#allocation6 + $0xa50] ss:$8 sps:$4 sm:$0xff]  }
 0x176   :  { %4426 = vmatpush1.bf16.msra.mxu1 %v8711_v1  ;;  %4386 = vmatprep.subr.bf16.mxu0 %v8716_v2 }
 0x177   :  { %4427 = vmatprep.subr.bf16.mxu1 %v8719_v3 }
 0x179   :  { %4387 = vmatpush1.bf16.msra.mxu0 %v8714_v4  ;;  %v8792_v4 = vld [vmem:[#allocation6 + $0xa44] ss:$8 sps:$4 sm:$0xff]  }
 0x17a   :  { %4428 = vmatpush1.bf16.msra.mxu1 %v8717_v5  ;;  %4388 = vmatprep.subr.bf16.mxu0 %v8722_v6  ;;  %v8795_v5 = vld [vmem:[#allocation6 + $0xb44] ss:$8 sps:$4 sm:$0xff]  }
 0x17b   :  { %4429 = vmatprep.subr.bf16.mxu1 %v8725_v7  ;;  %v8790_v7 = vld [vmem:[#allocation6 + $0xa40] ss:$8 sps:$4 sm:$0xff]  }
 0x17d   :  { %4389 = vmatpush2.bf16.msra.mxu0 %v8720_v8  ;;  %v8798_v8 = vld [vmem:[#allocation6 + $0xa34] ss:$8 sps:$4 sm:$0xff]  }
 0x17e   :  { %4430 = vmatpush2.bf16.msra.mxu1 %v8723_v9  ;;  %4390 = vmatprep.subr.bf16.mxu0 %v8728_v10  ;;  %v8801_v9 = vld [vmem:[#allocation6 + $0xb34] ss:$8 sps:$4 sm:$0xff]   ;;  %v8796_v10 = vld [vmem:[#allocation6 + $0xa30] ss:$8 sps:$4 sm:$0xff]  }
 0x17f   :  { %4431 = vmatprep.subr.bf16.mxu1 %v8731_v11  ;;  %v8799_v11 = vld [vmem:[#allocation6 + $0xb30] ss:$8 sps:$4 sm:$0xff]  }
 0x181   :  { %4391 = vmatpush2.bf16.msra.mxu0 %v8726_v12  ;;  %v8804_v12 = vld [vmem:[#allocation6 + $0xa24] ss:$8 sps:$4 sm:$0xff]  }
 0x182   :  { %4432 = vmatpush2.bf16.msra.mxu1 %v8729_v13  ;;  %4392 = vmatprep.subr.bf16.mxu0 %v8734_v14  ;;  %v8807_v13 = vld [vmem:[#allocation6 + $0xb24] ss:$8 sps:$4 sm:$0xff]   ;;  %v8802_v14 = vld [vmem:[#allocation6 + $0xa20] ss:$8 sps:$4 sm:$0xff]  }
 0x183   :  { %4433 = vmatprep.subr.bf16.mxu1 %v8737_v15  ;;  %v8805_v15 = vld [vmem:[#allocation6 + $0xb20] ss:$8 sps:$4 sm:$0xff]  }
 0x185   :  { %4393 = vmatpush2.bf16.msra.mxu0 %v8732_v16  ;;  %v8810_v16 = vld [vmem:[#allocation6 + $0xa14] ss:$8 sps:$4 sm:$0xff]  }
 0x186   :  { %4434 = vmatpush2.bf16.msra.mxu1 %v8735_v17  ;;  %4394 = vmatprep.subr.bf16.mxu0 %v8740_v19  ;;  %v8813_v17 = vld [vmem:[#allocation6 + $0xb14] ss:$8 sps:$4 sm:$0xff]   ;;  %v8808_v19 = vld [vmem:[#allocation6 + $0xa10] ss:$8 sps:$4 sm:$0xff]  }
 0x187   :  { %4435 = vmatprep.subr.bf16.mxu1 %v8743_v21  ;;  %v8811_v21 = vld [vmem:[#allocation6 + $0xb10] ss:$8 sps:$4 sm:$0xff]  }
 0x189   :  { %4395 = vmatpush2.bf16.msra.mxu0 %v8738_v22  ;;  %v8816_v22 = vld [vmem:[#allocation6 + $0xa04] ss:$8 sps:$4 sm:$0xff]  }
 0x18a   :  { %4436 = vmatpush2.bf16.msra.mxu1 %v8741_v23  ;;  %4396 = vmatprep.subr.bf16.mxu0 %v8746_v26  ;;  %v8819_v23 = vld [vmem:[#allocation6 + $0xb04] ss:$8 sps:$4 sm:$0xff]   ;;  %v8814_v26 = vld [vmem:[#allocation6 + $0xa00] ss:$8 sps:$4 sm:$0xff]  }
 0x18b   :  { %4437 = vmatprep.subr.bf16.mxu1 %v8749_v27  ;;  %v8817_v27 = vld [vmem:[#allocation6 + $0xb00] ss:$8 sps:$4 sm:$0xff]  }
 0x18d   :  { %4397 = vmatpush2.bf16.msra.mxu0 %v8744_v20  ;;  %v8822_v20 = vld [vmem:[#allocation6 + $0xaf4] ss:$8 sps:$4 sm:$0xff]  }
 0x18e   :  { %4438 = vmatpush2.bf16.msra.mxu1 %v8747_v28  ;;  %4398 = vmatprep.subr.bf16.mxu0 %v8752_v30  ;;  %v8825_v28 = vld [vmem:[#allocation6 + $0xbf4] ss:$8 sps:$4 sm:$0xff]   ;;  %v8820_v30 = vld [vmem:[#allocation6 + $0xaf0] ss:$8 sps:$4 sm:$0xff]  }
 0x18f   :  { %4439 = vmatprep.subr.bf16.mxu1 %v8755_v31  ;;  %v8823_v31 = vld [vmem:[#allocation6 + $0xbf0] ss:$8 sps:$4 sm:$0xff]  }
 0x191   :  { %4399 = vmatpush2.bf16.msra.mxu0 %v8750_v32  ;;  %v8828_v32 = vld [vmem:[#allocation6 + $0xae4] ss:$8 sps:$4 sm:$0xff]  }
 0x192   :  { %4440 = vmatpush2.bf16.msra.mxu1 %v8753_v33  ;;  %4400 = vmatprep.subr.bf16.mxu0 %v8758_v34  ;;  %v8831_v33 = vld [vmem:[#allocation6 + $0xbe4] ss:$8 sps:$4 sm:$0xff]   ;;  %v8826_v34 = vld [vmem:[#allocation6 + $0xae0] ss:$8 sps:$4 sm:$0xff]  }
 0x193   :  { %4441 = vmatprep.subr.bf16.mxu1 %v8761_v24  ;;  %v8829_v24 = vld [vmem:[#allocation6 + $0xbe0] ss:$8 sps:$4 sm:$0xff]  }
 0x195   :  { %4401 = vmatpush2.bf16.msra.mxu0 %v8756_v25  ;;  %v8834_v25 = vld [vmem:[#allocation6 + $0xad4] ss:$8 sps:$4 sm:$0xff]  }
 0x196   :  { %4442 = vmatpush2.bf16.msra.mxu1 %v8759_v35  ;;  %4402 = vmatprep.subr.bf16.mxu0 %v8764_v36  ;;  %v8837_v35 = vld [vmem:[#allocation6 + $0xbd4] ss:$8 sps:$4 sm:$0xff]   ;;  %v8832_v36 = vld [vmem:[#allocation6 + $0xad0] ss:$8 sps:$4 sm:$0xff]  }
 0x197   :  { %4443 = vmatprep.subr.bf16.mxu1 %v8767_v38  ;;  %v8835_v38 = vld [vmem:[#allocation6 + $0xbd0] ss:$8 sps:$4 sm:$0xff]  }
 0x199   :  { %4403 = vmatpush2.bf16.msra.mxu0 %v8762_v39  ;;  %v8840_v39 = vld [vmem:[#allocation6 + $0xac4] ss:$8 sps:$4 sm:$0xff]  }
 0x19a   :  { %4444 = vmatpush2.bf16.msra.mxu1 %v8765_v40  ;;  %4454 = vmatprep.subr.bf16.mxu0 %v8772_v41  ;;  %v8843_v40 = vld [vmem:[#allocation6 + $0xbc4] ss:$8 sps:$4 sm:$0xff]   ;;  %v8838_v41 = vld [vmem:[#allocation6 + $0xac0] ss:$8 sps:$4 sm:$0xff]  }
 0x19b   :  { %4495 = vmatprep.subr.bf16.mxu1 %v8777_v42  ;;  %v8841_v42 = vld [vmem:[#allocation6 + $0xbc0] ss:$8 sps:$4 sm:$0xff]  }
 0x19c   :  { %v4160_v53 = vpop.f32.mrf.mxu0  ;;  %4405 = vmatmul.mubr.bf16.vlgmr.msra.gmra.mxu0 %v7263_v45  ;;  %v8849_v45 = vld [vmem:[#allocation6 + $0xbb4] ss:$8 sps:$4 sm:$0xff]  }
 0x19d   :  { %v4201_v54 = vpop.f32.mrf.mxu1  ;;  %4446 = vmatmul.mubr.bf16.vlgmr.msra.gmra.mxu1 %v7265_v46  ;;  %v4161_v56 = vadd.f32 %v4160_v53, %v9960_v37  ;;  %4455 = vmatpush1.bf16.msra.mxu0 %v8770_v44  ;;  %v8787_v37 = vld [vmem:[#allocation6 + $0xb50] ss:$8 sps:$4 sm:$0xff]   ;;  %v8846_v44 = vld [vmem:[#allocation6 + $0xab4] ss:$8 sps:$4 sm:$0xff]  }
 0x19e   :  { %4496 = vmatpush1.bf16.msra.mxu1 %v8775_v49  ;;  %v4162_v58 = vpop.f32.mrf.mxu0  ;;  %4456 = vmatprep.subr.bf16.mxu0 %v8780_v50  ;;  %v8844_v46 = vld [vmem:[#allocation6 + $0xab0] ss:$8 sps:$4 sm:$0xff]   ;;  %v8852_v50 = vld [vmem:[#allocation6 + $0xaa4] ss:$8 sps:$4 sm:$0xff]   ;;  %v8861_v53 = vld [vmem:[#allocation6 + $0xb94] ss:$8 sps:$4 sm:$0xff]  }
 0x19f   :  { %v4203_v59 = vpop.f32.mrf.mxu1  ;;  %4497 = vmatprep.subr.bf16.mxu1 %v8783_v18  ;;  %v4163_v61 = vadd.f32 %v4162_v58, %v9962_v43  ;;  %v9984_v62 = vadd.f32 %v4201_v54, %v4161_v56  ;;  %4486 = vmatprep.mubr.bf16.mxu0 %v7268_v29  ;;  %v8793_v43 = vld [vmem:[#allocation6 + $0xb40] ss:$8 sps:$4 sm:$0xff]   ;;  %v8847_v49 = vld [vmem:[#allocation6 + $0xbb0] ss:$8 sps:$4 sm:$0xff]   ;;  %v8855_v18 = vld [vmem:[#allocation6 + $0xba4] ss:$8 sps:$4 sm:$0xff]  }
 0x1a0   :  { %4527 = vmatprep.mubr.bf16.mxu1 %v7270_v52  ;;  %v4164_v63 = vpop.f32.mrf.mxu0  ;;  %v8853_v29 = vld [vmem:[#allocation6 + $0xba0] ss:$8 sps:$4 sm:$0xff]   ;;  %v8858_v52 = vld [vmem:[#allocation6 + $0xa94] ss:$8 sps:$4 sm:$0xff]   ;;  %v8856_v54 = vld [vmem:[#allocation6 + $0xa90] ss:$8 sps:$4 sm:$0xff]  }
 0x1a1   :  { %v4205_v1 = vpop.f32.mrf.mxu1  ;;  %v9986_v2 = vadd.f32 %v4203_v59, %v4163_v61  ;;  %4457 = vmatpush1.bf16.msra.mxu0 %v8778_v51  ;;  %v8850_v51 = vld [vmem:[#allocation6 + $0xaa0] ss:$8 sps:$4 sm:$0xff]   ;;  %v8864_v56 = vld [vmem:[#allocation6 + $0xa84] ss:$8 sps:$4 sm:$0xff]   ;;  %v8877_v61 = vld [vmem:[#allocation6 + $0xd74] ss:$8 sps:$4 sm:$0xff]  }
 0x1a2   :  { %4498 = vmatpush1.bf16.msra.mxu1 %v8781_v55  ;;  %v4165_v3 = vpop.f32.mrf.mxu0  ;;  %4458 = vmatprep.subr.bf16.mxu0 %v8786_v57  ;;  %v8859_v55 = vld [vmem:[#allocation6 + $0xb90] ss:$8 sps:$4 sm:$0xff]   ;;  %v8867_v57 = vld [vmem:[#allocation6 + $0xb84] ss:$8 sps:$4 sm:$0xff]   ;;  %v8862_v58 = vld [vmem:[#allocation6 + $0xa80] ss:$8 sps:$4 sm:$0xff]   ;;  %v7269_v1 = vcombine.low %v9976_v48, %v9976_v48 }
 0x1a3   :  { %4499 = vmatprep.subr.bf16.mxu1 %v8789_v60  ;;  %v4206_v6 = vpop.f32.mrf.mxu1  ;;  %v8865_v59 = vld [vmem:[#allocation6 + $0xb80] ss:$8 sps:$4 sm:$0xff]   ;;  %v8872_v60 = vld [vmem:[#allocation6 + $0xc74] ss:$8 sps:$4 sm:$0xff]   ;;  %v8870_v63 = vld [vmem:[#allocation6 + $0xc70] ss:$8 sps:$4 sm:$0xff]  }
 0x1a4   :  { %v10000_v3 = vld [vmem:[%s10429_s1 + $0x68] sm:$0x77] }
 0x1a5   :  { %4459 = vmatpush1.bf16.msra.mxu0 %v8784_v0  ;;  %v7267_v0 = vcombine.low %v9971_v47, %v9971_v47  ;;  %v8883_v47 = vld [vmem:[#allocation6 + $0xd64] ss:$8 sps:$4 sm:$0xff]   ;;  %v8878_v6 = vld [vmem:[#allocation6 + $0xc60] ss:$8 sps:$4 sm:$0xff]  }
 0x1a6   :  { %4500 = vmatpush1.bf16.msra.mxu1 %v8787_v37  ;;  %4460 = vmatprep.subr.bf16.mxu0 %v8792_v4  ;;  %v9995_v37 = vld [vmem:[%s10429_s1 + $0x60] sm:$0x77]  ;;  %v8875_v4 = vld [vmem:[#allocation6 + $0xd70] ss:$8 sps:$4 sm:$0xff]  }
 0x1a7   :  { %4501 = vmatprep.subr.bf16.mxu1 %v8795_v5  ;;  %v8880_v5 = vld [vmem:[#allocation6 + $0xc64] ss:$8 sps:$4 sm:$0xff]   ;;  %v7272_v48 = vcombine.high %v9995_v37, %v9995_v37 }
 0x1a9   :  { %4461 = vmatpush1.bf16.msra.mxu0 %v8790_v7  ;;  %v7274_v7 = vcombine.high %v10000_v3, %v10000_v3 }
 0x1aa   :  { %4502 = vmatpush1.bf16.msra.mxu1 %v8793_v43  ;;  %4462 = vmatprep.subr.bf16.mxu0 %v8798_v8 }
 0x1ab   :  { %4503 = vmatprep.subr.bf16.mxu1 %v8801_v9  ;;  %v8881_v9 = vld [vmem:[#allocation6 + $0xd60] ss:$8 sps:$4 sm:$0xff]  }
 0x1ad   :  { %4463 = vmatpush1.bf16.msra.mxu0 %v8796_v10 }
 0x1ae   :  { %4504 = vmatpush1.bf16.msra.mxu1 %v8799_v11  ;;  %4464 = vmatprep.subr.bf16.mxu0 %v8804_v12  ;;  %v8886_v11 = vld [vmem:[#allocation6 + $0xc54] ss:$8 sps:$4 sm:$0xff]  }
 0x1af   :  { %4505 = vmatprep.subr.bf16.mxu1 %v8807_v13 }
 0x1b1   :  { %4465 = vmatpush1.bf16.msra.mxu0 %v8802_v14  ;;  %v8889_v14 = vld [vmem:[#allocation6 + $0xd54] ss:$8 sps:$4 sm:$0xff]  }
 0x1b2   :  { %4506 = vmatpush1.bf16.msra.mxu1 %v8805_v15  ;;  %4466 = vmatprep.subr.bf16.mxu0 %v8810_v16 }
 0x1b3   :  { %4507 = vmatprep.subr.bf16.mxu1 %v8813_v17 }
 0x1b5   :  { %4467 = vmatpush1.bf16.msra.mxu0 %v8808_v19  ;;  %v8884_v19 = vld [vmem:[#allocation6 + $0xc50] ss:$8 sps:$4 sm:$0xff]  }
 0x1b6   :  { %4508 = vmatpush1.bf16.msra.mxu1 %v8811_v21  ;;  %4468 = vmatprep.subr.bf16.mxu0 %v8816_v22 }
 0x1b7   :  { %4509 = vmatprep.subr.bf16.mxu1 %v8819_v23 }
 0x1b9   :  { %4469 = vmatpush1.bf16.msra.mxu0 %v8814_v26  ;;  %v8892_v26 = vld [vmem:[#allocation6 + $0xc44] ss:$8 sps:$4 sm:$0xff]  }
 0x1ba   :  { %4510 = vmatpush1.bf16.msra.mxu1 %v8817_v27  ;;  %4470 = vmatprep.subr.bf16.mxu0 %v8822_v20  ;;  %v8895_v27 = vld [vmem:[#allocation6 + $0xd44] ss:$8 sps:$4 sm:$0xff]  }
 0x1bb   :  { %4511 = vmatprep.subr.bf16.mxu1 %v8825_v28  ;;  %v8890_v28 = vld [vmem:[#allocation6 + $0xc40] ss:$8 sps:$4 sm:$0xff]  }
 0x1bd   :  { %4471 = vmatpush2.bf16.msra.mxu0 %v8820_v30  ;;  %v8898_v30 = vld [vmem:[#allocation6 + $0xc34] ss:$8 sps:$4 sm:$0xff]  }
 0x1be   :  { %4512 = vmatpush2.bf16.msra.mxu1 %v8823_v31  ;;  %4472 = vmatprep.subr.bf16.mxu0 %v8828_v32  ;;  %v8901_v31 = vld [vmem:[#allocation6 + $0xd34] ss:$8 sps:$4 sm:$0xff]   ;;  %v8896_v32 = vld [vmem:[#allocation6 + $0xc30] ss:$8 sps:$4 sm:$0xff]  }
 0x1bf   :  { %4513 = vmatprep.subr.bf16.mxu1 %v8831_v33  ;;  %v8899_v33 = vld [vmem:[#allocation6 + $0xd30] ss:$8 sps:$4 sm:$0xff]  }
 0x1c1   :  { %4473 = vmatpush2.bf16.msra.mxu0 %v8826_v34  ;;  %v8904_v34 = vld [vmem:[#allocation6 + $0xc24] ss:$8 sps:$4 sm:$0xff]  }
 0x1c2   :  { %4514 = vmatpush2.bf16.msra.mxu1 %v8829_v24  ;;  %4474 = vmatprep.subr.bf16.mxu0 %v8834_v25  ;;  %v8907_v24 = vld [vmem:[#allocation6 + $0xd24] ss:$8 sps:$4 sm:$0xff]   ;;  %v8902_v25 = vld [vmem:[#allocation6 + $0xc20] ss:$8 sps:$4 sm:$0xff]  }
 0x1c3   :  { %4515 = vmatprep.subr.bf16.mxu1 %v8837_v35  ;;  %v8905_v35 = vld [vmem:[#allocation6 + $0xd20] ss:$8 sps:$4 sm:$0xff]  }
 0x1c5   :  { %4475 = vmatpush2.bf16.msra.mxu0 %v8832_v36  ;;  %v8910_v36 = vld [vmem:[#allocation6 + $0xc14] ss:$8 sps:$4 sm:$0xff]  }
 0x1c6   :  { %4516 = vmatpush2.bf16.msra.mxu1 %v8835_v38  ;;  %4476 = vmatprep.subr.bf16.mxu0 %v8840_v39  ;;  %v8913_v38 = vld [vmem:[#allocation6 + $0xd14] ss:$8 sps:$4 sm:$0xff]   ;;  %v8908_v39 = vld [vmem:[#allocation6 + $0xc10] ss:$8 sps:$4 sm:$0xff]  }
 0x1c7   :  { %4517 = vmatprep.subr.bf16.mxu1 %v8843_v40  ;;  %v8911_v40 = vld [vmem:[#allocation6 + $0xd10] ss:$8 sps:$4 sm:$0xff]  }
 0x1c9   :  { %4477 = vmatpush2.bf16.msra.mxu0 %v8838_v41  ;;  %v8916_v41 = vld [vmem:[#allocation6 + $0xc04] ss:$8 sps:$4 sm:$0xff]  }
 0x1ca   :  { %4518 = vmatpush2.bf16.msra.mxu1 %v8841_v42  ;;  %4478 = vmatprep.subr.bf16.mxu0 %v8846_v44  ;;  %v8919_v42 = vld [vmem:[#allocation6 + $0xd04] ss:$8 sps:$4 sm:$0xff]   ;;  %v8914_v44 = vld [vmem:[#allocation6 + $0xc00] ss:$8 sps:$4 sm:$0xff]  }
 0x1cb   :  { %4519 = vmatprep.subr.bf16.mxu1 %v8849_v45  ;;  %v8917_v45 = vld [vmem:[#allocation6 + $0xd00] ss:$8 sps:$4 sm:$0xff]  }
 0x1cd   :  { %4479 = vmatpush2.bf16.msra.mxu0 %v8844_v46  ;;  %v8922_v46 = vld [vmem:[#allocation6 + $0xcf4] ss:$8 sps:$4 sm:$0xff]  }
 0x1ce   :  { %4520 = vmatpush2.bf16.msra.mxu1 %v8847_v49  ;;  %4480 = vmatprep.subr.bf16.mxu0 %v8852_v50  ;;  %v8925_v49 = vld [vmem:[#allocation6 + $0xdf4] ss:$8 sps:$4 sm:$0xff]   ;;  %v8920_v50 = vld [vmem:[#allocation6 + $0xcf0] ss:$8 sps:$4 sm:$0xff]  }
 0x1cf   :  { %4521 = vmatprep.subr.bf16.mxu1 %v8855_v18  ;;  %v8923_v18 = vld [vmem:[#allocation6 + $0xdf0] ss:$8 sps:$4 sm:$0xff]  }
 0x1d1   :  { %4481 = vmatpush2.bf16.msra.mxu0 %v8850_v51  ;;  %v8928_v51 = vld [vmem:[#allocation6 + $0xce4] ss:$8 sps:$4 sm:$0xff]  }
 0x1d2   :  { %4522 = vmatpush2.bf16.msra.mxu1 %v8853_v29  ;;  %4482 = vmatprep.subr.bf16.mxu0 %v8858_v52  ;;  %v8931_v29 = vld [vmem:[#allocation6 + $0xde4] ss:$8 sps:$4 sm:$0xff]   ;;  %v8926_v52 = vld [vmem:[#allocation6 + $0xce0] ss:$8 sps:$4 sm:$0xff]  }
 0x1d3   :  { %4523 = vmatprep.subr.bf16.mxu1 %v8861_v53  ;;  %v8929_v53 = vld [vmem:[#allocation6 + $0xde0] ss:$8 sps:$4 sm:$0xff]  }
 0x1d5   :  { %4483 = vmatpush2.bf16.msra.mxu0 %v8856_v54  ;;  %v8934_v54 = vld [vmem:[#allocation6 + $0xcd4] ss:$8 sps:$4 sm:$0xff]  }
 0x1d6   :  { %4524 = vmatpush2.bf16.msra.mxu1 %v8859_v55  ;;  %4484 = vmatprep.subr.bf16.mxu0 %v8864_v56  ;;  %v8937_v55 = vld [vmem:[#allocation6 + $0xdd4] ss:$8 sps:$4 sm:$0xff]   ;;  %v8932_v56 = vld [vmem:[#allocation6 + $0xcd0] ss:$8 sps:$4 sm:$0xff]  }
 0x1d7   :  { %4525 = vmatprep.subr.bf16.mxu1 %v8867_v57  ;;  %v8935_v57 = vld [vmem:[#allocation6 + $0xdd0] ss:$8 sps:$4 sm:$0xff]  }
 0x1d9   :  { %4485 = vmatpush2.bf16.msra.mxu0 %v8862_v58  ;;  %v8940_v58 = vld [vmem:[#allocation6 + $0xcc4] ss:$8 sps:$4 sm:$0xff]  }
 0x1da   :  { %4526 = vmatpush2.bf16.msra.mxu1 %v8865_v59  ;;  %4536 = vmatprep.subr.bf16.mxu0 %v8872_v60  ;;  %v8943_v59 = vld [vmem:[#allocation6 + $0xdc4] ss:$8 sps:$4 sm:$0xff]   ;;  %v8938_v60 = vld [vmem:[#allocation6 + $0xcc0] ss:$8 sps:$4 sm:$0xff]  }
 0x1db   :  { %4577 = vmatprep.subr.bf16.mxu1 %v8877_v61  ;;  %v8941_v61 = vld [vmem:[#allocation6 + $0xdc0] ss:$8 sps:$4 sm:$0xff]  }
 0x1dc   :  { %v4242_v43 = vpop.f32.mrf.mxu0  ;;  %4487 = vmatmul.mubr.bf16.vlgmr.msra.gmra.mxu0 %v7267_v0  ;;  %v8949_v0 = vld [vmem:[#allocation6 + $0xdb4] ss:$8 sps:$4 sm:$0xff]  }
 0x1dd   :  { %v4283_v8 = vpop.f32.mrf.mxu1  ;;  %4528 = vmatmul.mubr.bf16.vlgmr.msra.gmra.mxu1 %v7269_v1  ;;  %v4243_v10 = vadd.f32 %v4242_v43, %v9984_v62  ;;  %4537 = vmatpush1.bf16.msra.mxu0 %v8870_v63  ;;  %v8887_v62 = vld [vmem:[#allocation6 + $0xd50] ss:$8 sps:$4 sm:$0xff]   ;;  %v8946_v63 = vld [vmem:[#allocation6 + $0xcb4] ss:$8 sps:$4 sm:$0xff]  }
 0x1de   :  { %4578 = vmatpush1.bf16.msra.mxu1 %v8875_v4  ;;  %v4244_v12 = vpop.f32.mrf.mxu0  ;;  %4538 = vmatprep.subr.bf16.mxu0 %v8880_v5  ;;  %v8944_v1 = vld [vmem:[#allocation6 + $0xcb0] ss:$8 sps:$4 sm:$0xff]   ;;  %v8952_v5 = vld [vmem:[#allocation6 + $0xca4] ss:$8 sps:$4 sm:$0xff]   ;;  %v8961_v43 = vld [vmem:[#allocation6 + $0xd94] ss:$8 sps:$4 sm:$0xff]  }
 0x1df   :  { %v4285_v13 = vpop.f32.mrf.mxu1  ;;  %4579 = vmatprep.subr.bf16.mxu1 %v8883_v47  ;;  %v4245_v15 = vadd.f32 %v4244_v12, %v9986_v2  ;;  %v10008_v16 = vadd.f32 %v4283_v8, %v4243_v10  ;;  %4568 = vmatprep.mubr.bf16.mxu0 %v7272_v48  ;;  %v8893_v2 = vld [vmem:[#allocation6 + $0xd40] ss:$8 sps:$4 sm:$0xff]   ;;  %v8947_v4 = vld [vmem:[#allocation6 + $0xdb0] ss:$8 sps:$4 sm:$0xff]   ;;  %v8955_v47 = vld [vmem:[#allocation6 + $0xda4] ss:$8 sps:$4 sm:$0xff]  }
 0x1e0   :  { %4609 = vmatprep.mubr.bf16.mxu1 %v7274_v7  ;;  %v4246_v17 = vpop.f32.mrf.mxu0  ;;  %v8953_v48 = vld [vmem:[#allocation6 + $0xda0] ss:$8 sps:$4 sm:$0xff]   ;;  %v8958_v7 = vld [vmem:[#allocation6 + $0xc94] ss:$8 sps:$4 sm:$0xff]   ;;  %v8956_v8 = vld [vmem:[#allocation6 + $0xc90] ss:$8 sps:$4 sm:$0xff]  }
 0x1e1   :  { %v4287_v21 = vpop.f32.mrf.mxu1  ;;  %v10010_v22 = vadd.f32 %v4285_v13, %v4245_v15  ;;  %4539 = vmatpush1.bf16.msra.mxu0 %v8878_v6  ;;  %v8950_v6 = vld [vmem:[#allocation6 + $0xca0] ss:$8 sps:$4 sm:$0xff]   ;;  %v8964_v10 = vld [vmem:[#allocation6 + $0xc84] ss:$8 sps:$4 sm:$0xff]   ;;  %v8977_v15 = vld [vmem:[#allocation6 + $0xf74] ss:$8 sps:$4 sm:$0xff]  }
 0x1e2   :  { %4580 = vmatpush1.bf16.msra.mxu1 %v8881_v9  ;;  %v4247_v23 = vpop.f32.mrf.mxu0  ;;  %4540 = vmatprep.subr.bf16.mxu0 %v8886_v11  ;;  %v8959_v9 = vld [vmem:[#allocation6 + $0xd90] ss:$8 sps:$4 sm:$0xff]   ;;  %v8967_v11 = vld [vmem:[#allocation6 + $0xd84] ss:$8 sps:$4 sm:$0xff]   ;;  %v8962_v12 = vld [vmem:[#allocation6 + $0xc80] ss:$8 sps:$4 sm:$0xff]   ;;  %v7273_v21 = vcombine.low %v10000_v3, %v10000_v3 }
 0x1e3   :  { %4581 = vmatprep.subr.bf16.mxu1 %v8889_v14  ;;  %v4288_v20 = vpop.f32.mrf.mxu1  ;;  %v8965_v13 = vld [vmem:[#allocation6 + $0xd80] ss:$8 sps:$4 sm:$0xff]   ;;  %v8972_v14 = vld [vmem:[#allocation6 + $0xe74] ss:$8 sps:$4 sm:$0xff]   ;;  %v8970_v17 = vld [vmem:[#allocation6 + $0xe70] ss:$8 sps:$4 sm:$0xff]  }
 0x1e4   :  { %v10024_v23 = vld [vmem:[%s10429_s1 + $0x78] sm:$0x77]  ;;  %v8978_v20 = vld [vmem:[#allocation6 + $0xe60] ss:$8 sps:$4 sm:$0xff]  }
 0x1e5   :  { %4541 = vmatpush1.bf16.msra.mxu0 %v8884_v19  ;;  %v7271_v19 = vcombine.low %v9995_v37, %v9995_v37  ;;  %v8983_v37 = vld [vmem:[#allocation6 + $0xf64] ss:$8 sps:$4 sm:$0xff]  }
 0x1e6   :  { %4582 = vmatpush1.bf16.msra.mxu1 %v8887_v62  ;;  %4542 = vmatprep.subr.bf16.mxu0 %v8892_v26  ;;  %v10019_v62 = vld [vmem:[%s10429_s1 + $0x70] sm:$0x77] }
 0x1e7   :  { %4583 = vmatprep.subr.bf16.mxu1 %v8895_v27  ;;  %v8975_v26 = vld [vmem:[#allocation6 + $0xf70] ss:$8 sps:$4 sm:$0xff]   ;;  %v8980_v27 = vld [vmem:[#allocation6 + $0xe64] ss:$8 sps:$4 sm:$0xff]   ;;  %v7276_v3 = vcombine.high %v10019_v62, %v10019_v62 }
 0x1e9   :  { %4543 = vmatpush1.bf16.msra.mxu0 %v8890_v28  ;;  %v8981_v28 = vld [vmem:[#allocation6 + $0xf60] ss:$8 sps:$4 sm:$0xff]  }
 0x1ea   :  { %4584 = vmatpush1.bf16.msra.mxu1 %v8893_v2  ;;  %4544 = vmatprep.subr.bf16.mxu0 %v8898_v30  ;;  %v7278_v2 = vcombine.high %v10024_v23, %v10024_v23 }
 0x1eb   :  { %4585 = vmatprep.subr.bf16.mxu1 %v8901_v31 }
 0x1ed   :  { %4545 = vmatpush1.bf16.msra.mxu0 %v8896_v32  ;;  %v8986_v32 = vld [vmem:[#allocation6 + $0xe54] ss:$8 sps:$4 sm:$0xff]  }
 0x1ee   :  { %4586 = vmatpush1.bf16.msra.mxu1 %v8899_v33  ;;  %4546 = vmatprep.subr.bf16.mxu0 %v8904_v34 }
 0x1ef   :  { %4587 = vmatprep.subr.bf16.mxu1 %v8907_v24 }
 0x1f1   :  { %4547 = vmatpush1.bf16.msra.mxu0 %v8902_v25  ;;  %v8989_v25 = vld [vmem:[#allocation6 + $0xf54] ss:$8 sps:$4 sm:$0xff]  }
 0x1f2   :  { %4588 = vmatpush1.bf16.msra.mxu1 %v8905_v35  ;;  %4548 = vmatprep.subr.bf16.mxu0 %v8910_v36 }
 0x1f3   :  { %4589 = vmatprep.subr.bf16.mxu1 %v8913_v38  ;;  %v8984_v38 = vld [vmem:[#allocation6 + $0xe50] ss:$8 sps:$4 sm:$0xff]  }
 0x1f5   :  { %4549 = vmatpush1.bf16.msra.mxu0 %v8908_v39  ;;  %v8987_v39 = vld [vmem:[#allocation6 + $0xf50] ss:$8 sps:$4 sm:$0xff]  }
 0x1f6   :  { %4590 = vmatpush1.bf16.msra.mxu1 %v8911_v40  ;;  %4550 = vmatprep.subr.bf16.mxu0 %v8916_v41 }
 0x1f7   :  { %4591 = vmatprep.subr.bf16.mxu1 %v8919_v42 }
 0x1f9   :  { %4551 = vmatpush1.bf16.msra.mxu0 %v8914_v44  ;;  %v8992_v44 = vld [vmem:[#allocation6 + $0xe44] ss:$8 sps:$4 sm:$0xff]  }
 0x1fa   :  { %4592 = vmatpush1.bf16.msra.mxu1 %v8917_v45  ;;  %4552 = vmatprep.subr.bf16.mxu0 %v8922_v46  ;;  %v8995_v45 = vld [vmem:[#allocation6 + $0xf44] ss:$8 sps:$4 sm:$0xff]  }
 0x1fb   :  { %4593 = vmatprep.subr.bf16.mxu1 %v8925_v49  ;;  %v8990_v49 = vld [vmem:[#allocation6 + $0xe40] ss:$8 sps:$4 sm:$0xff]  }
 0x1fd   :  { %4553 = vmatpush2.bf16.msra.mxu0 %v8920_v50  ;;  %v8998_v50 = vld [vmem:[#allocation6 + $0xe34] ss:$8 sps:$4 sm:$0xff]  }
 0x1fe   :  { %4594 = vmatpush2.bf16.msra.mxu1 %v8923_v18  ;;  %4554 = vmatprep.subr.bf16.mxu0 %v8928_v51  ;;  %v9001_v18 = vld [vmem:[#allocation6 + $0xf34] ss:$8 sps:$4 sm:$0xff]   ;;  %v8996_v51 = vld [vmem:[#allocation6 + $0xe30] ss:$8 sps:$4 sm:$0xff]  }
 0x1ff   :  { %4595 = vmatprep.subr.bf16.mxu1 %v8931_v29  ;;  %v8999_v29 = vld [vmem:[#allocation6 + $0xf30] ss:$8 sps:$4 sm:$0xff]  }
 0x201   :  { %4555 = vmatpush2.bf16.msra.mxu0 %v8926_v52  ;;  %v9004_v52 = vld [vmem:[#allocation6 + $0xe24] ss:$8 sps:$4 sm:$0xff]  }
 0x202   :  { %4596 = vmatpush2.bf16.msra.mxu1 %v8929_v53  ;;  %4556 = vmatprep.subr.bf16.mxu0 %v8934_v54  ;;  %v9007_v53 = vld [vmem:[#allocation6 + $0xf24] ss:$8 sps:$4 sm:$0xff]   ;;  %v9002_v54 = vld [vmem:[#allocation6 + $0xe20] ss:$8 sps:$4 sm:$0xff]  }
 0x203   :  { %4597 = vmatprep.subr.bf16.mxu1 %v8937_v55  ;;  %v9005_v55 = vld [vmem:[#allocation6 + $0xf20] ss:$8 sps:$4 sm:$0xff]  }
 0x205   :  { %4557 = vmatpush2.bf16.msra.mxu0 %v8932_v56  ;;  %v9010_v56 = vld [vmem:[#allocation6 + $0xe14] ss:$8 sps:$4 sm:$0xff]  }
 0x206   :  { %4598 = vmatpush2.bf16.msra.mxu1 %v8935_v57  ;;  %4558 = vmatprep.subr.bf16.mxu0 %v8940_v58  ;;  %v9013_v57 = vld [vmem:[#allocation6 + $0xf14] ss:$8 sps:$4 sm:$0xff]   ;;  %v9008_v58 = vld [vmem:[#allocation6 + $0xe10] ss:$8 sps:$4 sm:$0xff]  }
 0x207   :  { %4599 = vmatprep.subr.bf16.mxu1 %v8943_v59  ;;  %v9011_v59 = vld [vmem:[#allocation6 + $0xf10] ss:$8 sps:$4 sm:$0xff]  }
 0x209   :  { %4559 = vmatpush2.bf16.msra.mxu0 %v8938_v60  ;;  %v9016_v60 = vld [vmem:[#allocation6 + $0xe04] ss:$8 sps:$4 sm:$0xff]  }
 0x20a   :  { %4600 = vmatpush2.bf16.msra.mxu1 %v8941_v61  ;;  %4560 = vmatprep.subr.bf16.mxu0 %v8946_v63  ;;  %v9019_v61 = vld [vmem:[#allocation6 + $0xf04] ss:$8 sps:$4 sm:$0xff]   ;;  %v9014_v63 = vld [vmem:[#allocation6 + $0xe00] ss:$8 sps:$4 sm:$0xff]  }
 0x20b   :  { %4601 = vmatprep.subr.bf16.mxu1 %v8949_v0  ;;  %v9017_v0 = vld [vmem:[#allocation6 + $0xf00] ss:$8 sps:$4 sm:$0xff]  }
 0x20d   :  { %4561 = vmatpush2.bf16.msra.mxu0 %v8944_v1  ;;  %v9022_v1 = vld [vmem:[#allocation6 + $0xef4] ss:$8 sps:$4 sm:$0xff]  }
 0x20e   :  { %4602 = vmatpush2.bf16.msra.mxu1 %v8947_v4  ;;  %4562 = vmatprep.subr.bf16.mxu0 %v8952_v5  ;;  %v9025_v4 = vld [vmem:[#allocation6 + $0xff4] ss:$8 sps:$4 sm:$0xff]   ;;  %v9020_v5 = vld [vmem:[#allocation6 + $0xef0] ss:$8 sps:$4 sm:$0xff]  }
 0x20f   :  { %4603 = vmatprep.subr.bf16.mxu1 %v8955_v47  ;;  %v9023_v47 = vld [vmem:[#allocation6 + $0xff0] ss:$8 sps:$4 sm:$0xff]  }
 0x211   :  { %4563 = vmatpush2.bf16.msra.mxu0 %v8950_v6  ;;  %v9028_v6 = vld [vmem:[#allocation6 + $0xee4] ss:$8 sps:$4 sm:$0xff]  }
 0x212   :  { %4604 = vmatpush2.bf16.msra.mxu1 %v8953_v48  ;;  %4564 = vmatprep.subr.bf16.mxu0 %v8958_v7  ;;  %v9031_v48 = vld [vmem:[#allocation6 + $0xfe4] ss:$8 sps:$4 sm:$0xff]   ;;  %v9026_v7 = vld [vmem:[#allocation6 + $0xee0] ss:$8 sps:$4 sm:$0xff]  }
 0x213   :  { %4605 = vmatprep.subr.bf16.mxu1 %v8961_v43  ;;  %v9029_v43 = vld [vmem:[#allocation6 + $0xfe0] ss:$8 sps:$4 sm:$0xff]  }
 0x215   :  { %4565 = vmatpush2.bf16.msra.mxu0 %v8956_v8  ;;  %v9034_v8 = vld [vmem:[#allocation6 + $0xed4] ss:$8 sps:$4 sm:$0xff]  }
 0x216   :  { %4606 = vmatpush2.bf16.msra.mxu1 %v8959_v9  ;;  %4566 = vmatprep.subr.bf16.mxu0 %v8964_v10  ;;  %v9037_v9 = vld [vmem:[#allocation6 + $0xfd4] ss:$8 sps:$4 sm:$0xff]   ;;  %v9032_v10 = vld [vmem:[#allocation6 + $0xed0] ss:$8 sps:$4 sm:$0xff]  }
 0x217   :  { %4607 = vmatprep.subr.bf16.mxu1 %v8967_v11  ;;  %v9035_v11 = vld [vmem:[#allocation6 + $0xfd0] ss:$8 sps:$4 sm:$0xff]  }
 0x219   :  { %4567 = vmatpush2.bf16.msra.mxu0 %v8962_v12  ;;  %v9040_v12 = vld [vmem:[#allocation6 + $0xec4] ss:$8 sps:$4 sm:$0xff]  }
 0x21a   :  { %4608 = vmatpush2.bf16.msra.mxu1 %v8965_v13  ;;  %4618 = vmatprep.subr.bf16.mxu0 %v8972_v14  ;;  %v9043_v13 = vld [vmem:[#allocation6 + $0xfc4] ss:$8 sps:$4 sm:$0xff]   ;;  %v9038_v14 = vld [vmem:[#allocation6 + $0xec0] ss:$8 sps:$4 sm:$0xff]  }
 0x21b   :  { %4659 = vmatprep.subr.bf16.mxu1 %v8977_v15  ;;  %v9041_v15 = vld [vmem:[#allocation6 + $0xfc0] ss:$8 sps:$4 sm:$0xff]  }
 0x21c   :  { %v4324_v30 = vpop.f32.mrf.mxu0  ;;  %4569 = vmatmul.mubr.bf16.vlgmr.msra.gmra.mxu0 %v7271_v19  ;;  %v9049_v19 = vld [vmem:[#allocation6 + $0xfb4] ss:$8 sps:$4 sm:$0xff]  }
 0x21d   :  { %v4365_v31 = vpop.f32.mrf.mxu1  ;;  %4610 = vmatmul.mubr.bf16.vlgmr.msra.gmra.mxu1 %v7273_v21  ;;  %v4325_v33 = vadd.f32 %v4324_v30, %v10008_v16  ;;  %4619 = vmatpush1.bf16.msra.mxu0 %v8970_v17  ;;  %v9046_v17 = vld [vmem:[#allocation6 + $0xeb4] ss:$8 sps:$4 sm:$0xff]   ;;  %v9044_v21 = vld [vmem:[#allocation6 + $0xeb0] ss:$8 sps:$4 sm:$0xff]  }
 0x21e   :  { %4660 = vmatpush1.bf16.msra.mxu1 %v8975_v26  ;;  %v4326_v34 = vpop.f32.mrf.mxu0  ;;  %4620 = vmatprep.subr.bf16.mxu0 %v8980_v27  ;;  %v9047_v26 = vld [vmem:[#allocation6 + $0xfb0] ss:$8 sps:$4 sm:$0xff]   ;;  %v9052_v27 = vld [vmem:[#allocation6 + $0xea4] ss:$8 sps:$4 sm:$0xff]  }
 0x21f   :  { %v4367_v24 = vpop.f32.mrf.mxu1  ;;  %4661 = vmatprep.subr.bf16.mxu1 %v8983_v37  ;;  %v4327_v35 = vadd.f32 %v4326_v34, %v10010_v22  ;;  %v10032_v36 = vadd.f32 %v4365_v31, %v4325_v33  ;;  %4650 = vmatprep.mubr.bf16.mxu0 %v7276_v3  ;;  %v8993_v22 = vld [vmem:[#allocation6 + $0xf40] ss:$8 sps:$4 sm:$0xff]   ;;  %v9055_v37 = vld [vmem:[#allocation6 + $0xfa4] ss:$8 sps:$4 sm:$0xff]   ;;  %v9058_v3 = vld [vmem:[#allocation6 + $0xe94] ss:$8 sps:$4 sm:$0xff]  }
 0x220   :  { %4691 = vmatprep.mubr.bf16.mxu1 %v7278_v2  ;;  %v4328_v40 = vpop.f32.mrf.mxu0  ;;  %v9061_v2 = vld [vmem:[#allocation6 + $0xf94] ss:$8 sps:$4 sm:$0xff]   ;;  %v9056_v30 = vld [vmem:[#allocation6 + $0xe90] ss:$8 sps:$4 sm:$0xff]   ;;  %v9067_v33 = vld [vmem:[#allocation6 + $0xf84] ss:$8 sps:$4 sm:$0xff]  }
 0x221   :  { %v4369_v41 = vpop.f32.mrf.mxu1  ;;  %v10034_v42 = vadd.f32 %v4367_v24, %v4327_v35  ;;  %4621 = vmatpush1.bf16.msra.mxu0 %v8978_v20  ;;  %v9050_v20 = vld [vmem:[#allocation6 + $0xea0] ss:$8 sps:$4 sm:$0xff]   ;;  %v9059_v31 = vld [vmem:[#allocation6 + $0xf90] ss:$8 sps:$4 sm:$0xff]   ;;  %v9077_v35 = vld [vmem:[#allocation6 + $0x1174] ss:$8 sps:$4 sm:$0xff]  }
 0x222   :  { %4662 = vmatpush1.bf16.msra.mxu1 %v8981_v28  ;;  %v4329_v16 = vpop.f32.mrf.mxu0  ;;  %4622 = vmatprep.subr.bf16.mxu0 %v8986_v32  ;;  %v9053_v28 = vld [vmem:[#allocation6 + $0xfa0] ss:$8 sps:$4 sm:$0xff]   ;;  %v9064_v32 = vld [vmem:[#allocation6 + $0xe84] ss:$8 sps:$4 sm:$0xff]  }
 0x223   :  { %4663 = vmatprep.subr.bf16.mxu1 %v8989_v25  ;;  %v4370_v46 = vpop.f32.mrf.mxu1  ;;  %v9062_v34 = vld [vmem:[#allocation6 + $0xe80] ss:$8 sps:$4 sm:$0xff]   ;;  %v9072_v25 = vld [vmem:[#allocation6 + $0x1074] ss:$8 sps:$4 sm:$0xff]   ;;  %v9070_v16 = vld [vmem:[#allocation6 + $0x1070] ss:$8 sps:$4 sm:$0xff]  }
 0x224   :  { %v9065_v24 = vld [vmem:[#allocation6 + $0xf80] ss:$8 sps:$4 sm:$0xff]  }
 0x225   :  { %4623 = vmatpush1.bf16.msra.mxu0 %v8984_v38  ;;  %v7275_v38 = vcombine.low %v10019_v62, %v10019_v62  ;;  %v10043_v40 = vld [vmem:[%s10429_s1 + $0x80] sm:$0x77]  ;;  %v10048_v41 = vld [vmem:[%s10429_s1 + $0x88] sm:$0x77] }
 0x226   :  { %4664 = vmatpush1.bf16.msra.mxu1 %v8987_v39  ;;  %4624 = vmatprep.subr.bf16.mxu0 %v8992_v44  ;;  %v7277_v39 = vcombine.low %v10024_v23, %v10024_v23  ;;  %v9075_v44 = vld [vmem:[#allocation6 + $0x1170] ss:$8 sps:$4 sm:$0xff]   ;;  %v9080_v62 = vld [vmem:[#allocation6 + $0x1064] ss:$8 sps:$4 sm:$0xff]   ;;  %v7280_v23 = vcombine.high %v10043_v40, %v10043_v40  ;;  %v7282_v46 = vcombine.high %v10048_v41, %v10048_v41 }
 0x227   :  { %4665 = vmatprep.subr.bf16.mxu1 %v8995_v45  ;;  %v9083_v45 = vld [vmem:[#allocation6 + $0x1164] ss:$8 sps:$4 sm:$0xff]  }
 0x229   :  { %4625 = vmatpush1.bf16.msra.mxu0 %v8990_v49 }
 0x22a   :  { %4666 = vmatpush1.bf16.msra.mxu1 %v8993_v22  ;;  %4626 = vmatprep.subr.bf16.mxu0 %v8998_v50 }
 0x22b   :  { %4667 = vmatprep.subr.bf16.mxu1 %v9001_v18  ;;  %v9078_v18 = vld [vmem:[#allocation6 + $0x1060] ss:$8 sps:$4 sm:$0xff]  }
 0x22d   :  { %4627 = vmatpush1.bf16.msra.mxu0 %v8996_v51  ;;  %v9081_v51 = vld [vmem:[#allocation6 + $0x1160] ss:$8 sps:$4 sm:$0xff]  }
 0x22e   :  { %4668 = vmatpush1.bf16.msra.mxu1 %v8999_v29  ;;  %4628 = vmatprep.subr.bf16.mxu0 %v9004_v52 }
 0x22f   :  { %4669 = vmatprep.subr.bf16.mxu1 %v9007_v53  ;;  %v9086_v53 = vld [vmem:[#allocation6 + $0x1054] ss:$8 sps:$4 sm:$0xff]  }
 0x231   :  { %4629 = vmatpush1.bf16.msra.mxu0 %v9002_v54  ;;  %v9089_v54 = vld [vmem:[#allocation6 + $0x1154] ss:$8 sps:$4 sm:$0xff]  }
 0x232   :  { %4670 = vmatpush1.bf16.msra.mxu1 %v9005_v55  ;;  %4630 = vmatprep.subr.bf16.mxu0 %v9010_v56 }
 0x233   :  { %4671 = vmatprep.subr.bf16.mxu1 %v9013_v57 }
 0x235   :  { %4631 = vmatpush1.bf16.msra.mxu0 %v9008_v58 }
 0x236   :  { %4672 = vmatpush1.bf16.msra.mxu1 %v9011_v59  ;;  %4632 = vmatprep.subr.bf16.mxu0 %v9016_v60  ;;  %v9087_v60 = vld [vmem:[#allocation6 + $0x1150] ss:$8 sps:$4 sm:$0xff]  }
 0x237   :  { %4673 = vmatprep.subr.bf16.mxu1 %v9019_v61 }
 0x239   :  { %4633 = vmatpush1.bf16.msra.mxu0 %v9014_v63  ;;  %v9092_v63 = vld [vmem:[#allocation6 + $0x1044] ss:$8 sps:$4 sm:$0xff]  }
 0x23a   :  { %4674 = vmatpush1.bf16.msra.mxu1 %v9017_v0  ;;  %4634 = vmatprep.subr.bf16.mxu0 %v9022_v1  ;;  %v9095_v0 = vld [vmem:[#allocation6 + $0x1144] ss:$8 sps:$4 sm:$0xff]  }
 0x23b   :  { %4675 = vmatprep.subr.bf16.mxu1 %v9025_v4  ;;  %v9093_v4 = vld [vmem:[#allocation6 + $0x1140] ss:$8 sps:$4 sm:$0xff]  }
 0x23d   :  { %4635 = vmatpush2.bf16.msra.mxu0 %v9020_v5  ;;  %v9098_v5 = vld [vmem:[#allocation6 + $0x1034] ss:$8 sps:$4 sm:$0xff]  }
 0x23e   :  { %4676 = vmatpush2.bf16.msra.mxu1 %v9023_v47  ;;  %4636 = vmatprep.subr.bf16.mxu0 %v9028_v6  ;;  %v9101_v47 = vld [vmem:[#allocation6 + $0x1134] ss:$8 sps:$4 sm:$0xff]   ;;  %v9096_v6 = vld [vmem:[#allocation6 + $0x1030] ss:$8 sps:$4 sm:$0xff]  }
 0x23f   :  { %4677 = vmatprep.subr.bf16.mxu1 %v9031_v48  ;;  %v9099_v48 = vld [vmem:[#allocation6 + $0x1130] ss:$8 sps:$4 sm:$0xff]  }
 0x241   :  { %4637 = vmatpush2.bf16.msra.mxu0 %v9026_v7  ;;  %v9104_v7 = vld [vmem:[#allocation6 + $0x1024] ss:$8 sps:$4 sm:$0xff]  }
 0x242   :  { %4678 = vmatpush2.bf16.msra.mxu1 %v9029_v43  ;;  %4638 = vmatprep.subr.bf16.mxu0 %v9034_v8  ;;  %v9107_v43 = vld [vmem:[#allocation6 + $0x1124] ss:$8 sps:$4 sm:$0xff]   ;;  %v9102_v8 = vld [vmem:[#allocation6 + $0x1020] ss:$8 sps:$4 sm:$0xff]  }
 0x243   :  { %4679 = vmatprep.subr.bf16.mxu1 %v9037_v9  ;;  %v9105_v9 = vld [vmem:[#allocation6 + $0x1120] ss:$8 sps:$4 sm:$0xff]  }
 0x245   :  { %4639 = vmatpush2.bf16.msra.mxu0 %v9032_v10  ;;  %v9110_v10 = vld [vmem:[#allocation6 + $0x1014] ss:$8 sps:$4 sm:$0xff]  }
 0x246   :  { %4680 = vmatpush2.bf16.msra.mxu1 %v9035_v11  ;;  %4640 = vmatprep.subr.bf16.mxu0 %v9040_v12  ;;  %v9113_v11 = vld [vmem:[#allocation6 + $0x1114] ss:$8 sps:$4 sm:$0xff]   ;;  %v9108_v12 = vld [vmem:[#allocation6 + $0x1010] ss:$8 sps:$4 sm:$0xff]  }
 0x247   :  { %4681 = vmatprep.subr.bf16.mxu1 %v9043_v13  ;;  %v9111_v13 = vld [vmem:[#allocation6 + $0x1110] ss:$8 sps:$4 sm:$0xff]  }
 0x249   :  { %4641 = vmatpush2.bf16.msra.mxu0 %v9038_v14  ;;  %v9116_v14 = vld [vmem:[#allocation6 + $0x1004] ss:$8 sps:$4 sm:$0xff]  }
 0x24a   :  { %4682 = vmatpush2.bf16.msra.mxu1 %v9041_v15  ;;  %4642 = vmatprep.subr.bf16.mxu0 %v9046_v17  ;;  %v9119_v15 = vld [vmem:[#allocation6 + $0x1104] ss:$8 sps:$4 sm:$0xff]   ;;  %v9114_v17 = vld [vmem:[#allocation6 + $0x1000] ss:$8 sps:$4 sm:$0xff]  }
 0x24b   :  { %4683 = vmatprep.subr.bf16.mxu1 %v9049_v19  ;;  %v9117_v19 = vld [vmem:[#allocation6 + $0x1100] ss:$8 sps:$4 sm:$0xff]  }
 0x24d   :  { %4643 = vmatpush2.bf16.msra.mxu0 %v9044_v21  ;;  %v9122_v21 = vld [vmem:[#allocation6 + $0x10f4] ss:$8 sps:$4 sm:$0xff]  }
 0x24e   :  { %4684 = vmatpush2.bf16.msra.mxu1 %v9047_v26  ;;  %4644 = vmatprep.subr.bf16.mxu0 %v9052_v27  ;;  %v9125_v26 = vld [vmem:[#allocation6 + $0x11f4] ss:$8 sps:$4 sm:$0xff]   ;;  %v9120_v27 = vld [vmem:[#allocation6 + $0x10f0] ss:$8 sps:$4 sm:$0xff]  }
 0x24f   :  { %4685 = vmatprep.subr.bf16.mxu1 %v9055_v37  ;;  %v9123_v37 = vld [vmem:[#allocation6 + $0x11f0] ss:$8 sps:$4 sm:$0xff]  }
 0x251   :  { %4645 = vmatpush2.bf16.msra.mxu0 %v9050_v20  ;;  %v9128_v20 = vld [vmem:[#allocation6 + $0x10e4] ss:$8 sps:$4 sm:$0xff]  }
 0x252   :  { %4686 = vmatpush2.bf16.msra.mxu1 %v9053_v28  ;;  %4646 = vmatprep.subr.bf16.mxu0 %v9058_v3  ;;  %v9131_v28 = vld [vmem:[#allocation6 + $0x11e4] ss:$8 sps:$4 sm:$0xff]   ;;  %v9126_v3 = vld [vmem:[#allocation6 + $0x10e0] ss:$8 sps:$4 sm:$0xff]  }
 0x253   :  { %4687 = vmatprep.subr.bf16.mxu1 %v9061_v2  ;;  %v9129_v2 = vld [vmem:[#allocation6 + $0x11e0] ss:$8 sps:$4 sm:$0xff]  }
 0x255   :  { %4647 = vmatpush2.bf16.msra.mxu0 %v9056_v30  ;;  %v9134_v30 = vld [vmem:[#allocation6 + $0x10d4] ss:$8 sps:$4 sm:$0xff]  }
 0x256   :  { %4688 = vmatpush2.bf16.msra.mxu1 %v9059_v31  ;;  %4648 = vmatprep.subr.bf16.mxu0 %v9064_v32  ;;  %v9137_v31 = vld [vmem:[#allocation6 + $0x11d4] ss:$8 sps:$4 sm:$0xff]   ;;  %v9132_v32 = vld [vmem:[#allocation6 + $0x10d0] ss:$8 sps:$4 sm:$0xff]  }
 0x257   :  { %4689 = vmatprep.subr.bf16.mxu1 %v9067_v33  ;;  %v9135_v33 = vld [vmem:[#allocation6 + $0x11d0] ss:$8 sps:$4 sm:$0xff]  }
 0x259   :  { %4649 = vmatpush2.bf16.msra.mxu0 %v9062_v34  ;;  %v9140_v34 = vld [vmem:[#allocation6 + $0x10c4] ss:$8 sps:$4 sm:$0xff]  }
 0x25a   :  { %4690 = vmatpush2.bf16.msra.mxu1 %v9065_v24  ;;  %4700 = vmatprep.subr.bf16.mxu0 %v9072_v25  ;;  %v9143_v24 = vld [vmem:[#allocation6 + $0x11c4] ss:$8 sps:$4 sm:$0xff]   ;;  %v9138_v25 = vld [vmem:[#allocation6 + $0x10c0] ss:$8 sps:$4 sm:$0xff]  }
 0x25b   :  { %4741 = vmatprep.subr.bf16.mxu1 %v9077_v35  ;;  %v9141_v35 = vld [vmem:[#allocation6 + $0x11c0] ss:$8 sps:$4 sm:$0xff]  }
 0x25c   :  { %v4406_v49 = vpop.f32.mrf.mxu0  ;;  %4651 = vmatmul.mubr.bf16.vlgmr.msra.gmra.mxu0 %v7275_v38  ;;  %v9146_v38 = vld [vmem:[#allocation6 + $0x10b4] ss:$8 sps:$4 sm:$0xff]  }
 0x25d   :  { %v4447_v22 = vpop.f32.mrf.mxu1  ;;  %4692 = vmatmul.mubr.bf16.vlgmr.msra.gmra.mxu1 %v7277_v39  ;;  %v4407_v50 = vadd.f32 %v4406_v49, %v10032_v36  ;;  %4701 = vmatpush1.bf16.msra.mxu0 %v9070_v16  ;;  %v9084_v36 = vld [vmem:[#allocation6 + $0x1050] ss:$8 sps:$4 sm:$0xff]   ;;  %v9149_v39 = vld [vmem:[#allocation6 + $0x11b4] ss:$8 sps:$4 sm:$0xff]  }
 0x25e   :  { %4742 = vmatpush1.bf16.msra.mxu1 %v9075_v44  ;;  %v4408_v29 = vpop.f32.mrf.mxu0  ;;  %4702 = vmatprep.subr.bf16.mxu0 %v9080_v62  ;;  %v9144_v16 = vld [vmem:[#allocation6 + $0x10b0] ss:$8 sps:$4 sm:$0xff]   ;;  %v9152_v62 = vld [vmem:[#allocation6 + $0x10a4] ss:$8 sps:$4 sm:$0xff]   ;;  %v9158_v49 = vld [vmem:[#allocation6 + $0x1094] ss:$8 sps:$4 sm:$0xff]  }
 0x25f   :  { %v4449_v52 = vpop.f32.mrf.mxu1  ;;  %4743 = vmatprep.subr.bf16.mxu1 %v9083_v45  ;;  %v4409_v55 = vadd.f32 %v4408_v29, %v10034_v42  ;;  %v10056_v56 = vadd.f32 %v4447_v22, %v4407_v50  ;;  %4732 = vmatprep.mubr.bf16.mxu0 %v7280_v23  ;;  %v9090_v42 = vld [vmem:[#allocation6 + $0x1040] ss:$8 sps:$4 sm:$0xff]   ;;  %v9147_v44 = vld [vmem:[#allocation6 + $0x11b0] ss:$8 sps:$4 sm:$0xff]   ;;  %v9155_v45 = vld [vmem:[#allocation6 + $0x11a4] ss:$8 sps:$4 sm:$0xff]  }
 0x260   :  { %4773 = vmatprep.mubr.bf16.mxu1 %v7282_v46  ;;  %v4410_v57 = vpop.f32.mrf.mxu0  ;;  %v9150_v23 = vld [vmem:[#allocation6 + $0x10a0] ss:$8 sps:$4 sm:$0xff]   ;;  %v9161_v22 = vld [vmem:[#allocation6 + $0x1194] ss:$8 sps:$4 sm:$0xff]   ;;  %v9156_v50 = vld [vmem:[#allocation6 + $0x1090] ss:$8 sps:$4 sm:$0xff]  }
 0x261   :  { %v4451_v58 = vpop.f32.mrf.mxu1  ;;  %v10058_v59 = vadd.f32 %v4449_v52, %v4409_v55  ;;  %4703 = vmatpush1.bf16.msra.mxu0 %v9078_v18  ;;  %v9153_v46 = vld [vmem:[#allocation6 + $0x11a0] ss:$8 sps:$4 sm:$0xff]   ;;  %v9159_v18 = vld [vmem:[#allocation6 + $0x1190] ss:$8 sps:$4 sm:$0xff]   ;;  %v9167_v29 = vld [vmem:[#allocation6 + $0x1184] ss:$8 sps:$4 sm:$0xff]   ;;  %v7279_v57 = vcombine.low %v10043_v40, %v10043_v40 }
 0x262   :  { %4744 = vmatpush1.bf16.msra.mxu1 %v9081_v51  ;;  %v4411_v61 = vpop.f32.mrf.mxu0  ;;  %4704 = vmatprep.subr.bf16.mxu0 %v9086_v53  ;;  %v9164_v51 = vld [vmem:[#allocation6 + $0x1084] ss:$8 sps:$4 sm:$0xff]   ;;  %v9162_v52 = vld [vmem:[#allocation6 + $0x1080] ss:$8 sps:$4 sm:$0xff]   ;;  %v9195_v55 = vld [vmem:[#allocation6 + $0x1374] ss:$8 sps:$4 sm:$0xff]   ;;  %v7281_v58 = vcombine.low %v10048_v41, %v10048_v41 }
 0x263   :  { %4745 = vmatprep.subr.bf16.mxu1 %v9089_v54  ;;  %v4452_v1 = vpop.f32.mrf.mxu1  ;;  %v9165_v53 = vld [vmem:[#allocation6 + $0x1180] ss:$8 sps:$4 sm:$0xff]   ;;  %v9172_v54 = vld [vmem:[#allocation6 + $0x1274] ss:$8 sps:$4 sm:$0xff]   ;;  %v9170_v61 = vld [vmem:[#allocation6 + $0x1270] ss:$8 sps:$4 sm:$0xff]  }
 0x264   :  { %v9201_v40 = vld [vmem:[#allocation6 + $0x1364] ss:$8 sps:$4 sm:$0xff]  }
 0x265   :  { %4705 = vmatpush1.bf16.msra.mxu0 %v9084_v36  ;;  %v10067_v36 = vld [vmem:[%s10429_s1 + $0x98] sm:$0x77] }
 0x266   :  { %4746 = vmatpush1.bf16.msra.mxu1 %v9087_v60  ;;  %4706 = vmatprep.subr.bf16.mxu0 %v9092_v63  ;;  %v10072_v60 = vld [vmem:[%s10429_s1 + $0x90] sm:$0x77]  ;;  %v7286_v41 = vcombine.high %v10067_v36, %v10067_v36  ;;  %s10098_s1 = sld [smem:[#allocation2]] }
 0x267   :  { %4747 = vmatprep.subr.bf16.mxu1 %v9095_v0  ;;  %v9193_v63 = vld [vmem:[#allocation6 + $0x1370] ss:$8 sps:$4 sm:$0xff]   ;;  %v9177_v0 = vld [vmem:[#allocation6 + $0x1264] ss:$8 sps:$4 sm:$0xff]   ;;  %v7284_v1 = vcombine.high %v10072_v60, %v10072_v60 }
 0x269   :  { %4707 = vmatpush1.bf16.msra.mxu0 %v9090_v42 }
 0x26a   :  { %4748 = vmatpush1.bf16.msra.mxu1 %v9093_v4  ;;  %4708 = vmatprep.subr.bf16.mxu0 %v9098_v5 }
 0x26b   :  { %4749 = vmatprep.subr.bf16.mxu1 %v9101_v47  ;;  %v9175_v47 = vld [vmem:[#allocation6 + $0x1260] ss:$8 sps:$4 sm:$0xff]  }
 0x26d   :  { %4709 = vmatpush1.bf16.msra.mxu0 %v9096_v6  ;;  %v9199_v6 = vld [vmem:[#allocation6 + $0x1360] ss:$8 sps:$4 sm:$0xff]  }
 0x26e   :  { %4750 = vmatpush1.bf16.msra.mxu1 %v9099_v48  ;;  %4710 = vmatprep.subr.bf16.mxu0 %v9104_v7 }
 0x26f   :  { %4751 = vmatprep.subr.bf16.mxu1 %v9107_v43  ;;  %v9180_v43 = vld [vmem:[#allocation6 + $0x1254] ss:$8 sps:$4 sm:$0xff]  }
 0x271   :  { %4711 = vmatpush1.bf16.msra.mxu0 %v9102_v8  ;;  %v9207_v8 = vld [vmem:[#allocation6 + $0x1354] ss:$8 sps:$4 sm:$0xff]  }
 0x272   :  { %4752 = vmatpush1.bf16.msra.mxu1 %v9105_v9  ;;  %4712 = vmatprep.subr.bf16.mxu0 %v9110_v10 }
 0x273   :  { %4753 = vmatprep.subr.bf16.mxu1 %v9113_v11 }
 0x275   :  { %4713 = vmatpush1.bf16.msra.mxu0 %v9108_v12 }
 0x276   :  { %4754 = vmatpush1.bf16.msra.mxu1 %v9111_v13  ;;  %4714 = vmatprep.subr.bf16.mxu0 %v9116_v14  ;;  %v9205_v14 = vld [vmem:[#allocation6 + $0x1350] ss:$8 sps:$4 sm:$0xff]  }
 0x277   :  { %4755 = vmatprep.subr.bf16.mxu1 %v9119_v15 }
 0x279   :  { %4715 = vmatpush1.bf16.msra.mxu0 %v9114_v17  ;;  %v9183_v17 = vld [vmem:[#allocation6 + $0x1244] ss:$8 sps:$4 sm:$0xff]  }
 0x27a   :  { %4756 = vmatpush1.bf16.msra.mxu1 %v9117_v19  ;;  %4716 = vmatprep.subr.bf16.mxu0 %v9122_v21  ;;  %v9213_v21 = vld [vmem:[#allocation6 + $0x1344] ss:$8 sps:$4 sm:$0xff]  }
 0x27b   :  { %4757 = vmatprep.subr.bf16.mxu1 %v9125_v26  ;;  %v9211_v26 = vld [vmem:[#allocation6 + $0x1340] ss:$8 sps:$4 sm:$0xff]  }
 0x27d   :  { %4717 = vmatpush2.bf16.msra.mxu0 %v9120_v27  ;;  %v9186_v27 = vld [vmem:[#allocation6 + $0x1234] ss:$8 sps:$4 sm:$0xff]  }
 0x27e   :  { %4758 = vmatpush2.bf16.msra.mxu1 %v9123_v37  ;;  %4718 = vmatprep.subr.bf16.mxu0 %v9128_v20  ;;  %v9219_v37 = vld [vmem:[#allocation6 + $0x1334] ss:$8 sps:$4 sm:$0xff]   ;;  %v9184_v20 = vld [vmem:[#allocation6 + $0x1230] ss:$8 sps:$4 sm:$0xff]  }
 0x27f   :  { %4759 = vmatprep.subr.bf16.mxu1 %v9131_v28  ;;  %v9217_v28 = vld [vmem:[#allocation6 + $0x1330] ss:$8 sps:$4 sm:$0xff]  }
 0x281   :  { %4719 = vmatpush2.bf16.msra.mxu0 %v9126_v3  ;;  %v9189_v3 = vld [vmem:[#allocation6 + $0x1224] ss:$8 sps:$4 sm:$0xff]  }
 0x282   :  { %4760 = vmatpush2.bf16.msra.mxu1 %v9129_v2  ;;  %4720 = vmatprep.subr.bf16.mxu0 %v9134_v30  ;;  %v9225_v2 = vld [vmem:[#allocation6 + $0x1324] ss:$8 sps:$4 sm:$0xff]   ;;  %v9187_v30 = vld [vmem:[#allocation6 + $0x1220] ss:$8 sps:$4 sm:$0xff]  }
 0x283   :  { %4761 = vmatprep.subr.bf16.mxu1 %v9137_v31  ;;  %v9223_v31 = vld [vmem:[#allocation6 + $0x1320] ss:$8 sps:$4 sm:$0xff]  }
 0x285   :  { %4721 = vmatpush2.bf16.msra.mxu0 %v9132_v32  ;;  %v9192_v32 = vld [vmem:[#allocation6 + $0x1214] ss:$8 sps:$4 sm:$0xff]  }
 0x286   :  { %4762 = vmatpush2.bf16.msra.mxu1 %v9135_v33  ;;  %4722 = vmatprep.subr.bf16.mxu0 %v9140_v34  ;;  %v9231_v33 = vld [vmem:[#allocation6 + $0x1314] ss:$8 sps:$4 sm:$0xff]   ;;  %v9190_v34 = vld [vmem:[#allocation6 + $0x1210] ss:$8 sps:$4 sm:$0xff]  }
 0x287   :  { %4763 = vmatprep.subr.bf16.mxu1 %v9143_v24  ;;  %v9229_v24 = vld [vmem:[#allocation6 + $0x1310] ss:$8 sps:$4 sm:$0xff]  }
 0x289   :  { %4723 = vmatpush2.bf16.msra.mxu0 %v9138_v25  ;;  %v9198_v25 = vld [vmem:[#allocation6 + $0x1204] ss:$8 sps:$4 sm:$0xff]  }
 0x28a   :  { %4764 = vmatpush2.bf16.msra.mxu1 %v9141_v35  ;;  %4724 = vmatprep.subr.bf16.mxu0 %v9146_v38  ;;  %v9237_v35 = vld [vmem:[#allocation6 + $0x1304] ss:$8 sps:$4 sm:$0xff]  }
 0x28b   :  { %4765 = vmatprep.subr.bf16.mxu1 %v9149_v39  ;;  %v768_v38 = vld [vmem:[#allocation6 + $0x1380] sm:$0xff] }
 0x28c   :  { %v9196_v39 = vld [vmem:[#allocation6 + $0x1200] ss:$8 sps:$4 sm:$0xff]  }
 0x28d   :  { %4725 = vmatpush2.bf16.msra.mxu0 %v9144_v16  ;;  %v9235_v16 = vld [vmem:[#allocation6 + $0x1300] ss:$8 sps:$4 sm:$0xff]  }
 0x28e   :  { %4766 = vmatpush2.bf16.msra.mxu1 %v9147_v44  ;;  %4726 = vmatprep.subr.bf16.mxu0 %v9152_v62  ;;  %v9204_v44 = vld [vmem:[#allocation6 + $0x12f4] ss:$8 sps:$4 sm:$0xff]   ;;  %v7912_v62 = vcombine.high %v768_v38, %v768_v38 }
 0x28f   :  { %4767 = vmatprep.subr.bf16.mxu1 %v9155_v45  ;;  %v7911_v45 = vcombine.low %v768_v38, %v768_v38  ;;  %v9294_v38 = vld [vmem:[#allocation9 + $0x4] ss:$8 sps:$4 sm:$0xff]  }
 0x291   :  { %4727 = vmatpush2.bf16.msra.mxu0 %v9150_v23  ;;  %v9202_v23 = vld [vmem:[#allocation6 + $0x12f0] ss:$8 sps:$4 sm:$0xff]  }
 0x292   :  { %4768 = vmatpush2.bf16.msra.mxu1 %v9153_v46  ;;  %4728 = vmatprep.subr.bf16.mxu0 %v9158_v49  ;;  %v9210_v46 = vld [vmem:[#allocation6 + $0x12e4] ss:$8 sps:$4 sm:$0xff]   ;;  %v4039_v49 = vsel %vm4037_vm1, %v7911_v45, 0 }
 0x293   :  { %4769 = vmatprep.subr.bf16.mxu1 %v9161_v22  ;;  %v7285_v22 = vcombine.low %v10067_v36, %v10067_v36  ;;  %v9238_v36 = vld [vmem:[#allocation6 + $0x1290] ss:$8 sps:$4 sm:$0xff]   ;;  %v9303_v45 = vld [vmem:[#allocation9 + $0x1f4] ss:$8 sps:$4 sm:$0xff]  }
 0x295   :  { %4729 = vmatpush2.bf16.msra.mxu0 %v9156_v50  ;;  %v9208_v50 = vld [vmem:[#allocation6 + $0x12e0] ss:$8 sps:$4 sm:$0xff]  }
 0x296   :  { %4770 = vmatpush2.bf16.msra.mxu1 %v9159_v18  ;;  %4730 = vmatprep.subr.bf16.mxu0 %v9164_v51  ;;  %v9216_v18 = vld [vmem:[#allocation6 + $0x12d4] ss:$8 sps:$4 sm:$0xff]   ;;  %v9214_v51 = vld [vmem:[#allocation6 + $0x12d0] ss:$8 sps:$4 sm:$0xff]  }
 0x297   :  { %4771 = vmatprep.subr.bf16.mxu1 %v9167_v29  ;;  %v9222_v29 = vld [vmem:[#allocation6 + $0x12c4] ss:$8 sps:$4 sm:$0xff]  }
 0x299   :  { %4731 = vmatpush2.bf16.msra.mxu0 %v9162_v52  ;;  %v9220_v52 = vld [vmem:[#allocation6 + $0x12c0] ss:$8 sps:$4 sm:$0xff]  }
 0x29a   :  { %4772 = vmatpush2.bf16.msra.mxu1 %v9165_v53  ;;  %4782 = vmatprep.subr.bf16.mxu0 %v9172_v54  ;;  %v9228_v53 = vld [vmem:[#allocation6 + $0x12b4] ss:$8 sps:$4 sm:$0xff]   ;;  %v9226_v54 = vld [vmem:[#allocation6 + $0x12b0] ss:$8 sps:$4 sm:$0xff]  }
 0x29b   :  { %4823 = vmatprep.subr.bf16.mxu1 %v9195_v55  ;;  %v9234_v55 = vld [vmem:[#allocation6 + $0x12a4] ss:$8 sps:$4 sm:$0xff]  }
 0x29c   :  { %v4488_v42 = vpop.f32.mrf.mxu0  ;;  %4733 = vmatmul.mubr.bf16.vlgmr.msra.gmra.mxu0 %v7279_v57  ;;  %v9232_v57 = vld [vmem:[#allocation6 + $0x12a0] ss:$8 sps:$4 sm:$0xff]  }
 0x29d   :  { %v4529_v4 = vpop.f32.mrf.mxu1  ;;  %4774 = vmatmul.mubr.bf16.vlgmr.msra.gmra.mxu1 %v7281_v58  ;;  %v4489_v5 = vadd.f32 %v4488_v42, %v10056_v56  ;;  %4783 = vmatpush1.bf16.msra.mxu0 %v9170_v61  ;;  %v9178_v56 = vld [vmem:[#allocation6 + $0x1250] ss:$8 sps:$4 sm:$0xff]   ;;  %v9240_v58 = vld [vmem:[#allocation6 + $0x1294] ss:$8 sps:$4 sm:$0xff]   ;;  %v9246_v61 = vld [vmem:[#allocation6 + $0x1284] ss:$8 sps:$4 sm:$0xff]  }
 0x29e   :  { %4824 = vmatpush1.bf16.msra.mxu1 %v9193_v63  ;;  %v4490_v48 = vpop.f32.mrf.mxu0  ;;  %4784 = vmatprep.subr.bf16.mxu0 %v9177_v0  ;;  %v9244_v63 = vld [vmem:[#allocation6 + $0x1280] ss:$8 sps:$4 sm:$0xff]   ;;  %v7283_v0 = vcombine.low %v10072_v60, %v10072_v60 }
 0x29f   :  { %v4531_v7 = vpop.f32.mrf.mxu1  ;;  %4825 = vmatprep.subr.bf16.mxu1 %v9201_v40  ;;  %v4491_v9 = vadd.f32 %v4490_v48, %v10058_v59  ;;  %v10080_v10 = vadd.f32 %v4529_v4, %v4489_v5  ;;  %7914 = vmatprep.mubr.msk.bf16.mxu1 %vm4033_vm0, %v7286_v41  ;;  %v9181_v59 = vld [vmem:[#allocation6 + $0x1240] ss:$8 sps:$4 sm:$0xff]  }
 0x2a0   :  { %4814 = vmatprep.mubr.bf16.mxu0 %v7284_v1  ;;  %v4492_v11 = vpop.f32.mrf.mxu0  ;;  %v9252_v60 = vld [vmem:[#allocation9 + $0x74] ss:$8 sps:$4 sm:$0xff]  }
 0x2a1   :  { %v4533_v12 = vpop.f32.mrf.mxu1  ;;  %v10082_v13 = vadd.f32 %v4531_v7, %v4491_v9  ;;  %4785 = vmatpush1.bf16.msra.mxu0 %v9175_v47  ;;  %v9250_v9 = vld [vmem:[#allocation9 + $0x70] ss:$8 sps:$4 sm:$0xff]  }
 0x2a2   :  { %4826 = vmatpush1.bf16.msra.mxu1 %v9199_v6  ;;  %v4493_v15 = vpop.f32.mrf.mxu0  ;;  %4786 = vmatprep.subr.bf16.mxu0 %v9180_v43  ;;  %v9253_v11 = vld [vmem:[#allocation9 + $0x170] ss:$8 sps:$4 sm:$0xff]   ;;  %v9255_v12 = vld [vmem:[#allocation9 + $0x174] ss:$8 sps:$4 sm:$0xff]  }
 0x2a3   :  { %v4534_v19 = vpop.f32.mrf.mxu1  ;;  %4827 = vmatprep.subr.bf16.mxu1 %v9207_v8  ;;  %v9264_v15 = vld [vmem:[#allocation9 + $0x54] ss:$8 sps:$4 sm:$0xff]  }
 0x2a4   :  { %v9262_v19 = vld [vmem:[#allocation9 + $0x50] ss:$8 sps:$4 sm:$0xff]  }
 0x2a5   :  { %4787 = vmatpush1.bf16.msra.mxu0 %v9178_v56  ;;  %v9258_v56 = vld [vmem:[#allocation9 + $0x64] ss:$8 sps:$4 sm:$0xff]  }
 0x2a6   :  { %4828 = vmatpush1.bf16.msra.mxu1 %v9205_v14  ;;  %4788 = vmatprep.subr.bf16.mxu0 %v9183_v17  ;;  %v9261_v14 = vld [vmem:[#allocation9 + $0x164] ss:$8 sps:$4 sm:$0xff]   ;;  %v9267_v17 = vld [vmem:[#allocation9 + $0x154] ss:$8 sps:$4 sm:$0xff]  }
 0x2a7   :  { %4829 = vmatprep.subr.bf16.mxu1 %v9213_v21  ;;  %v9265_v21 = vld [vmem:[#allocation9 + $0x150] ss:$8 sps:$4 sm:$0xff]  }
 0x2a9   :  { %4789 = vmatpush1.bf16.msra.mxu0 %v9181_v59  ;;  %v9270_v59 = vld [vmem:[#allocation9 + $0x44] ss:$8 sps:$4 sm:$0xff]  }
 0x2aa   :  { %4830 = vmatpush1.bf16.msra.mxu1 %v9211_v26  ;;  %4790 = vmatprep.subr.bf16.mxu0 %v9186_v27  ;;  %v9273_v26 = vld [vmem:[#allocation9 + $0x144] ss:$8 sps:$4 sm:$0xff]   ;;  %v9268_v27 = vld [vmem:[#allocation9 + $0x40] ss:$8 sps:$4 sm:$0xff]  }
 0x2ab   :  { %4831 = vmatprep.subr.bf16.mxu1 %v9219_v37  ;;  %v9271_v37 = vld [vmem:[#allocation9 + $0x140] ss:$8 sps:$4 sm:$0xff]  }
 0x2ad   :  { %4791 = vmatpush1.bf16.msra.mxu0 %v9184_v20  ;;  %v9276_v20 = vld [vmem:[#allocation9 + $0x34] ss:$8 sps:$4 sm:$0xff]  }
 0x2ae   :  { %4832 = vmatpush1.bf16.msra.mxu1 %v9217_v28  ;;  %4792 = vmatprep.subr.bf16.mxu0 %v9189_v3  ;;  %v9279_v28 = vld [vmem:[#allocation9 + $0x134] ss:$8 sps:$4 sm:$0xff]   ;;  %v9274_v3 = vld [vmem:[#allocation9 + $0x30] ss:$8 sps:$4 sm:$0xff]  }
 0x2af   :  { %4833 = vmatprep.subr.bf16.mxu1 %v9225_v2  ;;  %v9277_v2 = vld [vmem:[#allocation9 + $0x130] ss:$8 sps:$4 sm:$0xff]  }
 0x2b1   :  { %4793 = vmatpush1.bf16.msra.mxu0 %v9187_v30  ;;  %v9282_v30 = vld [vmem:[#allocation9 + $0x24] ss:$8 sps:$4 sm:$0xff]  }
 0x2b2   :  { %4834 = vmatpush1.bf16.msra.mxu1 %v9223_v31  ;;  %4794 = vmatprep.subr.bf16.mxu0 %v9192_v32  ;;  %v9285_v31 = vld [vmem:[#allocation9 + $0x124] ss:$8 sps:$4 sm:$0xff]   ;;  %v9280_v32 = vld [vmem:[#allocation9 + $0x20] ss:$8 sps:$4 sm:$0xff]  }
 0x2b3   :  { %4835 = vmatprep.subr.bf16.mxu1 %v9231_v33  ;;  %v9283_v33 = vld [vmem:[#allocation9 + $0x120] ss:$8 sps:$4 sm:$0xff]  }
 0x2b5   :  { %4795 = vmatpush1.bf16.msra.mxu0 %v9190_v34  ;;  %v9288_v34 = vld [vmem:[#allocation9 + $0x14] ss:$8 sps:$4 sm:$0xff]  }
 0x2b6   :  { %4836 = vmatpush1.bf16.msra.mxu1 %v9229_v24  ;;  %4796 = vmatprep.subr.bf16.mxu0 %v9198_v25  ;;  %v9291_v24 = vld [vmem:[#allocation9 + $0x114] ss:$8 sps:$4 sm:$0xff]   ;;  %v9286_v25 = vld [vmem:[#allocation9 + $0x10] ss:$8 sps:$4 sm:$0xff]  }
 0x2b7   :  { %4837 = vmatprep.subr.bf16.mxu1 %v9237_v35  ;;  %v9289_v35 = vld [vmem:[#allocation9 + $0x110] ss:$8 sps:$4 sm:$0xff]  }
 0x2b9   :  { %4797 = vmatpush1.bf16.msra.mxu0 %v9196_v39  ;;  %v9297_v39 = vld [vmem:[#allocation9 + $0x104] ss:$8 sps:$4 sm:$0xff]  }
 0x2ba   :  { %4838 = vmatpush1.bf16.msra.mxu1 %v9235_v16  ;;  %4798 = vmatprep.subr.bf16.mxu0 %v9204_v44  ;;  %v9292_v16 = vld [vmem:[#allocation9] ss:$8 sps:$4 sm:$0xff]  }
 0x2bb   :  { %7913 = vmatprep.subr.msk.bf16.mxu1 %vm4037_vm1, %v7912_v62  ;;  %v9295_v44 = vld [vmem:[#allocation9 + $0x100] ss:$8 sps:$4 sm:$0xff]   ;;  %v9300_v62 = vld [vmem:[#allocation9 + $0xf4] ss:$8 sps:$4 sm:$0xff]  }
 0x2bd   :  { %4799 = vmatpush2.bf16.msra.mxu0 %v9202_v23  ;;  %v9298_v23 = vld [vmem:[#allocation9 + $0xf0] ss:$8 sps:$4 sm:$0xff]  }
 0x2be   :  { %4854 = vmatpush2.bf16.msra.mxu1 %v4039_v49  ;;  %4800 = vmatprep.subr.bf16.mxu0 %v9210_v46  ;;  %v9301_v46 = vld [vmem:[#allocation9 + $0x1f0] ss:$8 sps:$4 sm:$0xff]   ;;  %v9306_v49 = vld [vmem:[#allocation9 + $0xe4] ss:$8 sps:$4 sm:$0xff]  }
 0x2bf   :  { %6696 = vmatprep.subr.bf16.mxu1 %v9252_v60  ;;  %v9328_v60 = vld [vmem:[#allocation9 + $0xa0] ss:$8 sps:$4 sm:$0xff]  }
 0x2c1   :  { %4856 = vmatmul.mubr.bf16.vlgmr.msra.gmra.mxu1 %v7285_v22  ;;  %4801 = vmatpush2.bf16.msra.mxu0 %v9208_v50  ;;  %v9309_v22 = vld [vmem:[#allocation9 + $0x1e4] ss:$8 sps:$4 sm:$0xff]   ;;  %v9304_v50 = vld [vmem:[#allocation9 + $0xe0] ss:$8 sps:$4 sm:$0xff]  }
 0x2c2   :  { %4802 = vmatprep.subr.bf16.mxu0 %v9216_v18  ;;  %6697 = vmatpush1.bf16.msra.mxu1 %v9250_v9  ;;  %v9307_v18 = vld [vmem:[#allocation9 + $0x1e0] ss:$8 sps:$4 sm:$0xff]  }
 0x2c3   :  { %6698 = vmatprep.subr.bf16.mxu1 %v9258_v56  ;;  %v9333_v56 = vld [vmem:[#allocation9 + $0x1a4] ss:$8 sps:$4 sm:$0xff]  }
 0x2c5   :  { %4803 = vmatpush2.bf16.msra.mxu0 %v9214_v51  ;;  %v9312_v51 = vld [vmem:[#allocation9 + $0xd4] ss:$8 sps:$4 sm:$0xff]  }
 0x2c6   :  { %4804 = vmatprep.subr.bf16.mxu0 %v9222_v29  ;;  %v9315_v29 = vld [vmem:[#allocation9 + $0x1d4] ss:$8 sps:$4 sm:$0xff]  }
 0x2c9   :  { %4805 = vmatpush2.bf16.msra.mxu0 %v9220_v52  ;;  %v9310_v52 = vld [vmem:[#allocation9 + $0xd0] ss:$8 sps:$4 sm:$0xff]  }
 0x2ca   :  { %4806 = vmatprep.subr.bf16.mxu0 %v9228_v53  ;;  %v9313_v53 = vld [vmem:[#allocation9 + $0x1d0] ss:$8 sps:$4 sm:$0xff]  }
 0x2cd   :  { %4807 = vmatpush2.bf16.msra.mxu0 %v9226_v54  ;;  %v9318_v54 = vld [vmem:[#allocation9 + $0xc4] ss:$8 sps:$4 sm:$0xff]  }
 0x2ce   :  { %4808 = vmatprep.subr.bf16.mxu0 %v9234_v55  ;;  %v9321_v55 = vld [vmem:[#allocation9 + $0x1c4] ss:$8 sps:$4 sm:$0xff]  }
 0x2d1   :  { %4809 = vmatpush2.bf16.msra.mxu0 %v9232_v57 }
 0x2d2   :  { %4810 = vmatprep.subr.bf16.mxu0 %v9240_v58 }
 0x2d5   :  { %4811 = vmatpush2.bf16.msra.mxu0 %v9238_v36  ;;  %v9316_v36 = vld [vmem:[#allocation9 + $0xc0] ss:$8 sps:$4 sm:$0xff]  }
 0x2d6   :  { %4812 = vmatprep.subr.bf16.mxu0 %v9246_v61  ;;  %v9319_v61 = vld [vmem:[#allocation9 + $0x1c0] ss:$8 sps:$4 sm:$0xff]  }
 0x2d9   :  { %4813 = vmatpush2.bf16.msra.mxu0 %v9244_v63 }
 0x2da   :  { %6737 = vmatprep.subr.bf16.mxu0 %v9255_v12  ;;  %v9331_v12 = vld [vmem:[#allocation9 + $0x1a0] ss:$8 sps:$4 sm:$0xff]  }
 0x2dc   :  { %v4570_v40 = vpop.f32.mrf.mxu0  ;;  %4815 = vmatmul.mubr.bf16.vlgmr.msra.gmra.mxu0 %v7283_v0 }
 0x2dd   :  { %v4611_v41 = vpop.f32.mrf.mxu1  ;;  %v4571_v1 = vadd.f32 %v4570_v40, %v10080_v10  ;;  %v9256_v10 = vld [vmem:[#allocation9 + $0x60] ss:$8 sps:$4 sm:$0xff]   ;;  %6738 = vmatpush1.bf16.msra.mxu0 %v9253_v11  ;;  %v9330_v11 = vld [vmem:[#allocation9 + $0xa4] ss:$8 sps:$4 sm:$0xff]  }
 0x2de   :  { %v4572_v42 = vpop.f32.mrf.mxu0  ;;  %6739 = vmatprep.subr.bf16.mxu0 %v9261_v14  ;;  %6699 = vmatpush1.bf16.msra.mxu1 %v9256_v10  ;;  %v9339_v14 = vld [vmem:[#allocation9 + $0x194] ss:$8 sps:$4 sm:$0xff]   ;;  %v9334_v10 = vld [vmem:[#allocation9 + $0x90] ss:$8 sps:$4 sm:$0xff]  }
 0x2df   :  { %v4613_v4 = vpop.f32.mrf.mxu1  ;;  %v4573_v5 = vadd.f32 %v4572_v42, %v10082_v13  ;;  %v10090_v47 = vadd.f32 %v4611_v41, %v4571_v1  ;;  %v9259_v13 = vld [vmem:[#allocation9 + $0x160] ss:$8 sps:$4 sm:$0xff]   ;;  %6700 = vmatprep.subr.bf16.mxu1 %v9264_v15  ;;  %v9324_v42 = vld [vmem:[#allocation9 + $0xb4] ss:$8 sps:$4 sm:$0xff]   ;;  %v9342_v15 = vld [vmem:[#allocation9 + $0x84] ss:$8 sps:$4 sm:$0xff]  }
 0x2e0   :  { %v4574_v6 = vpop.f32.mrf.mxu0 }
 0x2e1   :  { %v4615_v48 = vpop.f32.mrf.mxu1  ;;  %v10092_v7 = vadd.f32 %v4613_v4, %v4573_v5  ;;  %6740 = vmatpush1.bf16.msra.mxu0 %v9259_v13  ;;  %v9327_v4 = vld [vmem:[#allocation9 + $0x1b4] ss:$8 sps:$4 sm:$0xff]   ;;  %v9337_v13 = vld [vmem:[#allocation9 + $0x190] ss:$8 sps:$4 sm:$0xff]  }
 0x2e2   :  { %v4575_v43 = vpop.f32.mrf.mxu0  ;;  %6741 = vmatprep.subr.bf16.mxu0 %v9267_v17  ;;  %6701 = vmatpush1.bf16.msra.mxu1 %v9262_v19  ;;  %v9322_v48 = vld [vmem:[#allocation9 + $0xb0] ss:$8 sps:$4 sm:$0xff]   ;;  %v9345_v17 = vld [vmem:[#allocation9 + $0x184] ss:$8 sps:$4 sm:$0xff]   ;;  %v9340_v19 = vld [vmem:[#allocation9 + $0x80] ss:$8 sps:$4 sm:$0xff]  }
 0x2e3   :  { %v4616_v8 = vpop.f32.mrf.mxu1  ;;  %6702 = vmatprep.subr.bf16.mxu1 %v9270_v59  ;;  %v9325_v43 = vld [vmem:[#allocation9 + $0x1b0] ss:$8 sps:$4 sm:$0xff]   ;;  %v9348_v59 = vld [vmem:[#allocation9 + $0x274] ss:$8 sps:$4 sm:$0xff]  }
 0x2e5   :  { %6742 = vmatpush1.bf16.msra.mxu0 %v9265_v21  ;;  %v9343_v21 = vld [vmem:[#allocation9 + $0x180] ss:$8 sps:$4 sm:$0xff]  }
 0x2e6   :  { %6743 = vmatprep.subr.bf16.mxu0 %v9273_v26  ;;  %6703 = vmatpush1.bf16.msra.mxu1 %v9268_v27  ;;  %v9351_v26 = vld [vmem:[#allocation9 + $0x374] ss:$8 sps:$4 sm:$0xff]  }
 0x2e7   :  { %6704 = vmatprep.subr.bf16.mxu1 %v9276_v20 }
 0x2e9   :  { %6744 = vmatpush1.bf16.msra.mxu0 %v9271_v37 }
 0x2ea   :  { %6745 = vmatprep.subr.bf16.mxu0 %v9279_v28  ;;  %6705 = vmatpush1.bf16.msra.mxu1 %v9274_v3 }
 0x2eb   :  { %6706 = vmatprep.subr.bf16.mxu1 %v9282_v30 }
 0x2ed   :  { %6746 = vmatpush1.bf16.msra.mxu0 %v9277_v2 }
 0x2ee   :  { %6747 = vmatprep.subr.bf16.mxu0 %v9285_v31  ;;  %6707 = vmatpush1.bf16.msra.mxu1 %v9280_v32 }
 0x2ef   :  { %6708 = vmatprep.subr.bf16.mxu1 %v9288_v34 }
 0x2f1   :  { %6748 = vmatpush1.bf16.msra.mxu0 %v9283_v33 }
 0x2f2   :  { %6749 = vmatprep.subr.bf16.mxu0 %v9291_v24  ;;  %6709 = vmatpush1.bf16.msra.mxu1 %v9286_v25 }
 0x2f3   :  { %6710 = vmatprep.subr.bf16.mxu1 %v9294_v38  ;;  %v4894_v38 = vlaneseq }
 0x2f5   :  { %6750 = vmatpush1.bf16.msra.mxu0 %v9289_v35 }
 0x2f6   :  { %6751 = vmatprep.subr.bf16.mxu0 %v9297_v39  ;;  %6711 = vmatpush1.bf16.msra.mxu1 %v9292_v16  ;;  %v10120_v39 = vshrl.u32 %v4894_v38, 7 }
 0x2f7   :  { %6712 = vmatprep.subr.bf16.mxu1 %v9300_v62 }
 0x2f8   :  { %v4900_v62 = vsub.s32 1, %v10120_v39 }
 0x2f9   :  { %6752 = vmatpush1.bf16.msra.mxu0 %v9295_v44  ;;  %v4896_v44 = vsub.s32 0, %v10120_v39  ;;  %v7041_v39 = vld [vmem:[%s10434_s6 + $0x78] sm:$0xff] }
 0x2fa   :  { %6753 = vmatprep.subr.bf16.mxu0 %v9303_v45  ;;  %6713 = vmatpush2.bf16.msra.mxu1 %v9298_v23  ;;  %v4864_v45 = vld [vmem:[#allocation7] sm:$0x3] }
 0x2fb   :  { %6714 = vmatprep.subr.bf16.mxu1 %v9306_v49  ;;  %v4870_v49 = vstv %s10100_s15 }
 0x2fd   :  { %6754 = vmatpush2.bf16.msra.mxu0 %v9301_v46  ;;  %v4866_v46 = vstv %s10098_s1 }
 0x2fe   :  { %6755 = vmatprep.subr.bf16.mxu0 %v9309_v22  ;;  %6715 = vmatpush2.bf16.msra.mxu1 %v9304_v50  ;;  %v4882_v22 = vstv %s10102_s16  ;;  %v4909_v50 = vstv %s10104_s17 }
 0x2ff   :  { %6716 = vmatprep.subr.bf16.mxu1 %v9312_v51 }
 0x301   :  { %6756 = vmatpush2.bf16.msra.mxu0 %v9307_v18 }
 0x302   :  { %6757 = vmatprep.subr.bf16.mxu0 %v9315_v29  ;;  %6717 = vmatpush2.bf16.msra.mxu1 %v9310_v52  ;;  %v4913_v29 = vstv %s10106_s18  ;;  %v4925_v52 = vstv %s10108_s19 }
 0x303   :  { %6718 = vmatprep.subr.bf16.mxu1 %v9318_v54  ;;  %v10141_v54 = vrot.slane %v4864_v45, %v4896_v44 }
 0x305   :  { %6758 = vmatpush2.bf16.msra.mxu0 %v9313_v53 }
 0x306   :  { %6759 = vmatprep.subr.bf16.mxu0 %v9321_v55  ;;  %6719 = vmatpush2.bf16.msra.mxu1 %v9316_v36  ;;  %v10145_v55 = vrot.slane %v4864_v45, %v4900_v62 }
 0x307   :  { %6720 = vmatprep.subr.bf16.mxu1 %v9324_v42  ;;  %v5005_v42 = vstv %s10124_s25 }
 0x309   :  { %6760 = vmatpush2.bf16.msra.mxu0 %v9319_v61 }
 0x30a   :  { %6761 = vmatprep.subr.bf16.mxu0 %v9327_v4  ;;  %6721 = vmatpush2.bf16.msra.mxu1 %v9322_v48  ;;  %v5009_v4 = vstv %s10126_s4 }
 0x30b   :  { %6722 = vmatprep.subr.bf16.mxu1 %v9330_v11 }
 0x30d   :  { %6762 = vmatpush2.bf16.msra.mxu0 %v9325_v43  ;;  %v5021_v43 = vstv %s10129_s26 }
 0x30e   :  { %6763 = vmatprep.subr.bf16.mxu0 %v9333_v56  ;;  %6723 = vmatpush2.bf16.msra.mxu1 %v9328_v60 }
 0x311   :  { %6764 = vmatpush2.bf16.msra.mxu0 %v9331_v12 }
 0x312   :  { %6765 = vmatprep.subr.bf16.mxu0 %v9339_v14 }
 0x315   :  { %6766 = vmatpush2.bf16.msra.mxu0 %v9337_v13 }
 0x316   :  { %6767 = vmatprep.subr.bf16.mxu0 %v9345_v17 }
 0x319   :  { %6768 = vmatpush2.bf16.msra.mxu0 %v9343_v21 }
 0x31a   :  { %6819 = vmatprep.subr.bf16.mxu0 %v9351_v26 }
 0x31c   :  { %v4652_v57 = vpop.f32.mrf.mxu0 }
 0x31d   :  { %v4693_v58 = vpop.f32.mrf.mxu1  ;;  %v4653_v63 = vadd.f32 %v4652_v57, %v10090_v47  ;;  %v4941_v57 = vstv %s10110_s2 }
 0x31e   :  { %v4654_v0 = vpop.f32.mrf.mxu0 }
 0x31f   :  { %v4695_v40 = vpop.f32.mrf.mxu1  ;;  %v4655_v41 = vadd.f32 %v4654_v0, %v10092_v7  ;;  %v4694_v1 = vadd.f32 %v4693_v58, %v4653_v63  ;;  %v9336_v7 = vld [vmem:[#allocation9 + $0x94] ss:$8 sps:$4 sm:$0xff]   ;;  %v4945_v58 = vstv %s10112_s20  ;;  %v4957_v63 = vstv %s10114_s21 }
 0x320   :  { %v4656_v5 = vpop.f32.mrf.mxu0  ;;  %6724 = vmatprep.subr.bf16.mxu1 %v9336_v7  ;;  %v4973_v0 = vstv %s10116_s22 }
 0x321   :  { %v4697_v6 = vpop.f32.mrf.mxu1  ;;  %v10096_v8 = vadd.f32 %v4695_v40, %v4655_v41  ;;  %6725 = vmatpush2.bf16.msra.mxu1 %v9334_v10  ;;  %v4977_v41 = vstv %s10118_s23 }
 0x322   :  { %v4657_v47 = vpop.f32.mrf.mxu0  ;;  %6726 = vmatprep.subr.bf16.mxu1 %v9342_v15 }
 0x323   :  { %v4698_v9 = vpop.f32.mrf.mxu1 }
 0x325   :  { %6727 = vmatpush2.bf16.msra.mxu1 %v9340_v19 }
 0x326   :  { %6778 = vmatprep.subr.bf16.mxu1 %v9348_v59 }
 0x35c   :  { %v4734_v27 = vpop.f32.mrf.mxu0 }
 0x35d   :  { %v4775_v37 = vpop.f32.mrf.mxu1  ;;  %v4735_v20 = vadd.f32 %v4734_v27, %v4694_v1  ;;  %v4989_v1 = vstv %s10122_s24 }
 0x35e   :  { %v4736_v28 = vpop.f32.mrf.mxu0 }
 0x35f   :  { %v4777_v3 = vpop.f32.mrf.mxu1  ;;  %v4776_v2 = vadd.f32 %v4775_v37, %v4735_v20  ;;  %v4737_v16 = vadd.f32 %v4736_v28, %v10096_v8 }
 0x360   :  { %v4738_v30 = vpop.f32.mrf.mxu0 }
 0x361   :  { %v4779_v31 = vpop.f32.mrf.mxu1  ;;  %v4778_v18 = vadd.f32 %v4777_v3, %v4737_v16 }
 0x362   :  { %v4739_v32 = vpop.f32.mrf.mxu0 }
 0x363   :  { %v4780_v33 = vpop.f32.mrf.mxu1 }
 0x381   :  { %v4857_v34 = vpop.f32.mrf.mxu1 }
 0x383   :  { %v4859_v24 = vpop.f32.mrf.mxu1 }
 0x385   :  { %v4861_v25 = vpop.f32.mrf.mxu1 }
 0x387   :  { %v4862_v35 = vpop.f32.mrf.mxu1 }
 0x39c   :  { %v4816_v23 = vpop.f32.mrf.mxu0 }
 0x39d   :  { %v4817_v51 = vadd.f32 %v4816_v23, %v4776_v2 }
 0x39e   :  { %v4818_v53 = vpop.f32.mrf.mxu0 }
 0x39f   :  { %v10149_v36 = vadd.f32 %v4857_v34, %v4817_v51  ;;  %v4819_v61 = vadd.f32 %v4818_v53, %v4778_v18 }
 0x3a0   :  { %v4820_v40 = vpop.f32.mrf.mxu0 }
 0x3a1   :  { %v10157_v5 = vadd.f32 %v4859_v24, %v4819_v61  ;;  %v4871_v6 = vmul.f32 %v4870_v49, %v10149_v36  ;;  %v4883_v48 = vmul.f32 %v4882_v22, %v10149_v36  ;;  %v4867_v47 = vmul.f32 %v4866_v46, %v10149_v36 }
 0x3a2   :  { %v4821_v8 = vpop.f32.mrf.mxu0  ;;  %v4910_v9 = vmul.f32 %v4909_v50, %v10149_v36  ;;  %v4914_v60 = vmul.f32 %v4913_v29, %v10149_v36  ;;  %v4926_v11 = vmul.f32 %v4925_v52, %v10149_v36  ;;  %v4942_v14 = vmul.f32 %v4941_v57, %v10149_v36 }
 0x3a3   :  { %v4872_v12 = vmul.f32 %v4870_v49, %v10157_v5  ;;  %v4875_v56 = vrot.slane %v4871_v6, 2  ;;  %v4884_v7 = vmul.f32 %v4882_v22, %v10157_v5  ;;  %v4868_v10 = vmul.f32 %v4866_v46, %v10157_v5 }
 0x3a4   :  { %v4887_v13 = vrot.slane %v4883_v48, 4  ;;  %v4915_v15 = vmul.f32 %v4913_v29, %v10157_v5  ;;  %v4918_v17 = vrot.slane %v4914_v60, 2  ;;  %v4911_v59 = vmul.f32 %v4909_v50, %v10157_v5  ;;  %v9346_v60 = vld [vmem:[#allocation9 + $0x270] ss:$8 sps:$4 sm:$0xff]  }
 0x3a5   :  { %v4876_v19 = vrot.slane %v4872_v12, 2  ;;  %v4888_v21 = vrot.slane %v4884_v7, 4  ;;  %v4927_v26 = vmul.f32 %v4925_v52, %v10157_v5  ;;  %v4930_v37 = vrot.slane %v4926_v11, 4 }
 0x3a6   :  { %v4919_v27 = vrot.slane %v4915_v15, 2  ;;  %v4879_v20 = vadd.f32 %v4875_v56, %v4867_v47  ;;  %v4922_v28 = vadd.f32 %v4918_v17, %v4910_v9  ;;  %v4946_v30 = vmul.f32 %v4945_v58, %v10149_v36 }
 0x3a7   :  { %v4880_v3 = vadd.f32 %v4876_v19, %v4868_v10  ;;  %v4931_v2 = vrot.slane %v4927_v26, 4  ;;  %v4947_v31 = vmul.f32 %v4945_v58, %v10157_v5  ;;  %v4958_v24 = vmul.f32 %v4957_v63, %v10149_v36  ;;  %v9349_v10 = vld [vmem:[#allocation9 + $0x370] ss:$8 sps:$4 sm:$0xff]  }
 0x3a8   :  { %v4923_v32 = vadd.f32 %v4919_v27, %v4911_v59  ;;  %v4891_v33 = vadd.f32 %v4887_v13, %v4879_v20  ;;  %v4934_v34 = vadd.f32 %v4930_v37, %v4922_v28  ;;  %v4943_v35 = vmul.f32 %v4941_v57, %v10157_v5  ;;  %v9357_v59 = vld [vmem:[#allocation9 + $0x364] ss:$8 sps:$4 sm:$0xff]  }
 0x3a9   :  { %v4892_v25 = vadd.f32 %v4888_v21, %v4880_v3  ;;  %v4951_v38 = vrot.slane %v4947_v31, 2  ;;  %v4959_v16 = vmul.f32 %v4957_v63, %v10157_v5  ;;  %v4950_v49 = vrot.slane %v4946_v30, 2 }
 0x3aa   :  { %v4935_v45 = vadd.f32 %v4931_v2, %v4923_v32  ;;  %v4904_v23 = vadd.f32 %v10141_v54, %v4891_v33  ;;  %v4936_v46 = vadd.f32 %v4934_v34, %v10141_v54  ;;  %v4962_v18 = vrot.slane %v4958_v24, 4  ;;  %v9355_v32 = vld [vmem:[#allocation9 + $0x360] ss:$8 sps:$4 sm:$0xff]   ;;  %v9360_v33 = vld [vmem:[#allocation9 + $0x254] ss:$8 sps:$4 sm:$0xff]  }
 0x3ab   :  { %v4905_v22 = vadd.f32 %v10145_v55, %v4892_v25  ;;  %v4955_v50 = vadd.f32 %v4951_v38, %v4943_v35  ;;  %v4963_v51 = vrot.slane %v4959_v16, 4  ;;  %v4974_v57 = vmul.f32 %v4973_v0, %v10149_v36 }
 0x3ac   :  { %v4937_v29 = vadd.f32 %v4935_v45, %v10145_v55  ;;  %v4906_v52 = vmax.f32 %v4904_v23, 0.0  ;;  %v4938_v53 = vmax.f32 %v4936_v46, 0.0  ;;  %v4978_v63 = vmul.f32 %v4977_v41, %v10149_v36 }
 0x3ad   :  { %v4907_v58 = vmax.f32 %v4905_v22, 0.0  ;;  %v4967_v61 = vadd.f32 %v4963_v51, %v4955_v50  ;;  %v4979_v40 = vmul.f32 %v4977_v41, %v10157_v5  ;;  %v4975_v8 = vmul.f32 %v4973_v0, %v10157_v5  ;;  %v9354_v0 = vld [vmem:[#allocation9 + $0x264] ss:$8 sps:$4 sm:$0xff]   ;;  %v9358_v22 = vld [vmem:[#allocation9 + $0x250] ss:$8 sps:$4 sm:$0xff]  }
 0x3ae   :  { %v4939_v6 = vmax.f32 %v4937_v29, 0.0  ;;  %v5132_v48 = vpack.c.bf16 %v4906_v52, %v4906_v52  ;;  %v4990_v47 = vmul.f32 %v4989_v1, %v10149_v36  ;;  %v4982_v12 = vrot.slane %v4978_v63, 2  ;;  %v9361_v52 = vld [vmem:[#allocation9 + $0x350] ss:$8 sps:$4 sm:$0xff]  }
 0x3af   :  { %v5133_v9 = vpack.c.bf16 %v4907_v58, %v4907_v58  ;;  %v4969_v11 = vadd.f32 %v4967_v61, %v10145_v55  ;;  %v4983_v56 = vrot.slane %v4979_v40, 2  ;;  %v5134_v41 = vpack.c.bf16 %v4938_v53, %v4938_v53  ;;  %v9369_v61 = vld [vmem:[#allocation9 + $0x344] ss:$8 sps:$4 sm:$0xff]  }
 0x3b0   :  { %v5135_v7 = vpack.c.bf16 %v4939_v6, %v4939_v6  ;;  %v4991_v13 = vmul.f32 %v4989_v1, %v10157_v5  ;;  %v4954_v15 = vadd.f32 %v4950_v49, %v4942_v14  ;;  %v4994_v21 = vrot.slane %v4990_v47, 4  ;;  %v9352_v14 = vld [vmem:[#allocation9 + $0x260] ss:$8 sps:$4 sm:$0xff]  }
 0x3b1   :  { %6728 = vmatprep.mubr.bf16.mxu1 %v5133_v9  ;;  %v4971_v17 = vmax.f32 %v4969_v11, 0.0  ;;  %v4987_v19 = vadd.f32 %v4983_v56, %v4975_v8  ;;  %v4986_v26 = vadd.f32 %v4982_v12, %v4974_v57  ;;  %v5010_v20 = vmul.f32 %v5009_v4, %v10149_v36  ;;  %v9364_v11 = vld [vmem:[#allocation9 + $0x240] ss:$8 sps:$4 sm:$0xff]  }
 0x3b2   :  { %6769 = vmatprep.mubr.bf16.mxu0 %v5135_v7  ;;  %6729 = vmatmul.mubr.bf16.vlgmr.msra.gmra.mxu1 %v5132_v48  ;;  %v4995_v27 = vrot.slane %v4991_v13, 4  ;;  %v4966_v37 = vadd.f32 %v4962_v18, %v4954_v15  ;;  %v5037_v28 = vstv %s10180_s7  ;;  %v5011_v2 = vmul.f32 %v5009_v4, %v10157_v5  ;;  %v9363_v4 = vld [vmem:[#allocation9 + $0x354] ss:$8 sps:$4 sm:$0xff]  }
 0x3b3   :  { %6770 = vmatmul.mubr.bf16.vlgmr.msra.gmra.mxu0 %v5134_v41  ;;  %6779 = vmatpush1.bf16.msra.mxu1 %v9346_v60  ;;  %v5137_v1 = vpack.c.bf16 %v4971_v17, %v4971_v17  ;;  %v4998_v3 = vadd.f32 %v4994_v21, %v4986_v26  ;;  %v5041_v30 = vstv %s10183_s9  ;;  %v5007_v24 = vmul.f32 %v5005_v42, %v10157_v5  ;;  %v9367_v41 = vld [vmem:[#allocation9 + $0x340] ss:$8 sps:$4 sm:$0xff]   ;;  %v9372_v13 = vld [vmem:[#allocation9 + $0x234] ss:$8 sps:$4 sm:$0xff]  }
 0x3b4   :  { %6820 = vmatpush1.bf16.msra.mxu0 %v9349_v10  ;;  %v4999_v31 = vadd.f32 %v4995_v27, %v4987_v19  ;;  %6780 = vmatprep.subr.bf16.mxu1 %v9354_v0  ;;  %v10216_v34 = vadd.f32 %v4966_v37, %v10141_v54  ;;  %v5053_v25 = vstv %s10189_s3  ;;  %v5015_v38 = vrot.slane %v5011_v2, 2  ;;  %v9375_v19 = vld [vmem:[#allocation9 + $0x334] ss:$8 sps:$4 sm:$0xff]  }
 0x3b5   :  { %6810 = vmatprep.mubr.bf16.mxu1 %v5137_v1  ;;  %6821 = vmatprep.subr.bf16.mxu0 %v9357_v59  ;;  %v10223_v35 = vadd.f32 %v4998_v3, %v10141_v54  ;;  %v5022_v16 = vmul.f32 %v5021_v43, %v10149_v36  ;;  %v5023_v45 = vmul.f32 %v5021_v43, %v10157_v5  ;;  %v5014_v46 = vrot.slane %v5010_v20, 2 }
 0x3b6   :  { %v5001_v23 = vadd.f32 %v4999_v31, %v10145_v55  ;;  %v5073_v49 = vstv %s10199_s27  ;;  %v5006_v50 = vmul.f32 %v5005_v42, %v10149_v36  ;;  %v5019_v18 = vadd.f32 %v5015_v38, %v5007_v24  ;;  %v9366_v42 = vld [vmem:[#allocation9 + $0x244] ss:$8 sps:$4 sm:$0xff]  }
 0x3b7   :  { %6781 = vmatpush1.bf16.msra.mxu1 %v9352_v14  ;;  %v5027_v51 = vrot.slane %v5023_v45, 4  ;;  %v5042_v29 = vmul.f32 %v5041_v30, %v10149_v36  ;;  %v5038_v53 = vmul.f32 %v5037_v28, %v10149_v36  ;;  %v5043_v57 = vmul.f32 %v5041_v30, %v10157_v5  ;;  %v9370_v14 = vld [vmem:[#allocation9 + $0x230] ss:$8 sps:$4 sm:$0xff]  }
 0x3b8   :  { %v5003_v43 = vmax.f32 %v5001_v23, 0.0  ;;  %6822 = vmatpush1.bf16.msra.mxu0 %v9355_v32  ;;  %6782 = vmatprep.subr.bf16.mxu1 %v9360_v33  ;;  %v5054_v58 = vmul.f32 %v5053_v25, %v10149_v36  ;;  %v5026_v63 = vrot.slane %v5022_v16, 4  ;;  %v5055_v48 = vmul.f32 %v5053_v25, %v10157_v5  ;;  %v9373_v32 = vld [vmem:[#allocation9 + $0x330] ss:$8 sps:$4 sm:$0xff]   ;;  %v9378_v33 = vld [vmem:[#allocation9 + $0x224] ss:$8 sps:$4 sm:$0xff]  }
 0x3b9   :  { %6823 = vmatprep.subr.bf16.mxu0 %v9363_v4  ;;  %v5031_v40 = vadd.f32 %v5027_v51, %v5019_v18  ;;  %v5046_v6 = vrot.slane %v5042_v29, 2  ;;  %v5039_v47 = vmul.f32 %v5037_v28, %v10157_v5  ;;  %v5047_v9 = vrot.slane %v5043_v57, 2  ;;  %v9381_v16 = vld [vmem:[#allocation9 + $0x324] ss:$8 sps:$4 sm:$0xff]   ;;  %v9376_v18 = vld [vmem:[#allocation9 + $0x220] ss:$8 sps:$4 sm:$0xff]  }
 0x3ba   :  { %v5139_v8 = vpack.c.bf16 %v5003_v43, %v5003_v43  ;;  %v5018_v60 = vadd.f32 %v5014_v46, %v5006_v50  ;;  %v5058_v56 = vrot.slane %v5054_v58, 4  ;;  %v5085_v10 = vstv %s10213_s28  ;;  %v9384_v57 = vld [vmem:[#allocation9 + $0x214] ss:$8 sps:$4 sm:$0xff]   ;;  %s9809_s28 = smov [#allocation15]  }
 0x3bb   :  { %6783 = vmatpush1.bf16.msra.mxu1 %v9358_v22  ;;  %v10251_v12 = vadd.f32 %v5031_v40, %v10145_v55  ;;  %v5050_v7 = vadd.f32 %v5046_v6, %v5038_v53  ;;  %v5051_v0 = vadd.f32 %v5047_v9, %v5039_v47  ;;  %v5059_v15 = vrot.slane %v5055_v48, 4  ;;  %v9379_v53 = vld [vmem:[#allocation9 + $0x320] ss:$8 sps:$4 sm:$0xff]   ;;  %v9387_v40 = vld [vmem:[#allocation9 + $0x314] ss:$8 sps:$4 sm:$0xff]  }
 0x3bc   :  { %6851 = vmatprep.mubr.bf16.mxu0 %v5139_v8  ;;  %6824 = vmatpush1.bf16.msra.mxu0 %v9361_v52  ;;  %v5030_v17 = vadd.f32 %v5026_v63, %v5018_v60  ;;  %v5069_v59 = vstv %s10231_s29  ;;  %v5074_v26 = vmul.f32 %v5073_v49, %v10149_v36  ;;  %v5075_v27 = vmul.f32 %v5073_v49, %v10157_v5  ;;  %v9382_v60 = vld [vmem:[#allocation9 + $0x210] ss:$8 sps:$4 sm:$0xff]   ;;  %s7234_s29 = sshll.u32 %s9809_s28, 4  ;;  %s7235_s29 = int_to_ptr.vmem [resolvable:$true] %s7234_s29 }
 0x3bd   :  { %6784 = vmatprep.subr.bf16.mxu1 %v9366_v42  ;;  %6825 = vmatprep.subr.bf16.mxu0 %v9369_v61  ;;  %v5062_v21 = vadd.f32 %v5058_v56, %v5050_v7  ;;  %v5063_v37 = vadd.f32 %v5059_v15, %v5051_v0  ;;  %v5086_v28 = vmul.f32 %v5085_v10, %v10149_v36  ;;  %v5105_v31 = vstv %s10241_s5  ;;  %v9390_v56 = vld [vmem:[#allocation9 + $0x204] ss:$8 sps:$4 sm:$0xff]   ;;  %v9388_v15 = vld [vmem:[#allocation9 + $0x200] ss:$8 sps:$4 sm:$0xff]   ;;  %p9771_p8 = scmp.lt.s32.totalorder %s7235_s29, %s7235_s29 }
 0x3be   :  { %v10258_v20 = vadd.f32 %v5030_v17, %v10141_v54  ;;  %v5087_v1 = vmul.f32 %v5085_v10, %v10157_v5  ;;  %v5071_v2 = vmul.f32 %v5069_v59, %v10157_v5  ;;  %v5079_v30 = vrot.slane %v5075_v27, 2  ;;  %v9391_v17 = vld [vmem:[#allocation9 + $0x300] ss:$8 sps:$4 sm:$0xff]   ;;  %v9402_v27 = vld [vmem:[#allocation9 + $0x2e4] ss:$8 sps:$4 sm:$0xff]  }
 0x3bf   :  { %6785 = vmatpush1.bf16.msra.mxu1 %v9364_v11  ;;  %v10263_v3 = vadd.f32 %v5062_v21, %v10141_v54  ;;  %v10268_v24 = vadd.f32 %v5063_v37, %v10145_v55  ;;  %v5078_v25 = vrot.slane %v5074_v26, 2  ;;  %v5101_v4 = vstv %s10235_s0  ;;  %v9385_v11 = vld [vmem:[#allocation9 + $0x310] ss:$8 sps:$4 sm:$0xff]   ;;  %v9399_v21 = vld [vmem:[#allocation9 + $0x3f4] ss:$8 sps:$4 sm:$0xff]  }
 0x3c0   :  { %6826 = vmatpush1.bf16.msra.mxu0 %v9367_v41  ;;  %6786 = vmatprep.subr.bf16.mxu1 %v9372_v13  ;;  %v5117_v38 = vstv %s10246_s30  ;;  %v5083_v45 = vadd.f32 %v5079_v30, %v5071_v2  ;;  %v5091_v23 = vrot.slane %v5087_v1, 4  ;;  %v5070_v46 = vmul.f32 %v5069_v59, %v10149_v36  ;;  %v9393_v41 = vld [vmem:[#allocation9 + $0x304] ss:$8 sps:$4 sm:$0xff]   ;;  %v9394_v59 = vld [vmem:[#allocation9 + $0x2f0] ss:$8 sps:$4 sm:$0xff]  }
 0x3c1   :  { %6827 = vmatprep.subr.bf16.mxu0 %v9375_v19  ;;  %v5090_v49 = vrot.slane %v5086_v28, 4  ;;  %v5106_v22 = vmul.f32 %v5105_v31, %v10149_v36  ;;  %v5107_v50 = vmul.f32 %v5105_v31, %v10157_v5  ;;  %v5102_v29 = vmul.f32 %v5101_v4, %v10149_v36  ;;  %v9396_v19 = vld [vmem:[#allocation9 + $0x2f4] ss:$8 sps:$4 sm:$0xff]   ;;  %v9397_v26 = vld [vmem:[#allocation9 + $0x3f0] ss:$8 sps:$4 sm:$0xff]  }
 0x3c2   :  { %v5095_v51 = vadd.f32 %v5091_v23, %v5083_v45  ;;  %v5118_v43 = vmul.f32 %v5117_v38, %v10149_v36  ;;  %v5119_v52 = vmul.f32 %v5117_v38, %v10157_v5  ;;  %v5103_v58 = vmul.f32 %v5101_v4, %v10157_v5  ;;  %v9400_v37 = vld [vmem:[#allocation9 + $0x2e0] ss:$8 sps:$4 sm:$0xff]   ;;  %v9408_v28 = vld [vmem:[#allocation9 + $0x2d4] ss:$8 sps:$4 sm:$0xff]   ;;  %v9409_v2 = vld [vmem:[#allocation9 + $0x3d0] ss:$8 sps:$4 sm:$0xff]  }
 0x3c3   :  { %6787 = vmatpush1.bf16.msra.mxu1 %v9370_v14  ;;  %v5110_v42 = vrot.slane %v5106_v22, 2  ;;  %v5111_v61 = vrot.slane %v5107_v50, 2  ;;  %v5082_v63 = vadd.f32 %v5078_v25, %v5070_v46  ;;  %v9411_v1 = vld [vmem:[#allocation9 + $0x3d4] ss:$8 sps:$4 sm:$0xff]   ;;  %v9406_v14 = vld [vmem:[#allocation9 + $0x2d0] ss:$8 sps:$4 sm:$0xff]  }
 0x3c4   :  { %6828 = vmatpush1.bf16.msra.mxu0 %v9373_v32  ;;  %6788 = vmatprep.subr.bf16.mxu1 %v9378_v33  ;;  %v10280_v6 = vadd.f32 %v5095_v51, %v10145_v55  ;;  %v5122_v48 = vrot.slane %v5118_v43, 4  ;;  %v5123_v47 = vrot.slane %v5119_v52, 4  ;;  %v9414_v30 = vld [vmem:[#allocation9 + $0x2c4] ss:$8 sps:$4 sm:$0xff]   ;;  %v9412_v32 = vld [vmem:[#allocation9 + $0x2c0] ss:$8 sps:$4 sm:$0xff]  }
 0x3c5   :  { %6829 = vmatprep.subr.bf16.mxu0 %v9381_v16  ;;  %v5115_v8 = vadd.f32 %v5111_v61, %v5103_v58  ;;  %v5094_v36 = vadd.f32 %v5090_v49, %v5082_v63  ;;  %v5114_v9 = vadd.f32 %v5110_v42, %v5102_v29  ;;  %v9417_v31 = vld [vmem:[#allocation9 + $0x3c4] ss:$8 sps:$4 sm:$0xff]   ;;  %v9415_v33 = vld [vmem:[#allocation9 + $0x3c0] ss:$8 sps:$4 sm:$0xff]   ;;  %v9420_v25 = vld [vmem:[#allocation9 + $0x2b4] ss:$8 sps:$4 sm:$0xff]  }
 0x3c6   :  { %v9423_v4 = vld [vmem:[#allocation9 + $0x3b4] ss:$8 sps:$4 sm:$0xff]   ;;  %v9418_v38 = vld [vmem:[#allocation9 + $0x2b0] ss:$8 sps:$4 sm:$0xff]   ;;  %v9426_v45 = vld [vmem:[#allocation9 + $0x2a4] ss:$8 sps:$4 sm:$0xff]  }
 0x3c7   :  { %6789 = vmatpush1.bf16.msra.mxu1 %v9376_v18  ;;  %v5127_v5 = vadd.f32 %v5123_v47, %v5115_v8  ;;  %v10283_v7 = vadd.f32 %v5094_v36, %v10141_v54  ;;  %v5126_v10 = vadd.f32 %v5122_v48, %v5114_v9  ;;  %v9421_v16 = vld [vmem:[#allocation9 + $0x3b0] ss:$8 sps:$4 sm:$0xff]   ;;  %v9429_v23 = vld [vmem:[#allocation9 + $0x3a4] ss:$8 sps:$4 sm:$0xff]   ;;  %v9424_v46 = vld [vmem:[#allocation9 + $0x2a0] ss:$8 sps:$4 sm:$0xff]  }
 0x3c8   :  { %6830 = vmatpush1.bf16.msra.mxu0 %v9379_v53  ;;  %6790 = vmatprep.subr.bf16.mxu1 %v9384_v57  ;;  %v9427_v49 = vld [vmem:[#allocation9 + $0x3a0] ss:$8 sps:$4 sm:$0xff]   ;;  %v9432_v22 = vld [vmem:[#allocation9 + $0x294] ss:$8 sps:$4 sm:$0xff]   ;;  %v9430_v18 = vld [vmem:[#allocation9 + $0x290] ss:$8 sps:$4 sm:$0xff]  }
 0x3c9   :  { %6831 = vmatprep.subr.bf16.mxu0 %v9387_v40  ;;  %v10286_v13 = vadd.f32 %v5127_v5, %v10145_v55  ;;  %v10289_v0 = vadd.f32 %v5126_v10, %v10141_v54  ;;  %v9405_v55 = vld [vmem:[#allocation9 + $0x3e4] ss:$8 sps:$4 sm:$0xff]   ;;  %v9403_v54 = vld [vmem:[#allocation9 + $0x3e0] ss:$8 sps:$4 sm:$0xff]   ;;  %v9435_v50 = vld [vmem:[#allocation9 + $0x394] ss:$8 sps:$4 sm:$0xff]  }
 0x3ca   :  { %v9433_v51 = vld [vmem:[#allocation9 + $0x390] ss:$8 sps:$4 sm:$0xff]   ;;  %v9438_v29 = vld [vmem:[#allocation9 + $0x284] ss:$8 sps:$4 sm:$0xff]   ;;  %v9436_v52 = vld [vmem:[#allocation9 + $0x280] ss:$8 sps:$4 sm:$0xff]  }
 0x3cb   :  { %6791 = vmatpush1.bf16.msra.mxu1 %v9382_v60  ;;  %v9441_v43 = vld [vmem:[#allocation9 + $0x384] ss:$8 sps:$4 sm:$0xff]   ;;  %v9439_v53 = vld [vmem:[#allocation9 + $0x380] ss:$8 sps:$4 sm:$0xff]   ;;  %v4970_v57 = vmax.f32 %v10216_v34, 0.0  ;;  %v5002_v42 = vmax.f32 %v10223_v35, 0.0 }
 0x3cc   :  { %6832 = vmatpush1.bf16.msra.mxu0 %v9385_v11  ;;  %6792 = vmatprep.subr.bf16.mxu1 %v9390_v56  ;;  %v9444_v58 = vld [vmem:[#allocation9 + $0x474] ss:$8 sps:$4 sm:$0xff]   ;;  %v5035_v63 = vmax.f32 %v10251_v12, 0.0  ;;  %v9442_v40 = vld [vmem:[#allocation9 + $0x470] ss:$8 sps:$4 sm:$0xff]   ;;  %v5067_v48 = vmax.f32 %v10268_v24, 0.0 }
 0x3cd   :  { %6833 = vmatprep.subr.bf16.mxu0 %v9393_v41  ;;  %v9447_v61 = vld [vmem:[#allocation9 + $0x574] ss:$8 sps:$4 sm:$0xff]   ;;  %v5136_v8 = vpack.c.bf16 %v4970_v57, %v4970_v57  ;;  %v9445_v47 = vld [vmem:[#allocation9 + $0x570] ss:$8 sps:$4 sm:$0xff]   ;;  %v5138_v36 = vpack.c.bf16 %v5002_v42, %v5002_v42  ;;  %v9450_v9 = vld [vmem:[#allocation9 + $0x464] ss:$8 sps:$4 sm:$0xff]  }
 0x3ce   :  { %v5141_v34 = vpack.c.bf16 %v5035_v63, %v5035_v63  ;;  %v9453_v60 = vld [vmem:[#allocation9 + $0x564] ss:$8 sps:$4 sm:$0xff]   ;;  %v5143_v35 = vpack.c.bf16 %v5067_v48, %v5067_v48  ;;  %v9448_v11 = vld [vmem:[#allocation9 + $0x460] ss:$8 sps:$4 sm:$0xff]   ;;  %v9456_v56 = vld [vmem:[#allocation9 + $0x454] ss:$8 sps:$4 sm:$0xff]  }
 0x3cf   :  { %6793 = vmatpush1.bf16.msra.mxu1 %v9388_v15  ;;  %v9451_v12 = vld [vmem:[#allocation9 + $0x560] ss:$8 sps:$4 sm:$0xff]   ;;  %v9459_v24 = vld [vmem:[#allocation9 + $0x554] ss:$8 sps:$4 sm:$0xff]   ;;  %v9454_v5 = vld [vmem:[#allocation9 + $0x450] ss:$8 sps:$4 sm:$0xff]  }
 0x3d0   :  { %6834 = vmatpush1.bf16.msra.mxu0 %v9391_v17  ;;  %6794 = vmatprep.subr.bf16.mxu1 %v9396_v19  ;;  %v9457_v10 = vld [vmem:[#allocation9 + $0x550] ss:$8 sps:$4 sm:$0xff]   ;;  %v9462_v41 = vld [vmem:[#allocation9 + $0x444] ss:$8 sps:$4 sm:$0xff]   ;;  %v9460_v17 = vld [vmem:[#allocation9 + $0x440] ss:$8 sps:$4 sm:$0xff]  }
 0x3d1   :  { %6835 = vmatprep.subr.bf16.mxu0 %v9399_v21  ;;  %v9465_v15 = vld [vmem:[#allocation9 + $0x544] ss:$8 sps:$4 sm:$0xff]   ;;  %v9463_v19 = vld [vmem:[#allocation9 + $0x540] ss:$8 sps:$4 sm:$0xff]   ;;  %v9468_v21 = vld [vmem:[#allocation9 + $0x434] ss:$8 sps:$4 sm:$0xff]  }
 0x3d2   :  { %v9511_v57 = vld [vmem:[#allocation9 + $0x5c0] ss:$8 sps:$4 sm:$0xff]   ;;  %v9519_v42 = vld [vmem:[#allocation9 + $0x5b4] ss:$8 sps:$4 sm:$0xff]   ;;  %v9517_v63 = vld [vmem:[#allocation9 + $0x5b0] ss:$8 sps:$4 sm:$0xff]  }
 0x3d3   :  { %6795 = vmatpush2.bf16.msra.mxu1 %v9394_v59  ;;  %v9471_v59 = vld [vmem:[#allocation9 + $0x534] ss:$8 sps:$4 sm:$0xff]   ;;  %v9525_v48 = vld [vmem:[#allocation9 + $0x5a4] ss:$8 sps:$4 sm:$0xff]  }
 0x3d4   :  { %6836 = vmatpush2.bf16.msra.mxu0 %v9397_v26  ;;  %6796 = vmatprep.subr.bf16.mxu1 %v9402_v27  ;;  %v9466_v26 = vld [vmem:[#allocation9 + $0x430] ss:$8 sps:$4 sm:$0xff]  }
 0x3d5   :  { %6837 = vmatprep.subr.bf16.mxu0 %v9405_v55  ;;  %v9469_v27 = vld [vmem:[#allocation9 + $0x530] ss:$8 sps:$4 sm:$0xff]   ;;  %v9474_v55 = vld [vmem:[#allocation9 + $0x424] ss:$8 sps:$4 sm:$0xff]  }
 0x3d7   :  { %6797 = vmatpush2.bf16.msra.mxu1 %v9400_v37  ;;  %v9477_v37 = vld [vmem:[#allocation9 + $0x524] ss:$8 sps:$4 sm:$0xff]  }
 0x3d8   :  { %6838 = vmatpush2.bf16.msra.mxu0 %v9403_v54  ;;  %6798 = vmatprep.subr.bf16.mxu1 %v9408_v28  ;;  %v9472_v54 = vld [vmem:[#allocation9 + $0x420] ss:$8 sps:$4 sm:$0xff]  }
 0x3d9   :  { %6839 = vmatprep.subr.bf16.mxu0 %v9411_v1  ;;  %v9475_v28 = vld [vmem:[#allocation9 + $0x520] ss:$8 sps:$4 sm:$0xff]   ;;  %v9480_v1 = vld [vmem:[#allocation9 + $0x414] ss:$8 sps:$4 sm:$0xff]  }
 0x3db   :  { %6799 = vmatpush2.bf16.msra.mxu1 %v9406_v14  ;;  %v9483_v14 = vld [vmem:[#allocation9 + $0x514] ss:$8 sps:$4 sm:$0xff]  }
 0x3dc   :  { %6840 = vmatpush2.bf16.msra.mxu0 %v9409_v2  ;;  %6800 = vmatprep.subr.bf16.mxu1 %v9414_v30  ;;  %v9478_v2 = vld [vmem:[#allocation9 + $0x410] ss:$8 sps:$4 sm:$0xff]  }
 0x3dd   :  { %6841 = vmatprep.subr.bf16.mxu0 %v9417_v31  ;;  %v9481_v30 = vld [vmem:[#allocation9 + $0x510] ss:$8 sps:$4 sm:$0xff]   ;;  %v9486_v31 = vld [vmem:[#allocation9 + $0x404] ss:$8 sps:$4 sm:$0xff]  }
 0x3df   :  { %6801 = vmatpush2.bf16.msra.mxu1 %v9412_v32  ;;  %v9489_v32 = vld [vmem:[#allocation9 + $0x504] ss:$8 sps:$4 sm:$0xff]  }
 0x3e0   :  { %6842 = vmatpush2.bf16.msra.mxu0 %v9415_v33  ;;  %6802 = vmatprep.subr.bf16.mxu1 %v9420_v25  ;;  %v9484_v33 = vld [vmem:[#allocation9 + $0x400] ss:$8 sps:$4 sm:$0xff]  }
 0x3e1   :  { %6843 = vmatprep.subr.bf16.mxu0 %v9423_v4  ;;  %v9487_v25 = vld [vmem:[#allocation9 + $0x500] ss:$8 sps:$4 sm:$0xff]   ;;  %v9492_v4 = vld [vmem:[#allocation9 + $0x4f4] ss:$8 sps:$4 sm:$0xff]  }
 0x3e3   :  { %6803 = vmatpush2.bf16.msra.mxu1 %v9418_v38  ;;  %v9495_v38 = vld [vmem:[#allocation9 + $0x5f4] ss:$8 sps:$4 sm:$0xff]  }
 0x3e4   :  { %6844 = vmatpush2.bf16.msra.mxu0 %v9421_v16  ;;  %6804 = vmatprep.subr.bf16.mxu1 %v9426_v45  ;;  %v9490_v16 = vld [vmem:[#allocation9 + $0x4f0] ss:$8 sps:$4 sm:$0xff]  }
 0x3e5   :  { %6845 = vmatprep.subr.bf16.mxu0 %v9429_v23  ;;  %v9493_v45 = vld [vmem:[#allocation9 + $0x5f0] ss:$8 sps:$4 sm:$0xff]   ;;  %v9498_v23 = vld [vmem:[#allocation9 + $0x4e4] ss:$8 sps:$4 sm:$0xff]  }
 0x3e7   :  { %6805 = vmatpush2.bf16.msra.mxu1 %v9424_v46  ;;  %v9501_v46 = vld [vmem:[#allocation9 + $0x5e4] ss:$8 sps:$4 sm:$0xff]  }
 0x3e8   :  { %6846 = vmatpush2.bf16.msra.mxu0 %v9427_v49  ;;  %6806 = vmatprep.subr.bf16.mxu1 %v9432_v22  ;;  %v9496_v49 = vld [vmem:[#allocation9 + $0x4e0] ss:$8 sps:$4 sm:$0xff]  }
 0x3e9   :  { %6847 = vmatprep.subr.bf16.mxu0 %v9435_v50  ;;  %v9499_v22 = vld [vmem:[#allocation9 + $0x5e0] ss:$8 sps:$4 sm:$0xff]   ;;  %v9504_v50 = vld [vmem:[#allocation9 + $0x4d4] ss:$8 sps:$4 sm:$0xff]  }
 0x3eb   :  { %6807 = vmatpush2.bf16.msra.mxu1 %v9430_v18  ;;  %v9507_v18 = vld [vmem:[#allocation9 + $0x5d4] ss:$8 sps:$4 sm:$0xff]  }
 0x3ec   :  { %6848 = vmatpush2.bf16.msra.mxu0 %v9433_v51  ;;  %6808 = vmatprep.subr.bf16.mxu1 %v9438_v29  ;;  %v9502_v51 = vld [vmem:[#allocation9 + $0x4d0] ss:$8 sps:$4 sm:$0xff]  }
 0x3ed   :  { %6849 = vmatprep.subr.bf16.mxu0 %v9441_v43  ;;  %v9505_v29 = vld [vmem:[#allocation9 + $0x5d0] ss:$8 sps:$4 sm:$0xff]   ;;  %v9510_v43 = vld [vmem:[#allocation9 + $0x4c4] ss:$8 sps:$4 sm:$0xff]  }
 0x3ef   :  { %6809 = vmatpush2.bf16.msra.mxu1 %v9436_v52  ;;  %v9513_v52 = vld [vmem:[#allocation9 + $0x5c4] ss:$8 sps:$4 sm:$0xff]  }
 0x3f0   :  { %6850 = vmatpush2.bf16.msra.mxu0 %v9439_v53  ;;  %6860 = vmatprep.subr.bf16.mxu1 %v9444_v58  ;;  %v9508_v53 = vld [vmem:[#allocation9 + $0x4c0] ss:$8 sps:$4 sm:$0xff]   ;;  %v9516_v58 = vld [vmem:[#allocation9 + $0x4b4] ss:$8 sps:$4 sm:$0xff]  }
 0x3f1   :  { %6901 = vmatprep.subr.bf16.mxu0 %v9447_v61  ;;  %v9514_v61 = vld [vmem:[#allocation9 + $0x4b0] ss:$8 sps:$4 sm:$0xff]  }
 0x3f2   :  { %6811 = vmatmul.mubr.bf16.vlgmr.msra.gmra.mxu1 %v5136_v8  ;;  %v9520_v8 = vld [vmem:[#allocation9 + $0x4a0] ss:$8 sps:$4 sm:$0xff]  }
 0x3f3   :  { %6852 = vmatmul.mubr.bf16.vlgmr.msra.gmra.mxu0 %v5138_v36  ;;  %6861 = vmatpush1.bf16.msra.mxu1 %v9442_v40  ;;  %v9522_v40 = vld [vmem:[#allocation9 + $0x4a4] ss:$8 sps:$4 sm:$0xff]   ;;  %v9528_v36 = vld [vmem:[#allocation9 + $0x494] ss:$8 sps:$4 sm:$0xff]  }
 0x3f4   :  { %6892 = vmatprep.mubr.bf16.mxu1 %v5141_v34  ;;  %6902 = vmatpush1.bf16.msra.mxu0 %v9445_v47  ;;  %v9523_v47 = vld [vmem:[#allocation9 + $0x5a0] ss:$8 sps:$4 sm:$0xff]   ;;  %v9526_v34 = vld [vmem:[#allocation9 + $0x490] ss:$8 sps:$4 sm:$0xff]  }
 0x3f5   :  { %6933 = vmatprep.mubr.bf16.mxu0 %v5143_v35  ;;  %6862 = vmatprep.subr.bf16.mxu1 %v9450_v9  ;;  %v9531_v9 = vld [vmem:[#allocation9 + $0x594] ss:$8 sps:$4 sm:$0xff]   ;;  %v9534_v35 = vld [vmem:[#allocation9 + $0x484] ss:$8 sps:$4 sm:$0xff]  }
 0x3f6   :  { %6903 = vmatprep.subr.bf16.mxu0 %v9453_v60  ;;  %v9529_v60 = vld [vmem:[#allocation9 + $0x590] ss:$8 sps:$4 sm:$0xff]  }
 0x3f7   :  { %6863 = vmatpush1.bf16.msra.mxu1 %v9448_v11  ;;  %v9537_v11 = vld [vmem:[#allocation9 + $0x584] ss:$8 sps:$4 sm:$0xff]  }
 0x3f8   :  { %6904 = vmatpush1.bf16.msra.mxu0 %v9451_v12  ;;  %6864 = vmatprep.subr.bf16.mxu1 %v9456_v56  ;;  %v9532_v12 = vld [vmem:[#allocation9 + $0x480] ss:$8 sps:$4 sm:$0xff]  }
 0x3f9   :  { %6905 = vmatprep.subr.bf16.mxu0 %v9459_v24  ;;  %v9535_v56 = vld [vmem:[#allocation9 + $0x580] ss:$8 sps:$4 sm:$0xff]   ;;  %v5034_v24 = vmax.f32 %v10258_v20, 0.0 }
 0x3fb   :  { %6865 = vmatpush1.bf16.msra.mxu1 %v9454_v5  ;;  %v9540_v5 = vld [vmem:[#allocation9 + $0x674] ss:$8 sps:$4 sm:$0xff]  }
 0x3fc   :  { %6906 = vmatpush1.bf16.msra.mxu0 %v9457_v10  ;;  %6866 = vmatprep.subr.bf16.mxu1 %v9462_v41  ;;  %v5066_v10 = vmax.f32 %v10263_v3, 0.0  ;;  %v9543_v41 = vld [vmem:[#allocation9 + $0x774] ss:$8 sps:$4 sm:$0xff]  }
 0x3fd   :  { %6907 = vmatprep.subr.bf16.mxu0 %v9465_v15  ;;  %v5099_v15 = vmax.f32 %v10280_v6, 0.0  ;;  %v9547_v6 = vld [vmem:[#allocation9 + $0x760] ss:$8 sps:$4 sm:$0xff]  }
 0x3ff   :  { %6867 = vmatpush1.bf16.msra.mxu1 %v9460_v17  ;;  %v9538_v17 = vld [vmem:[#allocation9 + $0x670] ss:$8 sps:$4 sm:$0xff]   ;;  %v5145_v20 = vpack.c.bf16 %v5099_v15, %v5099_v15  ;;  %v9619_v15 = vld [vmem:[#allocation9 + $0x7a0] ss:$8 sps:$4 sm:$0xff]  }
 0x400   :  { %6908 = vmatpush1.bf16.msra.mxu0 %v9463_v19  ;;  %6868 = vmatprep.subr.bf16.mxu1 %v9468_v21  ;;  %v5131_v19 = vmax.f32 %v10286_v13, 0.0  ;;  %v5140_v21 = vpack.c.bf16 %v5034_v24, %v5034_v24  ;;  %v9555_v13 = vld [vmem:[#allocation9 + $0x754] ss:$8 sps:$4 sm:$0xff]   ;;  %v9613_v24 = vld [vmem:[#allocation9 + $0x7b0] ss:$8 sps:$4 sm:$0xff]  }
 0x401   :  { %6909 = vmatprep.subr.bf16.mxu0 %v9471_v59  ;;  %v9541_v59 = vld [vmem:[#allocation9 + $0x770] ss:$8 sps:$4 sm:$0xff]  }
 0x402   :  { %v5147_v3 = vpack.c.bf16 %v5131_v19, %v5131_v19  ;;  %v9627_v19 = vld [vmem:[#allocation9 + $0x794] ss:$8 sps:$4 sm:$0xff]  }
 0x403   :  { %6869 = vmatpush1.bf16.msra.mxu1 %v9466_v26  ;;  %v5142_v26 = vpack.c.bf16 %v5066_v10, %v5066_v10  ;;  %v9621_v10 = vld [vmem:[#allocation9 + $0x7a4] ss:$8 sps:$4 sm:$0xff]  }
 0x404   :  { %6910 = vmatpush1.bf16.msra.mxu0 %v9469_v27  ;;  %6870 = vmatprep.subr.bf16.mxu1 %v9474_v55  ;;  %v9546_v27 = vld [vmem:[#allocation9 + $0x664] ss:$8 sps:$4 sm:$0xff]  }
 0x405   :  { %6911 = vmatprep.subr.bf16.mxu0 %v9477_v37  ;;  %v9549_v55 = vld [vmem:[#allocation9 + $0x764] ss:$8 sps:$4 sm:$0xff]   ;;  %v9544_v37 = vld [vmem:[#allocation9 + $0x660] ss:$8 sps:$4 sm:$0xff]  }
 0x407   :  { %6871 = vmatpush1.bf16.msra.mxu1 %v9472_v54  ;;  %v9552_v54 = vld [vmem:[#allocation9 + $0x654] ss:$8 sps:$4 sm:$0xff]  }
 0x408   :  { %6912 = vmatpush1.bf16.msra.mxu0 %v9475_v28  ;;  %6872 = vmatprep.subr.bf16.mxu1 %v9480_v1  ;;  %v9550_v28 = vld [vmem:[#allocation9 + $0x650] ss:$8 sps:$4 sm:$0xff]  }
 0x409   :  { %6913 = vmatprep.subr.bf16.mxu0 %v9483_v14  ;;  %v9553_v1 = vld [vmem:[#allocation9 + $0x750] ss:$8 sps:$4 sm:$0xff]   ;;  %v9558_v14 = vld [vmem:[#allocation9 + $0x644] ss:$8 sps:$4 sm:$0xff]  }
 0x40b   :  { %6873 = vmatpush1.bf16.msra.mxu1 %v9478_v2  ;;  %v9561_v2 = vld [vmem:[#allocation9 + $0x744] ss:$8 sps:$4 sm:$0xff]  }
 0x40c   :  { %6914 = vmatpush1.bf16.msra.mxu0 %v9481_v30  ;;  %6874 = vmatprep.subr.bf16.mxu1 %v9486_v31  ;;  %v9556_v30 = vld [vmem:[#allocation9 + $0x640] ss:$8 sps:$4 sm:$0xff]  }
 0x40d   :  { %6915 = vmatprep.subr.bf16.mxu0 %v9489_v32  ;;  %v9559_v31 = vld [vmem:[#allocation9 + $0x740] ss:$8 sps:$4 sm:$0xff]   ;;  %v9564_v32 = vld [vmem:[#allocation9 + $0x634] ss:$8 sps:$4 sm:$0xff]  }
 0x40f   :  { %6875 = vmatpush1.bf16.msra.mxu1 %v9484_v33  ;;  %v9567_v33 = vld [vmem:[#allocation9 + $0x734] ss:$8 sps:$4 sm:$0xff]  }
 0x410   :  { %6916 = vmatpush1.bf16.msra.mxu0 %v9487_v25  ;;  %6876 = vmatprep.subr.bf16.mxu1 %v9492_v4  ;;  %v9562_v25 = vld [vmem:[#allocation9 + $0x630] ss:$8 sps:$4 sm:$0xff]  }
 0x411   :  { %6917 = vmatprep.subr.bf16.mxu0 %v9495_v38  ;;  %v9565_v4 = vld [vmem:[#allocation9 + $0x730] ss:$8 sps:$4 sm:$0xff]   ;;  %v9570_v38 = vld [vmem:[#allocation9 + $0x624] ss:$8 sps:$4 sm:$0xff]  }
 0x413   :  { %6877 = vmatpush2.bf16.msra.mxu1 %v9490_v16  ;;  %v9573_v16 = vld [vmem:[#allocation9 + $0x724] ss:$8 sps:$4 sm:$0xff]  }
 0x414   :  { %6918 = vmatpush2.bf16.msra.mxu0 %v9493_v45  ;;  %6878 = vmatprep.subr.bf16.mxu1 %v9498_v23  ;;  %v9568_v45 = vld [vmem:[#allocation9 + $0x620] ss:$8 sps:$4 sm:$0xff]  }
 0x415   :  { %6919 = vmatprep.subr.bf16.mxu0 %v9501_v46  ;;  %v9571_v23 = vld [vmem:[#allocation9 + $0x720] ss:$8 sps:$4 sm:$0xff]   ;;  %v9576_v46 = vld [vmem:[#allocation9 + $0x614] ss:$8 sps:$4 sm:$0xff]  }
 0x417   :  { %6879 = vmatpush2.bf16.msra.mxu1 %v9496_v49  ;;  %v9579_v49 = vld [vmem:[#allocation9 + $0x714] ss:$8 sps:$4 sm:$0xff]  }
 0x418   :  { %6920 = vmatpush2.bf16.msra.mxu0 %v9499_v22  ;;  %6880 = vmatprep.subr.bf16.mxu1 %v9504_v50  ;;  %v9574_v22 = vld [vmem:[#allocation9 + $0x610] ss:$8 sps:$4 sm:$0xff]  }
 0x419   :  { %6921 = vmatprep.subr.bf16.mxu0 %v9507_v18  ;;  %v9577_v50 = vld [vmem:[#allocation9 + $0x710] ss:$8 sps:$4 sm:$0xff]   ;;  %v9582_v18 = vld [vmem:[#allocation9 + $0x604] ss:$8 sps:$4 sm:$0xff]  }
 0x41b   :  { %6881 = vmatpush2.bf16.msra.mxu1 %v9502_v51  ;;  %v9585_v51 = vld [vmem:[#allocation9 + $0x704] ss:$8 sps:$4 sm:$0xff]  }
 0x41c   :  { %6922 = vmatpush2.bf16.msra.mxu0 %v9505_v29  ;;  %6882 = vmatprep.subr.bf16.mxu1 %v9510_v43  ;;  %v9580_v29 = vld [vmem:[#allocation9 + $0x600] ss:$8 sps:$4 sm:$0xff]  }
 0x41d   :  { %6923 = vmatprep.subr.bf16.mxu0 %v9513_v52  ;;  %v9583_v43 = vld [vmem:[#allocation9 + $0x700] ss:$8 sps:$4 sm:$0xff]   ;;  %v9588_v52 = vld [vmem:[#allocation9 + $0x6f4] ss:$8 sps:$4 sm:$0xff]  }
 0x41f   :  { %6883 = vmatpush2.bf16.msra.mxu1 %v9508_v53  ;;  %v9591_v53 = vld [vmem:[#allocation9 + $0x7f4] ss:$8 sps:$4 sm:$0xff]  }
 0x420   :  { %6924 = vmatpush2.bf16.msra.mxu0 %v9511_v57  ;;  %6884 = vmatprep.subr.bf16.mxu1 %v9516_v58  ;;  %v9586_v57 = vld [vmem:[#allocation9 + $0x6f0] ss:$8 sps:$4 sm:$0xff]  }
 0x421   :  { %6925 = vmatprep.subr.bf16.mxu0 %v9519_v42  ;;  %v9589_v58 = vld [vmem:[#allocation9 + $0x7f0] ss:$8 sps:$4 sm:$0xff]   ;;  %v9594_v42 = vld [vmem:[#allocation9 + $0x6e4] ss:$8 sps:$4 sm:$0xff]  }
 0x423   :  { %6885 = vmatpush2.bf16.msra.mxu1 %v9514_v61  ;;  %v9597_v61 = vld [vmem:[#allocation9 + $0x7e4] ss:$8 sps:$4 sm:$0xff]  }
 0x424   :  { %6926 = vmatpush2.bf16.msra.mxu0 %v9517_v63  ;;  %6886 = vmatprep.subr.bf16.mxu1 %v9522_v40  ;;  %v9592_v63 = vld [vmem:[#allocation9 + $0x6e0] ss:$8 sps:$4 sm:$0xff]  }
 0x425   :  { %6927 = vmatprep.subr.bf16.mxu0 %v9525_v48  ;;  %v9595_v40 = vld [vmem:[#allocation9 + $0x7e0] ss:$8 sps:$4 sm:$0xff]   ;;  %v9600_v48 = vld [vmem:[#allocation9 + $0x6d4] ss:$8 sps:$4 sm:$0xff]  }
 0x427   :  { %6887 = vmatpush2.bf16.msra.mxu1 %v9520_v8  ;;  %v9603_v8 = vld [vmem:[#allocation9 + $0x7d4] ss:$8 sps:$4 sm:$0xff]  }
 0x428   :  { %6928 = vmatpush2.bf16.msra.mxu0 %v9523_v47  ;;  %6888 = vmatprep.subr.bf16.mxu1 %v9528_v36  ;;  %v9598_v47 = vld [vmem:[#allocation9 + $0x6d0] ss:$8 sps:$4 sm:$0xff]  }
 0x429   :  { %6929 = vmatprep.subr.bf16.mxu0 %v9531_v9  ;;  %v9601_v36 = vld [vmem:[#allocation9 + $0x7d0] ss:$8 sps:$4 sm:$0xff]   ;;  %v9606_v9 = vld [vmem:[#allocation9 + $0x6c4] ss:$8 sps:$4 sm:$0xff]  }
 0x42b   :  { %6889 = vmatpush2.bf16.msra.mxu1 %v9526_v34  ;;  %v9609_v34 = vld [vmem:[#allocation9 + $0x7c4] ss:$8 sps:$4 sm:$0xff]  }
 0x42c   :  { %6930 = vmatpush2.bf16.msra.mxu0 %v9529_v60  ;;  %6890 = vmatprep.subr.bf16.mxu1 %v9534_v35  ;;  %v9604_v60 = vld [vmem:[#allocation9 + $0x6c0] ss:$8 sps:$4 sm:$0xff]  }
 0x42d   :  { %6931 = vmatprep.subr.bf16.mxu0 %v9537_v11  ;;  %v9607_v35 = vld [vmem:[#allocation9 + $0x7c0] ss:$8 sps:$4 sm:$0xff]   ;;  %v9612_v11 = vld [vmem:[#allocation9 + $0x6b4] ss:$8 sps:$4 sm:$0xff]  }
 0x42f   :  { %6891 = vmatpush2.bf16.msra.mxu1 %v9532_v12  ;;  %v9615_v12 = vld [vmem:[#allocation9 + $0x7b4] ss:$8 sps:$4 sm:$0xff]  }
 0x430   :  { %6932 = vmatpush2.bf16.msra.mxu0 %v9535_v56  ;;  %6942 = vmatprep.subr.bf16.mxu1 %v9540_v5  ;;  %v9610_v56 = vld [vmem:[#allocation9 + $0x6b0] ss:$8 sps:$4 sm:$0xff]   ;;  %v9618_v5 = vld [vmem:[#allocation9 + $0x6a4] ss:$8 sps:$4 sm:$0xff]  }
 0x431   :  { %6983 = vmatprep.subr.bf16.mxu0 %v9543_v41  ;;  %v9616_v41 = vld [vmem:[#allocation9 + $0x6a0] ss:$8 sps:$4 sm:$0xff]  }
 0x432   :  { %6893 = vmatmul.mubr.bf16.vlgmr.msra.gmra.mxu1 %v5140_v21  ;;  %v9622_v21 = vld [vmem:[#allocation9 + $0x690] ss:$8 sps:$4 sm:$0xff]  }
 0x433   :  { %6934 = vmatmul.mubr.bf16.vlgmr.msra.gmra.mxu0 %v5142_v26  ;;  %6943 = vmatpush1.bf16.msra.mxu1 %v9538_v17  ;;  %v9624_v17 = vld [vmem:[#allocation9 + $0x694] ss:$8 sps:$4 sm:$0xff]   ;;  %v9630_v26 = vld [vmem:[#allocation9 + $0x684] ss:$8 sps:$4 sm:$0xff]  }
 0x434   :  { %6974 = vmatprep.mubr.bf16.mxu1 %v5145_v20  ;;  %6984 = vmatpush1.bf16.msra.mxu0 %v9541_v59  ;;  %v9625_v59 = vld [vmem:[#allocation9 + $0x790] ss:$8 sps:$4 sm:$0xff]   ;;  %v9628_v20 = vld [vmem:[#allocation9 + $0x680] ss:$8 sps:$4 sm:$0xff]  }
 0x435   :  { %7015 = vmatprep.mubr.bf16.mxu0 %v5147_v3  ;;  %6944 = vmatprep.subr.bf16.mxu1 %v9546_v27  ;;  %v9633_v27 = vld [vmem:[#allocation9 + $0x784] ss:$8 sps:$4 sm:$0xff]   ;;  %v5098_v3 = vmax.f32 %v10283_v7, 0.0 }
 0x436   :  { %6985 = vmatprep.subr.bf16.mxu0 %v9549_v55  ;;  %v9631_v55 = vld [vmem:[#allocation9 + $0x780] ss:$8 sps:$4 sm:$0xff]  }
 0x437   :  { %6945 = vmatpush1.bf16.msra.mxu1 %v9544_v37  ;;  %v5404_v37 = vld [vmem:[#allocation10] sm:$0x3] }
 0x438   :  { %6986 = vmatpush1.bf16.msra.mxu0 %v9547_v6  ;;  %6946 = vmatprep.subr.bf16.mxu1 %v9552_v54  ;;  %v5130_v6 = vmax.f32 %v10289_v0, 0.0  ;;  %v5409_v54 = vrot.slane %v5404_v37, %v4896_v44 }
 0x439   :  { %6987 = vmatprep.subr.bf16.mxu0 %v9555_v13  ;;  %v5144_v13 = vpack.c.bf16 %v5098_v3, %v5098_v3  ;;  %v7142_v3 = vld [vmem:[%s10436_s8 + $0x30] sm:$0xff] }
 0x43b   :  { %6947 = vmatpush1.bf16.msra.mxu1 %v9550_v28  ;;  %v5146_v28 = vpack.c.bf16 %v5130_v6, %v5130_v6  ;;  %v7141_v6 = vld [vmem:[%s10436_s8 + $0x28] sm:$0xff] }
 0x43c   :  { %6988 = vmatpush1.bf16.msra.mxu0 %v9553_v1  ;;  %6948 = vmatprep.subr.bf16.mxu1 %v9558_v14  ;;  %v5413_v1 = vrot.slane %v5404_v37, %v4900_v62  ;;  %v7056_v62 = vld [vmem:[%s10434_s6 + $0xf0] sm:$0xff]  ;;  %v7026_v37 = vld [vmem:[%s10434_s6] sm:$0xff] }
 0x43d   :  { %6989 = vmatprep.subr.bf16.mxu0 %v9561_v2 }
 0x43f   :  { %6949 = vmatpush1.bf16.msra.mxu1 %v9556_v30 }
 0x440   :  { %6990 = vmatpush1.bf16.msra.mxu0 %v9559_v31  ;;  %6950 = vmatprep.subr.bf16.mxu1 %v9564_v32 }
 0x441   :  { %6991 = vmatprep.subr.bf16.mxu0 %v9567_v33 }
 0x443   :  { %6951 = vmatpush1.bf16.msra.mxu1 %v9562_v25 }
 0x444   :  { %6992 = vmatpush1.bf16.msra.mxu0 %v9565_v4  ;;  %6952 = vmatprep.subr.bf16.mxu1 %v9570_v38 }
 0x445   :  { %6993 = vmatprep.subr.bf16.mxu0 %v9573_v16  ;;  %v7057_v16 = vld [vmem:[%s10434_s6 + $0xf8] sm:$0xff] }
 0x447   :  { %6953 = vmatpush1.bf16.msra.mxu1 %v9568_v45  ;;  %v7040_v45 = vld [vmem:[%s10434_s6 + $0x70] sm:$0xff] }
 0x448   :  { %6994 = vmatpush1.bf16.msra.mxu0 %v9571_v23  ;;  %6954 = vmatprep.subr.bf16.mxu1 %v9576_v46  ;;  %v7055_v23 = vld [vmem:[%s10434_s6 + $0xe8] sm:$0xff] }
 0x449   :  { %6995 = vmatprep.subr.bf16.mxu0 %v9579_v49  ;;  %v7039_v46 = vld [vmem:[%s10434_s6 + $0x68] sm:$0xff]  ;;  %v7054_v49 = vld [vmem:[%s10434_s6 + $0xe0] sm:$0xff] }
 0x44b   :  { %6955 = vmatpush1.bf16.msra.mxu1 %v9574_v22  ;;  %v7038_v22 = vld [vmem:[%s10434_s6 + $0x60] sm:$0xff] }
 0x44c   :  { %6996 = vmatpush1.bf16.msra.mxu0 %v9577_v50  ;;  %6956 = vmatprep.subr.bf16.mxu1 %v9582_v18  ;;  %v7053_v50 = vld [vmem:[%s10434_s6 + $0xd8] sm:$0xff] }
 0x44d   :  { %6997 = vmatprep.subr.bf16.mxu0 %v9585_v51  ;;  %v7037_v18 = vld [vmem:[%s10434_s6 + $0x58] sm:$0xff]  ;;  %v7052_v51 = vld [vmem:[%s10434_s6 + $0xd0] sm:$0xff] }
 0x44f   :  { %6957 = vmatpush1.bf16.msra.mxu1 %v9580_v29  ;;  %v7036_v29 = vld [vmem:[%s10434_s6 + $0x50] sm:$0xff] }
 0x450   :  { %6998 = vmatpush1.bf16.msra.mxu0 %v9583_v43  ;;  %6958 = vmatprep.subr.bf16.mxu1 %v9588_v52  ;;  %v7051_v43 = vld [vmem:[%s10434_s6 + $0xc8] sm:$0xff] }
 0x451   :  { %6999 = vmatprep.subr.bf16.mxu0 %v9591_v53  ;;  %v7035_v52 = vld [vmem:[%s10434_s6 + $0x48] sm:$0xff]  ;;  %v7050_v53 = vld [vmem:[%s10434_s6 + $0xc0] sm:$0xff] }
 0x453   :  { %6959 = vmatpush2.bf16.msra.mxu1 %v9586_v57  ;;  %v7034_v57 = vld [vmem:[%s10434_s6 + $0x40] sm:$0xff] }
 0x454   :  { %7000 = vmatpush2.bf16.msra.mxu0 %v9589_v58  ;;  %6960 = vmatprep.subr.bf16.mxu1 %v9594_v42  ;;  %v7049_v58 = vld [vmem:[%s10434_s6 + $0xb8] sm:$0xff] }
 0x455   :  { %7001 = vmatprep.subr.bf16.mxu0 %v9597_v61  ;;  %v7033_v42 = vld [vmem:[%s10434_s6 + $0x38] sm:$0xff]  ;;  %v7048_v61 = vld [vmem:[%s10434_s6 + $0xb0] sm:$0xff] }
 0x457   :  { %6961 = vmatpush2.bf16.msra.mxu1 %v9592_v63  ;;  %v7032_v63 = vld [vmem:[%s10434_s6 + $0x30] sm:$0xff] }
 0x458   :  { %7002 = vmatpush2.bf16.msra.mxu0 %v9595_v40  ;;  %6962 = vmatprep.subr.bf16.mxu1 %v9600_v48  ;;  %v7047_v40 = vld [vmem:[%s10434_s6 + $0xa8] sm:$0xff] }
 0x459   :  { %7003 = vmatprep.subr.bf16.mxu0 %v9603_v8  ;;  %v7031_v48 = vld [vmem:[%s10434_s6 + $0x28] sm:$0xff] }
 0x45b   :  { %6963 = vmatpush2.bf16.msra.mxu1 %v9598_v47 }
 0x45c   :  { %7004 = vmatpush2.bf16.msra.mxu0 %v9601_v36  ;;  %6964 = vmatprep.subr.bf16.mxu1 %v9606_v9 }
 0x45d   :  { %7005 = vmatprep.subr.bf16.mxu0 %v9609_v34 }
 0x45f   :  { %6965 = vmatpush2.bf16.msra.mxu1 %v9604_v60 }
 0x460   :  { %7006 = vmatpush2.bf16.msra.mxu0 %v9607_v35  ;;  %6966 = vmatprep.subr.bf16.mxu1 %v9612_v11 }
 0x461   :  { %7007 = vmatprep.subr.bf16.mxu0 %v9615_v12 }
 0x463   :  { %6967 = vmatpush2.bf16.msra.mxu1 %v9610_v56 }
 0x464   :  { %7008 = vmatpush2.bf16.msra.mxu0 %v9613_v24  ;;  %6968 = vmatprep.subr.bf16.mxu1 %v9618_v5  ;;  %v7046_v24 = vld [vmem:[%s10434_s6 + $0xa0] sm:$0xff] }
 0x465   :  { %7009 = vmatprep.subr.bf16.mxu0 %v9621_v10  ;;  %v7030_v5 = vld [vmem:[%s10434_s6 + $0x20] sm:$0xff] }
 0x467   :  { %6969 = vmatpush2.bf16.msra.mxu1 %v9616_v41 }
 0x468   :  { %7010 = vmatpush2.bf16.msra.mxu0 %v9619_v15  ;;  %6970 = vmatprep.subr.bf16.mxu1 %v9624_v17  ;;  %v7045_v15 = vld [vmem:[%s10434_s6 + $0x98] sm:$0xff] }
 0x469   :  { %7011 = vmatprep.subr.bf16.mxu0 %v9627_v19  ;;  %v7029_v17 = vld [vmem:[%s10434_s6 + $0x18] sm:$0xff]  ;;  %v7044_v19 = vld [vmem:[%s10434_s6 + $0x90] sm:$0xff] }
 0x46b   :  { %6971 = vmatpush2.bf16.msra.mxu1 %v9622_v21  ;;  %v7028_v21 = vld [vmem:[%s10434_s6 + $0x10] sm:$0xff] }
 0x46c   :  { %7012 = vmatpush2.bf16.msra.mxu0 %v9625_v59  ;;  %6972 = vmatprep.subr.bf16.mxu1 %v9630_v26  ;;  %v7043_v59 = vld [vmem:[%s10434_s6 + $0x88] sm:$0xff] }
 0x46d   :  { %7013 = vmatprep.subr.bf16.mxu0 %v9633_v27  ;;  %v7027_v26 = vld [vmem:[%s10434_s6 + $0x8] sm:$0xff]  ;;  %v7143_v27 = vld [vmem:[%s10436_s8 + $0x38] sm:$0xff] }
 0x46f   :  { %6973 = vmatpush2.bf16.msra.mxu1 %v9628_v20  ;;  %v7042_v20 = vld [vmem:[%s10434_s6 + $0x80] sm:$0xff] }
 0x470   :  { %7014 = vmatpush2.bf16.msra.mxu0 %v9631_v55  ;;  %8197 = vmatprep.subr.mxu1 %v7057_v16  ;;  %v9807_v55 = vmov 0.0  }
 0x471   :  { %8241 = vmatprep.subr.mxu0 %v9807_v55 }
 0x472   :  { %6975 = vmatmul.mubr.bf16.vlgmr.msra.gmra.mxu1 %v5144_v13  ;;  %v6730_v14 = vpop.f32.mrf.mxu1 }
 0x473   :  { %7016 = vmatmul.mubr.bf16.vlgmr.msra.gmra.mxu0 %v5146_v28  ;;  %v6731_v2 = vadd.f32 %v6730_v14, %v5409_v54  ;;  %v6771_v30 = vpop.f32.mrf.mxu0  ;;  %8198 = vmatpush3.msra.mxu1 %v7041_v39 }
 0x474   :  { %v6732_v7 = vpop.f32.mrf.mxu1  ;;  %8199 = vmatprep.subr.mxu1 %v7056_v62  ;;  %8242 = vmatpush3.msra.mxu0 %v7143_v27 }
 0x475   :  { %v6772_v31 = vadd.f32 %v6771_v30, %v6731_v2  ;;  %v6733_v32 = vadd.f32 %v6732_v7, %v5413_v1  ;;  %v6773_v33 = vpop.f32.mrf.mxu0  ;;  %8200 = vmatpush3.msra.mxu1 %v7040_v45  ;;  %8243 = vmatprep.subr.mxu0 %v9807_v55 }
 0x476   :  { %v6734_v0 = vpop.f32.mrf.mxu1  ;;  %8201 = vmatprep.subr.mxu1 %v7055_v23  ;;  %8244 = vmatpush3.msra.mxu0 %v7142_v3 }
 0x477   :  { %v6774_v25 = vadd.f32 %v6773_v33, %v6733_v32  ;;  %v6775_v4 = vpop.f32.mrf.mxu0  ;;  %8202 = vmatpush3.msra.mxu1 %v7039_v46  ;;  %8245 = vmatprep.subr.mxu0 %v9807_v55 }
 0x478   :  { %v6735_v38 = vpop.f32.mrf.mxu1  ;;  %8203 = vmatprep.subr.mxu1 %v7054_v49  ;;  %8246 = vmatpush3.msra.mxu0 %v7141_v6 }
 0x479   :  { %v6776_v44 = vpop.f32.mrf.mxu0  ;;  %8204 = vmatpush3.msra.mxu1 %v7038_v22  ;;  %8247 = vmatprep.subr.mxu0 %v9807_v55 }
 0x47a   :  { %8205 = vmatprep.subr.mxu1 %v7053_v50  ;;  %8257 = vmatprep.mubr.msk.f32.mxu0 %vm9808_vm2, %v9807_v55 }
 0x47b   :  { %8206 = vmatpush3.msra.mxu1 %v7037_v18 }
 0x47c   :  { %8207 = vmatprep.subr.mxu1 %v7052_v51  ;;  %v7140_v51 = vld [vmem:[%s10436_s8 + $0x20] sm:$0xff] }
 0x47d   :  { %8208 = vmatpush3.msra.mxu1 %v7036_v29  ;;  %8248 = vmatpush3.msra.mxu0 %v7140_v51  ;;  %v7139_v29 = vld [vmem:[%s10436_s8 + $0x18] sm:$0xff] }
 0x47e   :  { %8209 = vmatprep.subr.mxu1 %v7051_v43  ;;  %8249 = vmatprep.subr.mxu0 %v9807_v55  ;;  %v7138_v43 = vld [vmem:[%s10436_s8 + $0x10] sm:$0xff] }
 0x47f   :  { %8210 = vmatpush3.msra.mxu1 %v7035_v52  ;;  %8250 = vmatpush3.msra.mxu0 %v7139_v29  ;;  %v7137_v52 = vld [vmem:[%s10436_s8 + $0x8] sm:$0xff] }
 0x480   :  { %8211 = vmatprep.subr.mxu1 %v7050_v53  ;;  %8251 = vmatprep.subr.mxu0 %v9807_v55  ;;  %v7136_v53 = vld [vmem:[%s10436_s8] sm:$0xff]  ;;  %s9766_s8 = scalar_lea.vmem %s7235_s29, 32 }
 0x481   :  { %8212 = vmatpush3.msra.mxu1 %v7034_v57  ;;  %8252 = vmatpush3.msra.mxu0 %v7138_v43  ;;  %p9767_p7 = scmp.ne.s32.totalorder %s7235_s29, %s9766_s8  ;;  %p9772_p9 = scmp.lt.s32.totalorder %s9766_s8, %s9766_s8 }
 0x482   :  { %8213 = vmatprep.subr.mxu1 %v7049_v58  ;;  %8253 = vmatprep.subr.mxu0 %v9807_v55  ;;  %v8194_v58 = vld [vmem:[#allocation12] ss:$0 sm:$0xff] }
 0x483   :  { %8214 = vmatpush3.msra.mxu1 %v7033_v42  ;;  %8254 = vmatpush3.msra.mxu0 %v7137_v52  ;;  %p9773_p10 = por %p9772_p9, %p9771_p8 }
 0x484   :  { %8215 = vmatprep.subr.mxu1 %v7048_v61  ;;  %8255 = vmatprep.subr.mxu0 %v9807_v55 }
 0x485   :  { %8216 = vmatpush3.msra.mxu1 %v7032_v63  ;;  %8256 = vmatpush3.msra.mxu0 %v7136_v53  ;;  %p9774_p11 = pnand %p9773_p10, %p9767_p7 }
 0x486   :  { %8217 = vmatprep.subr.mxu1 %v7047_v40 }
 0x487   :  { %8218 = vmatpush3.msra.mxu1 %v7031_v48  ;;  %v8195_v48 = vld [vmem:[#allocation13] ss:$0 sm:$0xff] }
 0x488   :  { %8219 = vmatprep.subr.mxu1 %v7046_v24 }
 0x489   :  { %8220 = vmatpush3.msra.mxu1 %v7030_v5 }
 0x48a   :  { %8221 = vmatprep.subr.mxu1 %v7045_v15 }
 0x48b   :  { %8222 = vmatpush3.msra.mxu1 %v7029_v17 }
 0x48c   :  { %8223 = vmatprep.subr.mxu1 %v7044_v19 }
 0x48d   :  { %8224 = vmatpush3.msra.mxu1 %v7028_v21 }
 0x48e   :  { %8225 = vmatprep.subr.mxu1 %v7043_v59 }
 0x48f   :  { %8226 = vmatpush3.msra.mxu1 %v7027_v26 }
 0x490   :  { %8227 = vmatprep.subr.mxu1 %v7042_v20 }
 0x491   :  { %8228 = vmatpush3.msra.mxu1 %v7026_v37 }
 0x4b2   :  { %v6812_v8 = vpop.f32.mrf.mxu1 }
 0x4b3   :  { %v6813_v47 = vadd.f32 %v6812_v8, %v6772_v31  ;;  %v6853_v36 = vpop.f32.mrf.mxu0 }
 0x4b4   :  { %v6814_v9 = vpop.f32.mrf.mxu1 }
 0x4b5   :  { %v6854_v34 = vadd.f32 %v6853_v36, %v6813_v47  ;;  %v6815_v60 = vadd.f32 %v6814_v9, %v6774_v25  ;;  %v6855_v35 = vpop.f32.mrf.mxu0 }
 0x4b6   :  { %v6816_v11 = vpop.f32.mrf.mxu1 }
 0x4b7   :  { %v6856_v12 = vadd.f32 %v6855_v35, %v6815_v60  ;;  %v6857_v56 = vpop.f32.mrf.mxu0 }
 0x4b8   :  { %v6817_v10 = vpop.f32.mrf.mxu1 }
 0x4b9   :  { %v6858_v41 = vpop.f32.mrf.mxu0 }
 0x4f2   :  { %v6894_v54 = vpop.f32.mrf.mxu1 }
 0x4f3   :  { %v6895_v13 = vadd.f32 %v6894_v54, %v6854_v34  ;;  %v6935_v28 = vpop.f32.mrf.mxu0 }
 0x4f4   :  { %v6896_v1 = vpop.f32.mrf.mxu1 }
 0x4f5   :  { %v6936_v14 = vadd.f32 %v6935_v28, %v6895_v13  ;;  %v6937_v2 = vpop.f32.mrf.mxu0  ;;  %v6897_v33 = vadd.f32 %v6896_v1, %v6856_v12 }
 0x4f6   :  { %v6898_v30 = vpop.f32.mrf.mxu1 }
 0x4f7   :  { %v6939_v7 = vpop.f32.mrf.mxu0  ;;  %v6938_v25 = vadd.f32 %v6937_v2, %v6897_v33 }
 0x4f8   :  { %v6899_v31 = vpop.f32.mrf.mxu1 }
 0x4f9   :  { %v6940_v32 = vpop.f32.mrf.mxu0 }
 0x532   :  { %v6976_v0 = vpop.f32.mrf.mxu1 }
 0x533   :  { %v6977_v4 = vadd.f32 %v6976_v0, %v6936_v14  ;;  %v7017_v38 = vpop.f32.mrf.mxu0 }
 0x534   :  { %v6978_v44 = vpop.f32.mrf.mxu1 }
 0x535   :  { %v6979_v16 = vadd.f32 %v6978_v44, %v6938_v25  ;;  %v7019_v39 = vpop.f32.mrf.mxu0  ;;  %v7018_v62 = vadd.f32 %v7017_v38, %v6977_v4 }
 0x536   :  { %v6980_v45 = vpop.f32.mrf.mxu1 }
 0x537   :  { %v7020_v23 = vadd.f32 %v7019_v39, %v6979_v16  ;;  %v7021_v46 = vpop.f32.mrf.mxu0  ;;  %v7024_v18 = vmax.f32 %v7018_v62, 0.0 }
 0x538   :  { %v6981_v49 = vpop.f32.mrf.mxu1 }
 0x539   :  { %v7025_v22 = vmax.f32 %v7020_v23, 0.0  ;;  %v7022_v50 = vpop.f32.mrf.mxu0 }
 0x53b   :  { %7129 = vmatprep.mubr.f32.mxu1 %v7025_v22 }
 0x53c   :  { %7130 = vmatmul.mubr.f32.vlgmr.msra.gmra.mxu1 %v7024_v18 }
 0x5fc   :  { %v8229_v57 = vpop.f32.mrf.mxu1 }
 0x5fe   :  { %v8230_v42 = vpop.f32.mrf.mxu1 }
 0x5ff   :  { %v8231_v61 = vadd.f32 %v8230_v42, %v8229_v57 }
 0x601   :  { %v7132_v63 = vadd.f32 %v8231_v61, %v8194_v58 }
 0x603   :  { %v7135_v40 = vmax.f32 %v7132_v63, 0.0 }
 0x605   :  { %8258 = vmatmul.mubr.msk.f32.vlgmr.msra.gmra.mxu0 %vm7151_vm3, %v7135_v40 }
 0x6c5   :  { %v7221_v8 = vpop.f32.mrf.mxu0 }
 0x6c6   :  { %v7222_v47 = vadd.f32 %v8195_v48, %v7221_v8 }
 0x6c7   :  { %v8259_v36 = vpop.f32.mrf.mxu0 }
 0x6c8   :  { %v7225_v9 = vmax.f32 %v7222_v47, 0.0 }
 0x6ca   :  { %7227 = vst.msk [vmem:[#allocation15] sm:$0x3] %vm7226_vm4, %v7225_v9 }
 0x6cb   :  { %9777 = shalt.err (!%p9774_p11)
}
 0x6cc   :  { %7237 = dma.vmem_to_hbm [thread:$0]  %s7235_s29, 32, %s10438_s10, [#allocation4]  }
 0x6cd   :  { %9796 = dma.done.wait [#allocation4], 32  }
 0x6ce   :  { %9797 = vsyncadd [#allocation4], 4294967264 }
 0x6cf   :  { %7241 = vsyncpa [#allocation3], 1 }
 0x6d0   :  { %7242 = vsyncpa [#allocation8], 1 }
 0x6d1   :  { %7243 = vsyncpa [#allocation11], 1 }
 0x6d2   :  { %7244 = vsyncpa [#allocation14], 1 }
 0x6d3   :  { %7245 = vsyncpa [#allocation4], 1 }
 0x6d4   :  { %7246 = vsyncpa [#allocation5], 1 }

</bundles_post_ra>
